<compile_context>
chip_gen: v7x
topology: tpu7x:2x2x1
jax: 0.10.0
libtpu: 0.0.40
codegen_flags: <defaults>
</compile_context>

<pallas_src>
import math
import functools

import jax
import jax.numpy as jnp
import numpy as np
from jax.experimental import pallas as pl
from jax.experimental.pallas import tpu as pltpu


def _dot(a, b):
    # bf16 x bf16 -> f32 MXU matmul (weights may already be bf16; astype is then a no-op).
    return jnp.dot(a.astype(jnp.bfloat16), b.astype(jnp.bfloat16),
                   preferred_element_type=jnp.float32)


# ----------------------------------------------------------------------------- kernel ---

def _node_edge_block_kernel(tq, lane_dense, compute_dtype, inv_sqrt_df,
                            x_ref, e_ref, m_ref,
                            ye1_ref, ye2p1_ref, yx1_ref, yx2p1_ref,
                            wq_ref, bq_ref, wkv_ref, bkv_ref,
                            we12_ref, be12_ref, weo_ref, beo_ref,
                            wxo_ref, bxo_ref,
                            newx_ref, newe_ref, se_ref):
    n, dx = x_ref.shape
    de = e_ref.shape[-1]
    f32 = jnp.float32
    cdt = compute_dtype

    q_off = pl.multiple_of(pl.program_id(1) * tq, tq)

    X = x_ref[...]                                    # (n, dx)  key/value source
    xm = m_ref[...]                                   # (n, 1)   key-side node mask
    Xq = x_ref[pl.ds(q_off, tq), :]                   # (tq, dx) query rows of this tile
    xm_q = m_ref[pl.ds(q_off, tq), :]                 # (tq, 1)

    # K / V for all n keys, recomputed per row tile (one small (n,dx)x(dx,2dx) matmul).
    KV = (_dot(X, wkv_ref[...]) + bkv_ref[...]) * xm               # (n, 2dx) f32
    K = KV[:, 0:dx].astype(cdt)
    V = KV[:, dx:2 * dx].astype(cdt)

    # Q only for the tq query rows; node mask and 1/sqrt(df) fused into one (tq,1) scale,
    # so no O(n^2*dx) scale multiply is ever issued.
    Q = ((_dot(Xq, wq_ref[...]) + bq_ref[...]) * (xm_q * inv_sqrt_df)).astype(cdt)

    # Fused e_mul|e_add projection of the E row slab. The pair mask is NOT applied here:
    # masked (i,j) pairs are handled by the additive softmax key mask below and the final
    # pair mask on newE (E2 stays O(1), far below the 1e30 mask scale).
    Eblk = e_ref[...]                                  # (tq, n, de) f32
    Ef = Eblk.reshape(tq * n, de)
    E12 = (_dot(Ef, we12_ref[...]) + be12_ref[...]).astype(cdt)    # (tq*n, 2dx)
    E1 = E12[:, 0:dx].reshape(tq, n, dx)
    E2 = E12[:, dx:2 * dx].reshape(tq, n, dx)

    # Unnormalized attention tensor (per-channel; heads only enter via 1/sqrt(df)).
    Y = Q.reshape(tq, 1, dx) * K.reshape(1, n, dx)     # (tq, n, dx) in compute_dtype
    Y = Y * (E1 + 1.0) + E2

    # --- edge-output branch: FiLM by y, e_out projection, pair mask ---
    ye1 = ye1_ref[...].astype(cdt).reshape(1, 1, dx)
    ye2p1 = ye2p1_ref[...].astype(cdt).reshape(1, 1, dx)           # (ye2 + 1) precomputed
    Eo_in = (ye1 + ye2p1 * Y).reshape(tq * n, dx)
    em = xm_q.reshape(tq, 1, 1) * xm.reshape(1, n, 1)              # (tq, n, 1) pair mask
    newE = (_dot(Eo_in, weo_ref[...]) + beo_ref[...]).reshape(tq, n, de) * em
    if lane_dense:
        # Lane-dense (n*de wide) output slab -> unmasked vector stores even when de < 128.
        newe_ref[...] = newE.reshape(tq, n * de)
    else:
        newe_ref[...] = newE

    # --- node-output branch: masked softmax over keys (post-normalized) ---
    neg = ((xm - 1.0) * 1e30).astype(cdt).reshape(1, n, 1)   # 0 valid, -1e30 masked key
    Ym = Y + neg
    expY = jnp.exp(Ym - jnp.max(Ym, axis=1, keepdims=True))        # (tq, n, dx)
    denom = jnp.sum(expY, axis=1, dtype=f32)                       # f32 accumulation
    wV = jnp.sum(expY * V.reshape(1, n, dx), axis=1, dtype=f32)    # f32 accumulation
    wV = wV * pl.reciprocal(denom, approx=True)                    # EUP slot, not VALU
    # TODO(synk): graphs whose node_mask is all-zero fall through to a uniform softmax
    # over zeroed V instead of PyTorch masked_softmax's early return (newX is 0 either way).

    newX = yx1_ref[...] + yx2p1_ref[...] * wV                      # (tq, dx) f32
    newx_ref[...] = (_dot(newX, wxo_ref[...]) + bxo_ref[...]) * xm_q

    # --- per-tile pooled E statistics (sum/min/max/sumsq), single 4-row store ---
    se_ref[...] = jnp.concatenate(
        [jnp.sum(Ef, axis=0, keepdims=True),
         jnp.min(Ef, axis=0, keepdims=True),
         jnp.max(Ef, axis=0, keepdims=True),
         jnp.sum(Ef * Ef, axis=0, keepdims=True)], axis=0)


# ----------------------------------------------------------------------- configuration ---

def _default_compute_dtype():
    """bf16 elementwise chain only on chips with bf16 VALU/EUP (v6e / v7x)."""
    try:
        kind = jax.devices()[0].device_kind.lower()
    except Exception:
        return jnp.float32
    if "tpu" not in kind:
        return jnp.float32
    for old in ("v2", "v3", "v4", "v5"):
        if old in kind:
            return jnp.float32
    return jnp.bfloat16


def _vmem_capacity_bytes():
    try:
        return int(pltpu.get_tpu_info().vmem_capacity_bytes)
    except Exception:
        return 64 * 1024 * 1024          # conservative (v7x per-TensorCore VMEM)


def _padded_size(shape):
    s = list(shape)
    if len(s) == 1:
        s = [1] + s
    s[-1] = -(-s[-1] // 128) * 128
    s[-2] = -(-s[-2] // 8) * 8
    out = 1
    for d in s:
        out *= int(d)
    return out


def _vmem_estimate_bytes(n, dx, de, tq, cbytes):
    """Per-grid-step VMEM: double-buffered pipeline blocks + weights + live temporaries."""
    p = _padded_size
    io = 4 * (p((n, dx)) + p((tq, n, de)) + p((n, 1)) + 4 * p((1, dx))
              + p((tq, dx)) + p((tq, n, de)) + p((4, de)))
    w = 2 * (2 * p((dx, dx)) + p((dx, 2 * dx)) + p((de, 2 * dx)) + p((dx, de))) \
        + 4 * (2 * p((1, dx)) + 2 * p((1, 2 * dx)) + p((1, de)))
    tmp = cbytes * (6 * p((tq, n, dx)) + p((tq * n, 2 * dx))) \
        + 4 * (2 * p((tq * n, de)) + p((n, 2 * dx)) + 2 * p((tq, dx)))
    return 2 * (io + w) + tmp


def _pick_tq(n, dx, de, cbytes, cap):
    budget = int(0.35 * cap)
    cands = [n] + [c for c in (512, 256, 128, 64, 32, 16, 8) if c < n and n % c == 0]
    for c in cands:
        if _vmem_estimate_bytes(n, dx, de, c, cbytes) <= budget:
            return c
    return cands[-1]


# ---------------------------------------------------------------------------- wrapper ---

_LANE_DENSE_OK = None      # cache: does the lane-dense newE reshape lower on this build?


def node_edge_block(X, E, y, node_mask, params, n_head, *, tq=None, compute_dtype=None):
    bs, n, dx = X.shape
    de = E.shape[-1]
    assert dx % n_head == 0
    f32, bf16 = jnp.float32, jnp.bfloat16

    X = X.astype(f32)
    E = E.astype(f32)
    y = y.astype(f32)
    xm = node_mask.astype(f32).reshape(bs, n, 1)

    if compute_dtype is None:
        compute_dtype = _default_compute_dtype()
    cbytes = 2 if compute_dtype == bf16 else 4
    cap = _vmem_capacity_bytes()
    if tq is None:
        tq = _pick_tq(n, dx, de, cbytes, cap)
    assert n % tq == 0 and (tq % 8 == 0 or tq == n), (n, tq)
    n_tiles = n // tq
    inv_sqrt_df = 1.0 / math.sqrt(dx // n_head)

    def lin(v, w, b):
        return _dot(v, w) + b

    # y-conditioned FiLM projections hoisted out of the kernel; the "+1" folded in here.
    ye1 = lin(y, params["wyea"], params["byea"]).reshape(bs, 1, dx)
    ye2p1 = (lin(y, params["wyem"], params["byem"]) + 1.0).reshape(bs, 1, dx)
    yx1 = lin(y, params["wyxa"], params["byxa"]).reshape(bs, 1, dx)
    yx2p1 = (lin(y, params["wyxm"], params["byxm"]) + 1.0).reshape(bs, 1, dx)

    # Weights cast to bf16 once (half the weight DMA / VMEM, no per-step pack ops);
    # biases stay f32 so the f32 accumulators are unchanged.  k|v and e_mul|e_add fused.
    w_q = params["wq"].astype(bf16)
    b_q = params["bq"]
    w_kv = jnp.concatenate([params["wk"], params["wv"]], axis=1).astype(bf16)
    b_kv = jnp.concatenate([params["bk"], params["bv"]], axis=1)
    w_e12 = jnp.concatenate([params["wem"], params["wea"]], axis=1).astype(bf16)
    b_e12 = jnp.concatenate([params["bem"], params["bea"]], axis=1)
    w_eo = params["weo"].astype(bf16)
    b_eo = params["beo"]
    w_xo = params["wxo"].astype(bf16)
    b_xo = params["bxo"]
    # TODO(synk): for production configs keep dx a multiple of 128 so the 0:dx / dx:2dx
    # lane splits of the fused KV / E12 projections land on (8,128) tile boundaries.
    weights = (w_q, b_q, w_kv, b_kv, w_e12, b_e12, w_eo, b_eo, w_xo, b_xo)

    def _full(a):
        return pl.BlockSpec(a.shape, lambda b, r: (0, 0))

    in_specs = [
        pl.BlockSpec((None, n, dx), lambda b, r: (b, 0, 0)),         # X (full, keys/values)
        pl.BlockSpec((None, tq, n, de), lambda b, r: (b, r, 0, 0)),  # E row slab
        pl.BlockSpec((None, n, 1), lambda b, r: (b, 0, 0)),          # node mask
        pl.BlockSpec((None, 1, dx), lambda b, r: (b, 0, 0)),         # ye1
        pl.BlockSpec((None, 1, dx), lambda b, r: (b, 0, 0)),         # ye2 + 1
        pl.BlockSpec((None, 1, dx), lambda b, r: (b, 0, 0)),         # yx1
        pl.BlockSpec((None, 1, dx), lambda b, r: (b, 0, 0)),         # yx2 + 1
    ] + [_full(w) for w in weights]

    newx_spec = pl.BlockSpec((None, tq, dx), lambda b, r: (b, r, 0))
    se_spec = pl.BlockSpec((None, None, 4, de), lambda b, r: (b, r, 0, 0))
    newx_shape = jax.ShapeDtypeStruct((bs, n, dx), f32)
    se_shape = jax.ShapeDtypeStruct((bs, n_tiles, 4, de), f32)

    est = _vmem_estimate_bytes(n, dx, de, tq, cbytes)
    vmem_limit = int(min(0.75 * cap, max(32 * 1024 * 1024, 1.5 * est)))

    def call(lane_dense):
        if lane_dense:
            newe_spec = pl.BlockSpec((None, tq, n * de), lambda b, r: (b, r, 0))
            newe_shape = jax.ShapeDtypeStruct((bs, n, n * de), f32)
        else:
            newe_spec = pl.BlockSpec((None, tq, n, de), lambda b, r: (b, r, 0, 0))
            newe_shape = jax.ShapeDtypeStruct((bs, n, n, de), f32)
        out = pl.pallas_call(
            functools.partial(_node_edge_block_kernel, tq, lane_dense, compute_dtype,
                              inv_sqrt_df),
            grid=(bs, n_tiles),
            in_specs=in_specs,
            out_specs=(newx_spec, newe_spec, se_spec),
            out_shape=(newx_shape, newe_shape, se_shape),
            compiler_params=pltpu.CompilerParams(
                dimension_semantics=("parallel", "parallel"),
                vmem_limit_bytes=vmem_limit),
        )(X, E, xm, ye1, ye2p1, yx1, yx2p1, *weights)
        return jax.block_until_ready(out)

    global _LANE_DENSE_OK
    newX = newE = stats_e = None
    if _LANE_DENSE_OK in (None, True):
        try:
            newX, newE_raw, stats_e = call(True)
            newE = newE_raw.reshape(bs, n, n, de)
            _LANE_DENSE_OK = True
        except Exception:
            _LANE_DENSE_OK = False      # minor-dim-merging reshape not lowerable here
    if _LANE_DENSE_OK is False:
        newX, newE, stats_e = call(False)

    # --- global feature update: finish stats reductions + small linears in XLA ---
    Xm = X.mean(axis=1)
    x_stats = jnp.concatenate(
        [Xm, X.min(axis=1), X.max(axis=1),
         jnp.sqrt(((X - Xm[:, None, :]) ** 2).sum(axis=1) / (n - 1))], axis=-1)

    tot = float(n * n)
    e_sum = stats_e[:, :, 0, :].sum(axis=1)
    e_min = stats_e[:, :, 1, :].min(axis=1)
    e_max = stats_e[:, :, 2, :].max(axis=1)
    e_ssq = stats_e[:, :, 3, :].sum(axis=1)
    e_mean = e_sum / tot
    e_std = jnp.sqrt(jnp.maximum(e_ssq - tot * e_mean * e_mean, 0.0) / (tot - 1.0))
    e_stats = jnp.concatenate([e_mean, e_min, e_max, e_std], axis=-1)

    new_y = (lin(y, params["wyy"], params["byy"])
             + lin(x_stats, params["wxy"], params["bxy"])
             + lin(e_stats, params["wey"], params["bey"]))
    new_y = lin(jnp.maximum(lin(new_y, params["wy0"], params["by0"]), 0.0),
                params["wy1"], params["by1"])
    return newX, newE, new_y


# -------------------------------------------------------------------------- reference ---

def reference(X, E, y, node_mask, P, n_head):
    """Pure-JAX reference reproducing the PyTorch forward (same bf16 matmul precision)."""
    bs, n, dx = X.shape
    df = dx // n_head

    def lin(x, w, b):
        return _dot(x, w) + b

    xm = node_mask.astype(jnp.float32)[..., None]
    em = xm[:, :, None, :] * xm[:, None, :, :]

    Q = lin(X, P["wq"], P["bq"]) * xm
    K = lin(X, P["wk"], P["bk"]) * xm
    V = lin(X, P["wv"], P["bv"]) * xm

    Y = Q[:, :, None, :] * K[:, None, :, :] / math.sqrt(df)
    E1 = lin(E, P["wem"], P["bem"]) * em
    E2 = lin(E, P["wea"], P["bea"]) * em
    Y = Y * (E1 + 1.0) + E2

    ye1 = lin(y, P["wyea"], P["byea"])[:, None, None, :]
    ye2 = lin(y, P["wyem"], P["byem"])[:, None, None, :]
    newE = ye1 + (ye2 + 1.0) * Y
    newE = lin(newE, P["weo"], P["beo"]) * em

    mask_j = xm[:, None, :, :]
    Ym = jnp.where(mask_j > 0, Y, -1e30)
    expY = jnp.exp(Ym - Ym.max(axis=2, keepdims=True))
    attn = expY / expY.sum(axis=2, keepdims=True)
    wV = (attn * V[:, None, :, :]).sum(axis=2)

    yx1 = lin(y, P["wyxa"], P["byxa"])[:, None, :]
    yx2 = lin(y, P["wyxm"], P["byxm"])[:, None, :]
    newX = yx1 + (yx2 + 1.0) * wV
    newX = lin(newX, P["wxo"], P["bxo"]) * xm

    yy = lin(y, P["wyy"], P["byy"])
    m = X.mean(axis=1)
    std = jnp.sqrt(((X - m[:, None, :]) ** 2).sum(axis=1) / (n - 1))
    x_y = lin(jnp.concatenate([m, X.min(axis=1), X.max(axis=1), std], axis=-1),
              P["wxy"], P["bxy"])

    Ef = E.reshape(bs, n * n, -1)
    me = Ef.mean(axis=1)
    stde = jnp.sqrt(((Ef - me[:, None, :]) ** 2).sum(axis=1) / (n * n - 1))
    e_y = lin(jnp.concatenate([me, Ef.min(axis=1), Ef.max(axis=1), stde], axis=-1),
              P["wey"], P["bey"])

    new_y = yy + x_y + e_y
    new_y = lin(jnp.maximum(lin(new_y, P["wy0"], P["by0"]), 0.0), P["wy1"], P["by1"])
    return newX, newE, new_y


def init_params(key, dx, de, dy):
    """Deterministic synthetic parameters (weights stored as (in, out), bias (1, out))."""
    layer_dims = {
        "q": (dx, dx), "k": (dx, dx), "v": (dx, dx),
        "em": (de, dx), "ea": (de, dx),
        "yem": (dy, dx), "yea": (dy, dx), "yxm": (dy, dx), "yxa": (dy, dx),
        "yy": (dy, dy),
        "xy": (4 * dx, dy), "ey": (4 * de, dy),
        "xo": (dx, dx), "eo": (dx, de),
        "y0": (dy, dy), "y1": (dy, dy),
    }
    params = {}
    keys = jax.random.split(key, 2 * len(layer_dims))
    for i, (name, (fi, fo)) in enumerate(layer_dims.items()):
        bound = 1.0 / math.sqrt(fi)
        params["w" + name] = jax.random.uniform(
            keys[2 * i], (fi, fo), jnp.float32, -bound, bound)
        params["b" + name] = jax.random.uniform(
            keys[2 * i + 1], (1, fo), jnp.float32, -bound, bound)
    return params


if __name__ == "__main__":
    bs, n, dx, de, dy, n_head = 2, 16, 32, 16, 16, 4
    tq = 8          # 2 row tiles per graph -> grid (2, 2); exercises the tiled path

    root = jax.random.PRNGKey(0)
    kp, kx, ke, ky = jax.random.split(root, 4)
    params = init_params(kp, dx, de, dy)

    X = jax.random.normal(kx, (bs, n, dx), jnp.float32)
    E = jax.random.normal(ke, (bs, n, n, de), jnp.float32)
    y = jax.random.normal(ky, (bs, dy), jnp.float32)
    node_mask = jnp.array([[1.0] * n, [1.0] * 11 + [0.0] * (n - 11)], jnp.float32)

    refs = reference(X, E, y, node_mask, params, n_head)

    # f32 elementwise path: tight check (only approx-reciprocal / association differences).
    outs = jax.block_until_ready(
        node_edge_block(X, E, y, node_mask, params, n_head, tq=tq,
                        compute_dtype=jnp.float32))
    for got, want in zip(outs, refs):
        np.testing.assert_allclose(np.asarray(got), np.asarray(want),
                                   rtol=3e-3, atol=3e-3)

    # bf16 elementwise path (v6e / v7x VALU+EUP win): loose sanity check only, since the
    # reference keeps the attention chain in f32.
    if _default_compute_dtype() == jnp.bfloat16:
        outs_bf = jax.block_until_ready(
            node_edge_block(X, E, y, node_mask, params, n_head, tq=tq,
                            compute_dtype=jnp.bfloat16))
        for got, want in zip(outs_bf, refs):
            np.testing.assert_allclose(np.asarray(got), np.asarray(want),
                                       rtol=1e-1, atol=1.5e-1)

    print("KERNEL_OK")
</pallas_src>

<mosaic_0001>
module attributes {stable_mosaic.version = 11 : i64} {
  func.func @_node_edge_block_kernel(%arg0: i32, %arg1: i32, %arg2: memref<1x16x32xf32, #tpu.memory_space<vmem>>, %arg3: memref<1x8x16x16xf32, #tpu.memory_space<vmem>>, %arg4: memref<1x16x1xf32, #tpu.memory_space<vmem>>, %arg5: memref<1x1x32xf32, #tpu.memory_space<vmem>>, %arg6: memref<1x1x32xf32, #tpu.memory_space<vmem>>, %arg7: memref<1x1x32xf32, #tpu.memory_space<vmem>>, %arg8: memref<1x1x32xf32, #tpu.memory_space<vmem>>, %arg9: memref<32x32xbf16, #tpu.memory_space<vmem>>, %arg10: memref<1x32xf32, #tpu.memory_space<vmem>>, %arg11: memref<32x64xbf16, #tpu.memory_space<vmem>>, %arg12: memref<1x64xf32, #tpu.memory_space<vmem>>, %arg13: memref<16x64xbf16, #tpu.memory_space<vmem>>, %arg14: memref<1x64xf32, #tpu.memory_space<vmem>>, %arg15: memref<32x16xbf16, #tpu.memory_space<vmem>>, %arg16: memref<1x16xf32, #tpu.memory_space<vmem>>, %arg17: memref<32x32xbf16, #tpu.memory_space<vmem>>, %arg18: memref<1x32xf32, #tpu.memory_space<vmem>>, %arg19: memref<1x8x32xf32, #tpu.memory_space<vmem>>, %arg20: memref<1x8x256xf32, #tpu.memory_space<vmem>>, %arg21: memref<1x1x4x16xf32, #tpu.memory_space<vmem>>) attributes {dimension_semantics = [#tpu.dimension_semantics<parallel>, #tpu.dimension_semantics<parallel>], iteration_bounds = array<i64: 2, 2>, scalar_prefetch = 0 : i64, scratch_operands = 0 : i64, tpu.core_type = #tpu.core_type<tc>, window_params = [{transform_indices = @transform_0, window_bounds = array<i64: 1, 16, 32>}, {transform_indices = @transform_1, window_bounds = array<i64: 1, 8, 16, 16>}, {transform_indices = @transform_2, window_bounds = array<i64: 1, 16, 1>}, {transform_indices = @transform_3, window_bounds = array<i64: 1, 1, 32>}, {transform_indices = @transform_4, window_bounds = array<i64: 1, 1, 32>}, {transform_indices = @transform_5, window_bounds = array<i64: 1, 1, 32>}, {transform_indices = @transform_6, window_bounds = array<i64: 1, 1, 32>}, {pipeline_mode = #tpu.pipeline_mode<synchronous>, transform_indices = @transform_7, window_bounds = array<i64: 32, 32>}, {pipeline_mode = #tpu.pipeline_mode<synchronous>, transform_indices = @transform_8, window_bounds = array<i64: 1, 32>}, {pipeline_mode = #tpu.pipeline_mode<synchronous>, transform_indices = @transform_9, window_bounds = array<i64: 32, 64>}, {pipeline_mode = #tpu.pipeline_mode<synchronous>, transform_indices = @transform_10, window_bounds = array<i64: 1, 64>}, {pipeline_mode = #tpu.pipeline_mode<synchronous>, transform_indices = @transform_11, window_bounds = array<i64: 16, 64>}, {pipeline_mode = #tpu.pipeline_mode<synchronous>, transform_indices = @transform_12, window_bounds = array<i64: 1, 64>}, {pipeline_mode = #tpu.pipeline_mode<synchronous>, transform_indices = @transform_13, window_bounds = array<i64: 32, 16>}, {pipeline_mode = #tpu.pipeline_mode<synchronous>, transform_indices = @transform_14, window_bounds = array<i64: 1, 16>}, {pipeline_mode = #tpu.pipeline_mode<synchronous>, transform_indices = @transform_15, window_bounds = array<i64: 32, 32>}, {pipeline_mode = #tpu.pipeline_mode<synchronous>, transform_indices = @transform_16, window_bounds = array<i64: 1, 32>}, {transform_indices = @transform_17, window_bounds = array<i64: 1, 8, 32>}, {transform_indices = @transform_18, window_bounds = array<i64: 1, 8, 256>}, {transform_indices = @transform_19, window_bounds = array<i64: 1, 1, 4, 16>}]} {
    %c8_i32 = arith.constant 8 : i32
    %0 = arith.muli %arg1, %c8_i32 : i32
    %1 = tpu.assume_multiple %0, 8 : i32
    %c0 = arith.constant 0 : index
    %c0_0 = arith.constant 0 : index
    %c0_1 = arith.constant 0 : index
    %2 = vector.load %arg2[%c0, %c0_0, %c0_1] : memref<1x16x32xf32, #tpu.memory_space<vmem>>, vector<1x16x32xf32>
    %3 = vector.shape_cast %2 : vector<1x16x32xf32> to vector<16x32xf32>
    %c0_2 = arith.constant 0 : index
    %c0_3 = arith.constant 0 : index
    %c0_4 = arith.constant 0 : index
    %4 = vector.load %arg4[%c0_2, %c0_3, %c0_4] : memref<1x16x1xf32, #tpu.memory_space<vmem>>, vector<1x16x1xf32>
    %5 = vector.shape_cast %4 : vector<1x16x1xf32> to vector<16x1xf32>
    %c0_5 = arith.constant 0 : index
    %6 = arith.index_cast %1 : i32 to index
    %c0_6 = arith.constant 0 : index
    %7 = vector.load %arg2[%c0_5, %6, %c0_6] : memref<1x16x32xf32, #tpu.memory_space<vmem>>, vector<1x8x32xf32>
    %8 = vector.shape_cast %7 : vector<1x8x32xf32> to vector<8x32xf32>
    %c0_7 = arith.constant 0 : index
    %9 = arith.index_cast %1 : i32 to index
    %c0_8 = arith.constant 0 : index
    %10 = vector.load %arg4[%c0_7, %9, %c0_8] : memref<1x16x1xf32, #tpu.memory_space<vmem>>, vector<1x8x1xf32>
    %11 = vector.shape_cast %10 : vector<1x8x1xf32> to vector<8x1xf32>
    %c0_9 = arith.constant 0 : index
    %c0_10 = arith.constant 0 : index
    %12 = vector.load %arg11[%c0_9, %c0_10] : memref<32x64xbf16, #tpu.memory_space<vmem>>, vector<32x64xbf16>
    %13 = arith.truncf %3 : vector<16x32xf32> to vector<16x32xbf16>
    %cst = arith.constant dense<0.000000e+00> : vector<16x64xf32>
    %14 = tpu.matmul %13, %12, %cst {dimension_numbers = #tpu.dot_dimension_numbers<[1], [0], [0], [1], [0, 0, 1, 1], [], []>} : vector<16x32xbf16>, vector<32x64xbf16>, vector<16x64xf32> -> vector<16x64xf32>
    %c0_11 = arith.constant 0 : index
    %c0_12 = arith.constant 0 : index
    %15 = vector.load %arg12[%c0_11, %c0_12] : memref<1x64xf32, #tpu.memory_space<vmem>>, vector<1x64xf32>
    %16 = vector.broadcast %15 : vector<1x64xf32> to vector<16x64xf32>
    %17 = arith.addf %14, %16 : vector<16x64xf32>
    %18 = vector.broadcast %5 : vector<16x1xf32> to vector<16x64xf32>
    %19 = arith.mulf %17, %18 : vector<16x64xf32>
    %20 = vector.extract_strided_slice %19 {offsets = [0, 0], sizes = [16, 32], strides = [1, 1]} : vector<16x64xf32> to vector<16x32xf32>
    %21 = vector.extract_strided_slice %19 {offsets = [0, 32], sizes = [16, 32], strides = [1, 1]} : vector<16x64xf32> to vector<16x32xf32>
    %c0_13 = arith.constant 0 : index
    %c0_14 = arith.constant 0 : index
    %22 = vector.load %arg9[%c0_13, %c0_14] : memref<32x32xbf16, #tpu.memory_space<vmem>>, vector<32x32xbf16>
    %23 = arith.truncf %8 : vector<8x32xf32> to vector<8x32xbf16>
    %cst_15 = arith.constant dense<0.000000e+00> : vector<8x32xf32>
    %24 = tpu.matmul %23, %22, %cst_15 {dimension_numbers = #tpu.dot_dimension_numbers<[1], [0], [0], [1], [0, 0, 1, 1], [], []>} : vector<8x32xbf16>, vector<32x32xbf16>, vector<8x32xf32> -> vector<8x32xf32>
    %c0_16 = arith.constant 0 : index
    %c0_17 = arith.constant 0 : index
    %25 = vector.load %arg10[%c0_16, %c0_17] : memref<1x32xf32, #tpu.memory_space<vmem>>, vector<1x32xf32>
    %26 = vector.broadcast %25 : vector<1x32xf32> to vector<8x32xf32>
    %27 = arith.addf %24, %26 : vector<8x32xf32>
    %cst_18 = arith.constant 0.353553385 : f32
    %28 = vector.broadcast %cst_18 : f32 to vector<8x1xf32>
    %29 = arith.mulf %11, %28 : vector<8x1xf32>
    %30 = vector.broadcast %29 : vector<8x1xf32> to vector<8x32xf32>
    %31 = arith.mulf %27, %30 : vector<8x32xf32>
    %c0_19 = arith.constant 0 : index
    %c0_20 = arith.constant 0 : index
    %c0_21 = arith.constant 0 : index
    %c0_22 = arith.constant 0 : index
    %32 = vector.load %arg3[%c0_19, %c0_20, %c0_21, %c0_22] : memref<1x8x16x16xf32, #tpu.memory_space<vmem>>, vector<1x8x16x16xf32>
    %33 = vector.shape_cast %32 : vector<1x8x16x16xf32> to vector<8x16x16xf32>
    %34 = vector.shape_cast %33 : vector<8x16x16xf32> to vector<128x16xf32>
    %c0_23 = arith.constant 0 : index
    %c0_24 = arith.constant 0 : index
    %35 = vector.load %arg13[%c0_23, %c0_24] : memref<16x64xbf16, #tpu.memory_space<vmem>>, vector<16x64xbf16>
    %36 = arith.truncf %34 : vector<128x16xf32> to vector<128x16xbf16>
    %cst_25 = arith.constant dense<0.000000e+00> : vector<128x64xf32>
    %37 = tpu.matmul %36, %35, %cst_25 {dimension_numbers = #tpu.dot_dimension_numbers<[1], [0], [0], [1], [0, 0, 1, 1], [], []>} : vector<128x16xbf16>, vector<16x64xbf16>, vector<128x64xf32> -> vector<128x64xf32>
    %c0_26 = arith.constant 0 : index
    %c0_27 = arith.constant 0 : index
    %38 = vector.load %arg14[%c0_26, %c0_27] : memref<1x64xf32, #tpu.memory_space<vmem>>, vector<1x64xf32>
    %39 = vector.broadcast %38 : vector<1x64xf32> to vector<128x64xf32>
    %40 = arith.addf %37, %39 : vector<128x64xf32>
    %41 = vector.extract_strided_slice %40 {offsets = [0, 0], sizes = [128, 32], strides = [1, 1]} : vector<128x64xf32> to vector<128x32xf32>
    %42 = vector.shape_cast %41 : vector<128x32xf32> to vector<8x16x32xf32>
    %43 = vector.extract_strided_slice %40 {offsets = [0, 32], sizes = [128, 32], strides = [1, 1]} : vector<128x64xf32> to vector<128x32xf32>
    %44 = vector.shape_cast %43 : vector<128x32xf32> to vector<8x16x32xf32>
    %45 = vector.shape_cast %31 : vector<8x32xf32> to vector<8x1x32xf32>
    %46 = vector.shape_cast %20 : vector<16x32xf32> to vector<1x16x32xf32>
    %47 = vector.broadcast %45 : vector<8x1x32xf32> to vector<8x16x32xf32>
    %48 = vector.broadcast %46 : vector<1x16x32xf32> to vector<8x16x32xf32>
    %49 = arith.mulf %47, %48 : vector<8x16x32xf32>
    %cst_28 = arith.constant 1.000000e+00 : f32
    %50 = vector.broadcast %cst_28 : f32 to vector<8x16x32xf32>
    %51 = arith.addf %42, %50 : vector<8x16x32xf32>
    %52 = arith.mulf %49, %51 : vector<8x16x32xf32>
    %53 = arith.addf %52, %44 : vector<8x16x32xf32>
    %c0_29 = arith.constant 0 : index
    %c0_30 = arith.constant 0 : index
    %c0_31 = arith.constant 0 : index
    %54 = vector.load %arg5[%c0_29, %c0_30, %c0_31] : memref<1x1x32xf32, #tpu.memory_space<vmem>>, vector<1x1x32xf32>
    %55 = vector.shape_cast %54 : vector<1x1x32xf32> to vector<1x32xf32>
    %56 = vector.shape_cast %55 : vector<1x32xf32> to vector<1x1x32xf32>
    %c0_32 = arith.constant 0 : index
    %c0_33 = arith.constant 0 : index
    %c0_34 = arith.constant 0 : index
    %57 = vector.load %arg6[%c0_32, %c0_33, %c0_34] : memref<1x1x32xf32, #tpu.memory_space<vmem>>, vector<1x1x32xf32>
    %58 = vector.shape_cast %57 : vector<1x1x32xf32> to vector<1x32xf32>
    %59 = vector.shape_cast %58 : vector<1x32xf32> to vector<1x1x32xf32>
    %60 = vector.broadcast %59 : vector<1x1x32xf32> to vector<8x16x32xf32>
    %61 = arith.mulf %60, %53 : vector<8x16x32xf32>
    %62 = vector.broadcast %56 : vector<1x1x32xf32> to vector<8x16x32xf32>
    %63 = arith.addf %62, %61 : vector<8x16x32xf32>
    %64 = vector.shape_cast %63 : vector<8x16x32xf32> to vector<128x32xf32>
    %65 = vector.shape_cast %11 : vector<8x1xf32> to vector<8x1x1xf32>
    %66 = vector.shape_cast %5 : vector<16x1xf32> to vector<1x16x1xf32>
    %67 = vector.broadcast %65 : vector<8x1x1xf32> to vector<8x16x1xf32>
    %68 = vector.broadcast %66 : vector<1x16x1xf32> to vector<8x16x1xf32>
    %69 = arith.mulf %67, %68 : vector<8x16x1xf32>
    %c0_35 = arith.constant 0 : index
    %c0_36 = arith.constant 0 : index
    %70 = vector.load %arg15[%c0_35, %c0_36] : memref<32x16xbf16, #tpu.memory_space<vmem>>, vector<32x16xbf16>
    %71 = arith.truncf %64 : vector<128x32xf32> to vector<128x32xbf16>
    %cst_37 = arith.constant dense<0.000000e+00> : vector<128x16xf32>
    %72 = tpu.matmul %71, %70, %cst_37 {dimension_numbers = #tpu.dot_dimension_numbers<[1], [0], [0], [1], [0, 0, 1, 1], [], []>} : vector<128x32xbf16>, vector<32x16xbf16>, vector<128x16xf32> -> vector<128x16xf32>
    %c0_38 = arith.constant 0 : index
    %c0_39 = arith.constant 0 : index
    %73 = vector.load %arg16[%c0_38, %c0_39] : memref<1x16xf32, #tpu.memory_space<vmem>>, vector<1x16xf32>
    %74 = vector.broadcast %73 : vector<1x16xf32> to vector<128x16xf32>
    %75 = arith.addf %72, %74 : vector<128x16xf32>
    %76 = vector.shape_cast %75 : vector<128x16xf32> to vector<8x16x16xf32>
    %77 = vector.broadcast %69 : vector<8x16x1xf32> to vector<8x16x16xf32>
    %78 = arith.mulf %76, %77 : vector<8x16x16xf32>
    %79 = vector.shape_cast %78 : vector<8x16x16xf32> to vector<8x256xf32>
    %c0_40 = arith.constant 0 : index
    %c0_41 = arith.constant 0 : index
    %c0_42 = arith.constant 0 : index
    %80 = vector.load %arg20[%c0_40, %c0_41, %c0_42] : memref<1x8x256xf32, #tpu.memory_space<vmem>>, vector<1x8x256xf32>
    %81 = vector.shape_cast %80 : vector<1x8x256xf32> to vector<8x256xf32>
    %82 = vector.shape_cast %79 : vector<8x256xf32> to vector<1x8x256xf32>
    tpu.vector_store %arg20[%c0_40, %c0_41, %c0_42], %82 {strides = array<i32>} : memref<1x8x256xf32, #tpu.memory_space<vmem>>, vector<1x8x256xf32>,
    %cst_43 = arith.constant 1.000000e+00 : f32
    %83 = vector.broadcast %cst_43 : f32 to vector<16x1xf32>
    %84 = arith.subf %5, %83 : vector<16x1xf32>
    %cst_44 = arith.constant 1.000000e+30 : f32
    %85 = vector.broadcast %cst_44 : f32 to vector<16x1xf32>
    %86 = arith.mulf %84, %85 : vector<16x1xf32>
    %87 = vector.shape_cast %86 : vector<16x1xf32> to vector<1x16x1xf32>
    %88 = vector.broadcast %87 : vector<1x16x1xf32> to vector<8x16x32xf32>
    %89 = arith.addf %53, %88 : vector<8x16x32xf32>
    %cst_45 = arith.constant dense<0xFF800000> : vector<8x32xf32>
    %90 = vector.multi_reduction <maximumf>, %89, %cst_45 [1] : vector<8x16x32xf32> to vector<8x32xf32>
    %91 = vector.shape_cast %90 : vector<8x32xf32> to vector<8x1x32xf32>
    %92 = vector.broadcast %91 : vector<8x1x32xf32> to vector<8x16x32xf32>
    %93 = arith.subf %89, %92 : vector<8x16x32xf32>
    %94 = math.exp %93 : vector<8x16x32xf32>
    %cst_46 = arith.constant dense<0.000000e+00> : vector<8x32xf32>
    %95 = vector.multi_reduction <add>, %94, %cst_46 [1] : vector<8x16x32xf32> to vector<8x32xf32>
    %96 = vector.shape_cast %21 : vector<16x32xf32> to vector<1x16x32xf32>
    %97 = vector.broadcast %96 : vector<1x16x32xf32> to vector<8x16x32xf32>
    %98 = arith.mulf %94, %97 : vector<8x16x32xf32>
    %cst_47 = arith.constant dense<0.000000e+00> : vector<8x32xf32>
    %99 = vector.multi_reduction <add>, %98, %cst_47 [1] : vector<8x16x32xf32> to vector<8x32xf32>
    %100 = tpu.reciprocal %95 {approx = true} : vector<8x32xf32> -> vector<8x32xf32>
    %101 = arith.mulf %99, %100 : vector<8x32xf32>
    %c0_48 = arith.constant 0 : index
    %c0_49 = arith.constant 0 : index
    %c0_50 = arith.constant 0 : index
    %102 = vector.load %arg7[%c0_48, %c0_49, %c0_50] : memref<1x1x32xf32, #tpu.memory_space<vmem>>, vector<1x1x32xf32>
    %103 = vector.shape_cast %102 : vector<1x1x32xf32> to vector<1x32xf32>
    %c0_51 = arith.constant 0 : index
    %c0_52 = arith.constant 0 : index
    %c0_53 = arith.constant 0 : index
    %104 = vector.load %arg8[%c0_51, %c0_52, %c0_53] : memref<1x1x32xf32, #tpu.memory_space<vmem>>, vector<1x1x32xf32>
    %105 = vector.shape_cast %104 : vector<1x1x32xf32> to vector<1x32xf32>
    %106 = vector.broadcast %105 : vector<1x32xf32> to vector<8x32xf32>
    %107 = arith.mulf %106, %101 : vector<8x32xf32>
    %108 = vector.broadcast %103 : vector<1x32xf32> to vector<8x32xf32>
    %109 = arith.addf %108, %107 : vector<8x32xf32>
    %c0_54 = arith.constant 0 : index
    %c0_55 = arith.constant 0 : index
    %110 = vector.load %arg17[%c0_54, %c0_55] : memref<32x32xbf16, #tpu.memory_space<vmem>>, vector<32x32xbf16>
    %111 = arith.truncf %109 : vector<8x32xf32> to vector<8x32xbf16>
    %cst_56 = arith.constant dense<0.000000e+00> : vector<8x32xf32>
    %112 = tpu.matmul %111, %110, %cst_56 {dimension_numbers = #tpu.dot_dimension_numbers<[1], [0], [0], [1], [0, 0, 1, 1], [], []>} : vector<8x32xbf16>, vector<32x32xbf16>, vector<8x32xf32> -> vector<8x32xf32>
    %c0_57 = arith.constant 0 : index
    %c0_58 = arith.constant 0 : index
    %113 = vector.load %arg18[%c0_57, %c0_58] : memref<1x32xf32, #tpu.memory_space<vmem>>, vector<1x32xf32>
    %114 = vector.broadcast %113 : vector<1x32xf32> to vector<8x32xf32>
    %115 = arith.addf %112, %114 : vector<8x32xf32>
    %116 = vector.broadcast %11 : vector<8x1xf32> to vector<8x32xf32>
    %117 = arith.mulf %115, %116 : vector<8x32xf32>
    %c0_59 = arith.constant 0 : index
    %c0_60 = arith.constant 0 : index
    %c0_61 = arith.constant 0 : index
    %118 = vector.load %arg19[%c0_59, %c0_60, %c0_61] : memref<1x8x32xf32, #tpu.memory_space<vmem>>, vector<1x8x32xf32>
    %119 = vector.shape_cast %118 : vector<1x8x32xf32> to vector<8x32xf32>
    %120 = vector.shape_cast %117 : vector<8x32xf32> to vector<1x8x32xf32>
    tpu.vector_store %arg19[%c0_59, %c0_60, %c0_61], %120 {strides = array<i32>} : memref<1x8x32xf32, #tpu.memory_space<vmem>>, vector<1x8x32xf32>,
    %cst_62 = arith.constant dense<0.000000e+00> : vector<16xf32>
    %121 = vector.multi_reduction <add>, %34, %cst_62 [0] : vector<128x16xf32> to vector<16xf32>
    %122 = vector.shape_cast %121 : vector<16xf32> to vector<1x16xf32>
    %cst_63 = arith.constant dense<0x7F800000> : vector<16xf32>
    %123 = vector.multi_reduction <minimumf>, %34, %cst_63 [0] : vector<128x16xf32> to vector<16xf32>
    %124 = vector.shape_cast %123 : vector<16xf32> to vector<1x16xf32>
    %cst_64 = arith.constant dense<0xFF800000> : vector<16xf32>
    %125 = vector.multi_reduction <maximumf>, %34, %cst_64 [0] : vector<128x16xf32> to vector<16xf32>
    %126 = vector.shape_cast %125 : vector<16xf32> to vector<1x16xf32>
    %127 = arith.mulf %34, %34 : vector<128x16xf32>
    %cst_65 = arith.constant dense<0.000000e+00> : vector<16xf32>
    %128 = vector.multi_reduction <add>, %127, %cst_65 [0] : vector<128x16xf32> to vector<16xf32>
    %129 = vector.shape_cast %128 : vector<16xf32> to vector<1x16xf32>
    %130 = tpu.concatenate %122, %124, %126, %129 in 0 : vector<1x16xf32>, vector<1x16xf32>, vector<1x16xf32>, vector<1x16xf32> -> vector<4x16xf32>
    %c0_66 = arith.constant 0 : index
    %c0_67 = arith.constant 0 : index
    %c0_68 = arith.constant 0 : index
    %c0_69 = arith.constant 0 : index
    %131 = vector.load %arg21[%c0_66, %c0_67, %c0_68, %c0_69] : memref<1x1x4x16xf32, #tpu.memory_space<vmem>>, vector<1x1x4x16xf32>
    %132 = vector.shape_cast %131 : vector<1x1x4x16xf32> to vector<4x16xf32>
    %133 = vector.shape_cast %130 : vector<4x16xf32> to vector<1x1x4x16xf32>
    tpu.vector_store %arg21[%c0_66, %c0_67, %c0_68, %c0_69], %133 {strides = array<i32>} : memref<1x1x4x16xf32, #tpu.memory_space<vmem>>, vector<1x1x4x16xf32>,
    return
  }
  func.func @transform_0(%arg0: i32, %arg1: i32) -> (i32, i32, i32) {
    %c0_i32 = arith.constant 0 : i32
    %c0_i32_0 = arith.constant 0 : i32
    %c0_i32_1 = arith.constant 0 : i32
    return %arg0, %c0_i32, %c0_i32_0 : i32, i32, i32
  }
  func.func @transform_1(%arg0: i32, %arg1: i32) -> (i32, i32, i32, i32) {
    %c0_i32 = arith.constant 0 : i32
    %c0_i32_0 = arith.constant 0 : i32
    %c0_i32_1 = arith.constant 0 : i32
    return %arg0, %arg1, %c0_i32, %c0_i32_0 : i32, i32, i32, i32
  }
  func.func @transform_2(%arg0: i32, %arg1: i32) -> (i32, i32, i32) {
    %c0_i32 = arith.constant 0 : i32
    %c0_i32_0 = arith.constant 0 : i32
    %c0_i32_1 = arith.constant 0 : i32
    return %arg0, %c0_i32, %c0_i32_0 : i32, i32, i32
  }
  func.func @transform_3(%arg0: i32, %arg1: i32) -> (i32, i32, i32) {
    %c0_i32 = arith.constant 0 : i32
    %c0_i32_0 = arith.constant 0 : i32
    %c0_i32_1 = arith.constant 0 : i32
    return %arg0, %c0_i32, %c0_i32_0 : i32, i32, i32
  }
  func.func @transform_4(%arg0: i32, %arg1: i32) -> (i32, i32, i32) {
    %c0_i32 = arith.constant 0 : i32
    %c0_i32_0 = arith.constant 0 : i32
    %c0_i32_1 = arith.constant 0 : i32
    return %arg0, %c0_i32, %c0_i32_0 : i32, i32, i32
  }
  func.func @transform_5(%arg0: i32, %arg1: i32) -> (i32, i32, i32) {
    %c0_i32 = arith.constant 0 : i32
    %c0_i32_0 = arith.constant 0 : i32
    %c0_i32_1 = arith.constant 0 : i32
    return %arg0, %c0_i32, %c0_i32_0 : i32, i32, i32
  }
  func.func @transform_6(%arg0: i32, %arg1: i32) -> (i32, i32, i32) {
    %c0_i32 = arith.constant 0 : i32
    %c0_i32_0 = arith.constant 0 : i32
    %c0_i32_1 = arith.constant 0 : i32
    return %arg0, %c0_i32, %c0_i32_0 : i32, i32, i32
  }
  func.func @transform_7(%arg0: i32, %arg1: i32) -> (i32, i32) {
    %c0_i32 = arith.constant 0 : i32
    %c0_i32_0 = arith.constant 0 : i32
    %c0_i32_1 = arith.constant 0 : i32
    return %c0_i32, %c0_i32_0 : i32, i32
  }
  func.func @transform_8(%arg0: i32, %arg1: i32) -> (i32, i32) {
    %c0_i32 = arith.constant 0 : i32
    %c0_i32_0 = arith.constant 0 : i32
    %c0_i32_1 = arith.constant 0 : i32
    return %c0_i32, %c0_i32_0 : i32, i32
  }
  func.func @transform_9(%arg0: i32, %arg1: i32) -> (i32, i32) {
    %c0_i32 = arith.constant 0 : i32
    %c0_i32_0 = arith.constant 0 : i32
    %c0_i32_1 = arith.constant 0 : i32
    return %c0_i32, %c0_i32_0 : i32, i32
  }
  func.func @transform_10(%arg0: i32, %arg1: i32) -> (i32, i32) {
    %c0_i32 = arith.constant 0 : i32
    %c0_i32_0 = arith.constant 0 : i32
    %c0_i32_1 = arith.constant 0 : i32
    return %c0_i32, %c0_i32_0 : i32, i32
  }
  func.func @transform_11(%arg0: i32, %arg1: i32) -> (i32, i32) {
    %c0_i32 = arith.constant 0 : i32
    %c0_i32_0 = arith.constant 0 : i32
    %c0_i32_1 = arith.constant 0 : i32
    return %c0_i32, %c0_i32_0 : i32, i32
  }
  func.func @transform_12(%arg0: i32, %arg1: i32) -> (i32, i32) {
    %c0_i32 = arith.constant 0 : i32
    %c0_i32_0 = arith.constant 0 : i32
    %c0_i32_1 = arith.constant 0 : i32
    return %c0_i32, %c0_i32_0 : i32, i32
  }
  func.func @transform_13(%arg0: i32, %arg1: i32) -> (i32, i32) {
    %c0_i32 = arith.constant 0 : i32
    %c0_i32_0 = arith.constant 0 : i32
    %c0_i32_1 = arith.constant 0 : i32
    return %c0_i32, %c0_i32_0 : i32, i32
  }
  func.func @transform_14(%arg0: i32, %arg1: i32) -> (i32, i32) {
    %c0_i32 = arith.constant 0 : i32
    %c0_i32_0 = arith.constant 0 : i32
    %c0_i32_1 = arith.constant 0 : i32
    return %c0_i32, %c0_i32_0 : i32, i32
  }
  func.func @transform_15(%arg0: i32, %arg1: i32) -> (i32, i32) {
    %c0_i32 = arith.constant 0 : i32
    %c0_i32_0 = arith.constant 0 : i32
    %c0_i32_1 = arith.constant 0 : i32
    return %c0_i32, %c0_i32_0 : i32, i32
  }
  func.func @transform_16(%arg0: i32, %arg1: i32) -> (i32, i32) {
    %c0_i32 = arith.constant 0 : i32
    %c0_i32_0 = arith.constant 0 : i32
    %c0_i32_1 = arith.constant 0 : i32
    return %c0_i32, %c0_i32_0 : i32, i32
  }
  func.func @transform_17(%arg0: i32, %arg1: i32) -> (i32, i32, i32) {
    %c0_i32 = arith.constant 0 : i32
    %c0_i32_0 = arith.constant 0 : i32
    return %arg0, %arg1, %c0_i32 : i32, i32, i32
  }
  func.func @transform_18(%arg0: i32, %arg1: i32) -> (i32, i32, i32) {
    %c0_i32 = arith.constant 0 : i32
    %c0_i32_0 = arith.constant 0 : i32
    return %arg0, %arg1, %c0_i32 : i32, i32, i32
  }
  func.func @transform_19(%arg0: i32, %arg1: i32) -> (i32, i32, i32, i32) {
    %c0_i32 = arith.constant 0 : i32
    %c0_i32_0 = arith.constant 0 : i32
    %c0_i32_1 = arith.constant 0 : i32
    return %arg0, %arg1, %c0_i32, %c0_i32_0 : i32, i32, i32, i32
  }
}

module attributes {stable_mosaic.version = 11 : i64} {
  func.func @_node_edge_block_kernel(%arg0: i32, %arg1: i32, %arg2: memref<1x16x32xf32, #tpu.memory_space<vmem>>, %arg3: memref<1x8x16x16xf32, #tpu.memory_space<vmem>>, %arg4: memref<1x16x1xf32, #tpu.memory_space<vmem>>, %arg5: memref<1x1x32xf32, #tpu.memory_space<vmem>>, %arg6: memref<1x1x32xf32, #tpu.memory_space<vmem>>, %arg7: memref<1x1x32xf32, #tpu.memory_space<vmem>>, %arg8: memref<1x1x32xf32, #tpu.memory_space<vmem>>, %arg9: memref<32x32xbf16, #tpu.memory_space<vmem>>, %arg10: memref<1x32xf32, #tpu.memory_space<vmem>>, %arg11: memref<32x64xbf16, #tpu.memory_space<vmem>>, %arg12: memref<1x64xf32, #tpu.memory_space<vmem>>, %arg13: memref<16x64xbf16, #tpu.memory_space<vmem>>, %arg14: memref<1x64xf32, #tpu.memory_space<vmem>>, %arg15: memref<32x16xbf16, #tpu.memory_space<vmem>>, %arg16: memref<1x16xf32, #tpu.memory_space<vmem>>, %arg17: memref<32x32xbf16, #tpu.memory_space<vmem>>, %arg18: memref<1x32xf32, #tpu.memory_space<vmem>>, %arg19: memref<1x8x32xf32, #tpu.memory_space<vmem>>, %arg20: memref<1x8x16x16xf32, #tpu.memory_space<vmem>>, %arg21: memref<1x1x4x16xf32, #tpu.memory_space<vmem>>) attributes {dimension_semantics = [#tpu.dimension_semantics<parallel>, #tpu.dimension_semantics<parallel>], iteration_bounds = array<i64: 2, 2>, scalar_prefetch = 0 : i64, scratch_operands = 0 : i64, tpu.core_type = #tpu.core_type<tc>, window_params = [{transform_indices = @transform_0, window_bounds = array<i64: 1, 16, 32>}, {transform_indices = @transform_1, window_bounds = array<i64: 1, 8, 16, 16>}, {transform_indices = @transform_2, window_bounds = array<i64: 1, 16, 1>}, {transform_indices = @transform_3, window_bounds = array<i64: 1, 1, 32>}, {transform_indices = @transform_4, window_bounds = array<i64: 1, 1, 32>}, {transform_indices = @transform_5, window_bounds = array<i64: 1, 1, 32>}, {transform_indices = @transform_6, window_bounds = array<i64: 1, 1, 32>}, {pipeline_mode = #tpu.pipeline_mode<synchronous>, transform_indices = @transform_7, window_bounds = array<i64: 32, 32>}, {pipeline_mode = #tpu.pipeline_mode<synchronous>, transform_indices = @transform_8, window_bounds = array<i64: 1, 32>}, {pipeline_mode = #tpu.pipeline_mode<synchronous>, transform_indices = @transform_9, window_bounds = array<i64: 32, 64>}, {pipeline_mode = #tpu.pipeline_mode<synchronous>, transform_indices = @transform_10, window_bounds = array<i64: 1, 64>}, {pipeline_mode = #tpu.pipeline_mode<synchronous>, transform_indices = @transform_11, window_bounds = array<i64: 16, 64>}, {pipeline_mode = #tpu.pipeline_mode<synchronous>, transform_indices = @transform_12, window_bounds = array<i64: 1, 64>}, {pipeline_mode = #tpu.pipeline_mode<synchronous>, transform_indices = @transform_13, window_bounds = array<i64: 32, 16>}, {pipeline_mode = #tpu.pipeline_mode<synchronous>, transform_indices = @transform_14, window_bounds = array<i64: 1, 16>}, {pipeline_mode = #tpu.pipeline_mode<synchronous>, transform_indices = @transform_15, window_bounds = array<i64: 32, 32>}, {pipeline_mode = #tpu.pipeline_mode<synchronous>, transform_indices = @transform_16, window_bounds = array<i64: 1, 32>}, {transform_indices = @transform_17, window_bounds = array<i64: 1, 8, 32>}, {transform_indices = @transform_18, window_bounds = array<i64: 1, 8, 16, 16>}, {transform_indices = @transform_19, window_bounds = array<i64: 1, 1, 4, 16>}]} {
    %c8_i32 = arith.constant 8 : i32
    %0 = arith.muli %arg1, %c8_i32 : i32
    %1 = tpu.assume_multiple %0, 8 : i32
    %c0 = arith.constant 0 : index
    %c0_0 = arith.constant 0 : index
    %c0_1 = arith.constant 0 : index
    %2 = vector.load %arg2[%c0, %c0_0, %c0_1] : memref<1x16x32xf32, #tpu.memory_space<vmem>>, vector<1x16x32xf32>
    %3 = vector.shape_cast %2 : vector<1x16x32xf32> to vector<16x32xf32>
    %c0_2 = arith.constant 0 : index
    %c0_3 = arith.constant 0 : index
    %c0_4 = arith.constant 0 : index
    %4 = vector.load %arg4[%c0_2, %c0_3, %c0_4] : memref<1x16x1xf32, #tpu.memory_space<vmem>>, vector<1x16x1xf32>
    %5 = vector.shape_cast %4 : vector<1x16x1xf32> to vector<16x1xf32>
    %c0_5 = arith.constant 0 : index
    %6 = arith.index_cast %1 : i32 to index
    %c0_6 = arith.constant 0 : index
    %7 = vector.load %arg2[%c0_5, %6, %c0_6] : memref<1x16x32xf32, #tpu.memory_space<vmem>>, vector<1x8x32xf32>
    %8 = vector.shape_cast %7 : vector<1x8x32xf32> to vector<8x32xf32>
    %c0_7 = arith.constant 0 : index
    %9 = arith.index_cast %1 : i32 to index
    %c0_8 = arith.constant 0 : index
    %10 = vector.load %arg4[%c0_7, %9, %c0_8] : memref<1x16x1xf32, #tpu.memory_space<vmem>>, vector<1x8x1xf32>
    %11 = vector.shape_cast %10 : vector<1x8x1xf32> to vector<8x1xf32>
    %c0_9 = arith.constant 0 : index
    %c0_10 = arith.constant 0 : index
    %12 = vector.load %arg11[%c0_9, %c0_10] : memref<32x64xbf16, #tpu.memory_space<vmem>>, vector<32x64xbf16>
    %13 = arith.truncf %3 : vector<16x32xf32> to vector<16x32xbf16>
    %cst = arith.constant dense<0.000000e+00> : vector<16x64xf32>
    %14 = tpu.matmul %13, %12, %cst {dimension_numbers = #tpu.dot_dimension_numbers<[1], [0], [0], [1], [0, 0, 1, 1], [], []>} : vector<16x32xbf16>, vector<32x64xbf16>, vector<16x64xf32> -> vector<16x64xf32>
    %c0_11 = arith.constant 0 : index
    %c0_12 = arith.constant 0 : index
    %15 = vector.load %arg12[%c0_11, %c0_12] : memref<1x64xf32, #tpu.memory_space<vmem>>, vector<1x64xf32>
    %16 = vector.broadcast %15 : vector<1x64xf32> to vector<16x64xf32>
    %17 = arith.addf %14, %16 : vector<16x64xf32>
    %18 = vector.broadcast %5 : vector<16x1xf32> to vector<16x64xf32>
    %19 = arith.mulf %17, %18 : vector<16x64xf32>
    %20 = vector.extract_strided_slice %19 {offsets = [0, 0], sizes = [16, 32], strides = [1, 1]} : vector<16x64xf32> to vector<16x32xf32>
    %21 = vector.extract_strided_slice %19 {offsets = [0, 32], sizes = [16, 32], strides = [1, 1]} : vector<16x64xf32> to vector<16x32xf32>
    %c0_13 = arith.constant 0 : index
    %c0_14 = arith.constant 0 : index
    %22 = vector.load %arg9[%c0_13, %c0_14] : memref<32x32xbf16, #tpu.memory_space<vmem>>, vector<32x32xbf16>
    %23 = arith.truncf %8 : vector<8x32xf32> to vector<8x32xbf16>
    %cst_15 = arith.constant dense<0.000000e+00> : vector<8x32xf32>
    %24 = tpu.matmul %23, %22, %cst_15 {dimension_numbers = #tpu.dot_dimension_numbers<[1], [0], [0], [1], [0, 0, 1, 1], [], []>} : vector<8x32xbf16>, vector<32x32xbf16>, vector<8x32xf32> -> vector<8x32xf32>
    %c0_16 = arith.constant 0 : index
    %c0_17 = arith.constant 0 : index
    %25 = vector.load %arg10[%c0_16, %c0_17] : memref<1x32xf32, #tpu.memory_space<vmem>>, vector<1x32xf32>
    %26 = vector.broadcast %25 : vector<1x32xf32> to vector<8x32xf32>
    %27 = arith.addf %24, %26 : vector<8x32xf32>
    %cst_18 = arith.constant 0.353553385 : f32
    %28 = vector.broadcast %cst_18 : f32 to vector<8x1xf32>
    %29 = arith.mulf %11, %28 : vector<8x1xf32>
    %30 = vector.broadcast %29 : vector<8x1xf32> to vector<8x32xf32>
    %31 = arith.mulf %27, %30 : vector<8x32xf32>
    %c0_19 = arith.constant 0 : index
    %c0_20 = arith.constant 0 : index
    %c0_21 = arith.constant 0 : index
    %c0_22 = arith.constant 0 : index
    %32 = vector.load %arg3[%c0_19, %c0_20, %c0_21, %c0_22] : memref<1x8x16x16xf32, #tpu.memory_space<vmem>>, vector<1x8x16x16xf32>
    %33 = vector.shape_cast %32 : vector<1x8x16x16xf32> to vector<8x16x16xf32>
    %34 = vector.shape_cast %33 : vector<8x16x16xf32> to vector<128x16xf32>
    %c0_23 = arith.constant 0 : index
    %c0_24 = arith.constant 0 : index
    %35 = vector.load %arg13[%c0_23, %c0_24] : memref<16x64xbf16, #tpu.memory_space<vmem>>, vector<16x64xbf16>
    %36 = arith.truncf %34 : vector<128x16xf32> to vector<128x16xbf16>
    %cst_25 = arith.constant dense<0.000000e+00> : vector<128x64xf32>
    %37 = tpu.matmul %36, %35, %cst_25 {dimension_numbers = #tpu.dot_dimension_numbers<[1], [0], [0], [1], [0, 0, 1, 1], [], []>} : vector<128x16xbf16>, vector<16x64xbf16>, vector<128x64xf32> -> vector<128x64xf32>
    %c0_26 = arith.constant 0 : index
    %c0_27 = arith.constant 0 : index
    %38 = vector.load %arg14[%c0_26, %c0_27] : memref<1x64xf32, #tpu.memory_space<vmem>>, vector<1x64xf32>
    %39 = vector.broadcast %38 : vector<1x64xf32> to vector<128x64xf32>
    %40 = arith.addf %37, %39 : vector<128x64xf32>
    %41 = vector.extract_strided_slice %40 {offsets = [0, 0], sizes = [128, 32], strides = [1, 1]} : vector<128x64xf32> to vector<128x32xf32>
    %42 = vector.shape_cast %41 : vector<128x32xf32> to vector<8x16x32xf32>
    %43 = vector.extract_strided_slice %40 {offsets = [0, 32], sizes = [128, 32], strides = [1, 1]} : vector<128x64xf32> to vector<128x32xf32>
    %44 = vector.shape_cast %43 : vector<128x32xf32> to vector<8x16x32xf32>
    %45 = vector.shape_cast %31 : vector<8x32xf32> to vector<8x1x32xf32>
    %46 = vector.shape_cast %20 : vector<16x32xf32> to vector<1x16x32xf32>
    %47 = vector.broadcast %45 : vector<8x1x32xf32> to vector<8x16x32xf32>
    %48 = vector.broadcast %46 : vector<1x16x32xf32> to vector<8x16x32xf32>
    %49 = arith.mulf %47, %48 : vector<8x16x32xf32>
    %cst_28 = arith.constant 1.000000e+00 : f32
    %50 = vector.broadcast %cst_28 : f32 to vector<8x16x32xf32>
    %51 = arith.addf %42, %50 : vector<8x16x32xf32>
    %52 = arith.mulf %49, %51 : vector<8x16x32xf32>
    %53 = arith.addf %52, %44 : vector<8x16x32xf32>
    %c0_29 = arith.constant 0 : index
    %c0_30 = arith.constant 0 : index
    %c0_31 = arith.constant 0 : index
    %54 = vector.load %arg5[%c0_29, %c0_30, %c0_31] : memref<1x1x32xf32, #tpu.memory_space<vmem>>, vector<1x1x32xf32>
    %55 = vector.shape_cast %54 : vector<1x1x32xf32> to vector<1x32xf32>
    %56 = vector.shape_cast %55 : vector<1x32xf32> to vector<1x1x32xf32>
    %c0_32 = arith.constant 0 : index
    %c0_33 = arith.constant 0 : index
    %c0_34 = arith.constant 0 : index
    %57 = vector.load %arg6[%c0_32, %c0_33, %c0_34] : memref<1x1x32xf32, #tpu.memory_space<vmem>>, vector<1x1x32xf32>
    %58 = vector.shape_cast %57 : vector<1x1x32xf32> to vector<1x32xf32>
    %59 = vector.shape_cast %58 : vector<1x32xf32> to vector<1x1x32xf32>
    %60 = vector.broadcast %59 : vector<1x1x32xf32> to vector<8x16x32xf32>
    %61 = arith.mulf %60, %53 : vector<8x16x32xf32>
    %62 = vector.broadcast %56 : vector<1x1x32xf32> to vector<8x16x32xf32>
    %63 = arith.addf %62, %61 : vector<8x16x32xf32>
    %64 = vector.shape_cast %63 : vector<8x16x32xf32> to vector<128x32xf32>
    %65 = vector.shape_cast %11 : vector<8x1xf32> to vector<8x1x1xf32>
    %66 = vector.shape_cast %5 : vector<16x1xf32> to vector<1x16x1xf32>
    %67 = vector.broadcast %65 : vector<8x1x1xf32> to vector<8x16x1xf32>
    %68 = vector.broadcast %66 : vector<1x16x1xf32> to vector<8x16x1xf32>
    %69 = arith.mulf %67, %68 : vector<8x16x1xf32>
    %c0_35 = arith.constant 0 : index
    %c0_36 = arith.constant 0 : index
    %70 = vector.load %arg15[%c0_35, %c0_36] : memref<32x16xbf16, #tpu.memory_space<vmem>>, vector<32x16xbf16>
    %71 = arith.truncf %64 : vector<128x32xf32> to vector<128x32xbf16>
    %cst_37 = arith.constant dense<0.000000e+00> : vector<128x16xf32>
    %72 = tpu.matmul %71, %70, %cst_37 {dimension_numbers = #tpu.dot_dimension_numbers<[1], [0], [0], [1], [0, 0, 1, 1], [], []>} : vector<128x32xbf16>, vector<32x16xbf16>, vector<128x16xf32> -> vector<128x16xf32>
    %c0_38 = arith.constant 0 : index
    %c0_39 = arith.constant 0 : index
    %73 = vector.load %arg16[%c0_38, %c0_39] : memref<1x16xf32, #tpu.memory_space<vmem>>, vector<1x16xf32>
    %74 = vector.broadcast %73 : vector<1x16xf32> to vector<128x16xf32>
    %75 = arith.addf %72, %74 : vector<128x16xf32>
    %76 = vector.shape_cast %75 : vector<128x16xf32> to vector<8x16x16xf32>
    %77 = vector.broadcast %69 : vector<8x16x1xf32> to vector<8x16x16xf32>
    %78 = arith.mulf %76, %77 : vector<8x16x16xf32>
    %c0_40 = arith.constant 0 : index
    %c0_41 = arith.constant 0 : index
    %c0_42 = arith.constant 0 : index
    %c0_43 = arith.constant 0 : index
    %79 = vector.load %arg20[%c0_40, %c0_41, %c0_42, %c0_43] : memref<1x8x16x16xf32, #tpu.memory_space<vmem>>, vector<1x8x16x16xf32>
    %80 = vector.shape_cast %79 : vector<1x8x16x16xf32> to vector<8x16x16xf32>
    %81 = vector.shape_cast %78 : vector<8x16x16xf32> to vector<1x8x16x16xf32>
    tpu.vector_store %arg20[%c0_40, %c0_41, %c0_42, %c0_43], %81 {strides = array<i32>} : memref<1x8x16x16xf32, #tpu.memory_space<vmem>>, vector<1x8x16x16xf32>,
    %cst_44 = arith.constant 1.000000e+00 : f32
    %82 = vector.broadcast %cst_44 : f32 to vector<16x1xf32>
    %83 = arith.subf %5, %82 : vector<16x1xf32>
    %cst_45 = arith.constant 1.000000e+30 : f32
    %84 = vector.broadcast %cst_45 : f32 to vector<16x1xf32>
    %85 = arith.mulf %83, %84 : vector<16x1xf32>
    %86 = vector.shape_cast %85 : vector<16x1xf32> to vector<1x16x1xf32>
    %87 = vector.broadcast %86 : vector<1x16x1xf32> to vector<8x16x32xf32>
    %88 = arith.addf %53, %87 : vector<8x16x32xf32>
    %cst_46 = arith.constant dense<0xFF800000> : vector<8x32xf32>
    %89 = vector.multi_reduction <maximumf>, %88, %cst_46 [1] : vector<8x16x32xf32> to vector<8x32xf32>
    %90 = vector.shape_cast %89 : vector<8x32xf32> to vector<8x1x32xf32>
    %91 = vector.broadcast %90 : vector<8x1x32xf32> to vector<8x16x32xf32>
    %92 = arith.subf %88, %91 : vector<8x16x32xf32>
    %93 = math.exp %92 : vector<8x16x32xf32>
    %cst_47 = arith.constant dense<0.000000e+00> : vector<8x32xf32>
    %94 = vector.multi_reduction <add>, %93, %cst_47 [1] : vector<8x16x32xf32> to vector<8x32xf32>
    %95 = vector.shape_cast %21 : vector<16x32xf32> to vector<1x16x32xf32>
    %96 = vector.broadcast %95 : vector<1x16x32xf32> to vector<8x16x32xf32>
    %97 = arith.mulf %93, %96 : vector<8x16x32xf32>
    %cst_48 = arith.constant dense<0.000000e+00> : vector<8x32xf32>
    %98 = vector.multi_reduction <add>, %97, %cst_48 [1] : vector<8x16x32xf32> to vector<8x32xf32>
    %99 = tpu.reciprocal %94 {approx = true} : vector<8x32xf32> -> vector<8x32xf32>
    %100 = arith.mulf %98, %99 : vector<8x32xf32>
    %c0_49 = arith.constant 0 : index
    %c0_50 = arith.constant 0 : index
    %c0_51 = arith.constant 0 : index
    %101 = vector.load %arg7[%c0_49, %c0_50, %c0_51] : memref<1x1x32xf32, #tpu.memory_space<vmem>>, vector<1x1x32xf32>
    %102 = vector.shape_cast %101 : vector<1x1x32xf32> to vector<1x32xf32>
    %c0_52 = arith.constant 0 : index
    %c0_53 = arith.constant 0 : index
    %c0_54 = arith.constant 0 : index
    %103 = vector.load %arg8[%c0_52, %c0_53, %c0_54] : memref<1x1x32xf32, #tpu.memory_space<vmem>>, vector<1x1x32xf32>
    %104 = vector.shape_cast %103 : vector<1x1x32xf32> to vector<1x32xf32>
    %105 = vector.broadcast %104 : vector<1x32xf32> to vector<8x32xf32>
    %106 = arith.mulf %105, %100 : vector<8x32xf32>
    %107 = vector.broadcast %102 : vector<1x32xf32> to vector<8x32xf32>
    %108 = arith.addf %107, %106 : vector<8x32xf32>
    %c0_55 = arith.constant 0 : index
    %c0_56 = arith.constant 0 : index
    %109 = vector.load %arg17[%c0_55, %c0_56] : memref<32x32xbf16, #tpu.memory_space<vmem>>, vector<32x32xbf16>
    %110 = arith.truncf %108 : vector<8x32xf32> to vector<8x32xbf16>
    %cst_57 = arith.constant dense<0.000000e+00> : vector<8x32xf32>
    %111 = tpu.matmul %110, %109, %cst_57 {dimension_numbers = #tpu.dot_dimension_numbers<[1], [0], [0], [1], [0, 0, 1, 1], [], []>} : vector<8x32xbf16>, vector<32x32xbf16>, vector<8x32xf32> -> vector<8x32xf32>
    %c0_58 = arith.constant 0 : index
    %c0_59 = arith.constant 0 : index
    %112 = vector.load %arg18[%c0_58, %c0_59] : memref<1x32xf32, #tpu.memory_space<vmem>>, vector<1x32xf32>
    %113 = vector.broadcast %112 : vector<1x32xf32> to vector<8x32xf32>
    %114 = arith.addf %111, %113 : vector<8x32xf32>
    %115 = vector.broadcast %11 : vector<8x1xf32> to vector<8x32xf32>
    %116 = arith.mulf %114, %115 : vector<8x32xf32>
    %c0_60 = arith.constant 0 : index
    %c0_61 = arith.constant 0 : index
    %c0_62 = arith.constant 0 : index
    %117 = vector.load %arg19[%c0_60, %c0_61, %c0_62] : memref<1x8x32xf32, #tpu.memory_space<vmem>>, vector<1x8x32xf32>
    %118 = vector.shape_cast %117 : vector<1x8x32xf32> to vector<8x32xf32>
    %119 = vector.shape_cast %116 : vector<8x32xf32> to vector<1x8x32xf32>
    tpu.vector_store %arg19[%c0_60, %c0_61, %c0_62], %119 {strides = array<i32>} : memref<1x8x32xf32, #tpu.memory_space<vmem>>, vector<1x8x32xf32>,
    %cst_63 = arith.constant dense<0.000000e+00> : vector<16xf32>
    %120 = vector.multi_reduction <add>, %34, %cst_63 [0] : vector<128x16xf32> to vector<16xf32>
    %121 = vector.shape_cast %120 : vector<16xf32> to vector<1x16xf32>
    %cst_64 = arith.constant dense<0x7F800000> : vector<16xf32>
    %122 = vector.multi_reduction <minimumf>, %34, %cst_64 [0] : vector<128x16xf32> to vector<16xf32>
    %123 = vector.shape_cast %122 : vector<16xf32> to vector<1x16xf32>
    %cst_65 = arith.constant dense<0xFF800000> : vector<16xf32>
    %124 = vector.multi_reduction <maximumf>, %34, %cst_65 [0] : vector<128x16xf32> to vector<16xf32>
    %125 = vector.shape_cast %124 : vector<16xf32> to vector<1x16xf32>
    %126 = arith.mulf %34, %34 : vector<128x16xf32>
    %cst_66 = arith.constant dense<0.000000e+00> : vector<16xf32>
    %127 = vector.multi_reduction <add>, %126, %cst_66 [0] : vector<128x16xf32> to vector<16xf32>
    %128 = vector.shape_cast %127 : vector<16xf32> to vector<1x16xf32>
    %129 = tpu.concatenate %121, %123, %125, %128 in 0 : vector<1x16xf32>, vector<1x16xf32>, vector<1x16xf32>, vector<1x16xf32> -> vector<4x16xf32>
    %c0_67 = arith.constant 0 : index
    %c0_68 = arith.constant 0 : index
    %c0_69 = arith.constant 0 : index
    %c0_70 = arith.constant 0 : index
    %130 = vector.load %arg21[%c0_67, %c0_68, %c0_69, %c0_70] : memref<1x1x4x16xf32, #tpu.memory_space<vmem>>, vector<1x1x4x16xf32>
    %131 = vector.shape_cast %130 : vector<1x1x4x16xf32> to vector<4x16xf32>
    %132 = vector.shape_cast %129 : vector<4x16xf32> to vector<1x1x4x16xf32>
    tpu.vector_store %arg21[%c0_67, %c0_68, %c0_69, %c0_70], %132 {strides = array<i32>} : memref<1x1x4x16xf32, #tpu.memory_space<vmem>>, vector<1x1x4x16xf32>,
    return
  }
  func.func @transform_0(%arg0: i32, %arg1: i32) -> (i32, i32, i32) {
    %c0_i32 = arith.constant 0 : i32
    %c0_i32_0 = arith.constant 0 : i32
    %c0_i32_1 = arith.constant 0 : i32
    return %arg0, %c0_i32, %c0_i32_0 : i32, i32, i32
  }
  func.func @transform_1(%arg0: i32, %arg1: i32) -> (i32, i32, i32, i32) {
    %c0_i32 = arith.constant 0 : i32
    %c0_i32_0 = arith.constant 0 : i32
    %c0_i32_1 = arith.constant 0 : i32
    return %arg0, %arg1, %c0_i32, %c0_i32_0 : i32, i32, i32, i32
  }
  func.func @transform_2(%arg0: i32, %arg1: i32) -> (i32, i32, i32) {
    %c0_i32 = arith.constant 0 : i32
    %c0_i32_0 = arith.constant 0 : i32
    %c0_i32_1 = arith.constant 0 : i32
    return %arg0, %c0_i32, %c0_i32_0 : i32, i32, i32
  }
  func.func @transform_3(%arg0: i32, %arg1: i32) -> (i32, i32, i32) {
    %c0_i32 = arith.constant 0 : i32
    %c0_i32_0 = arith.constant 0 : i32
    %c0_i32_1 = arith.constant 0 : i32
    return %arg0, %c0_i32, %c0_i32_0 : i32, i32, i32
  }
  func.func @transform_4(%arg0: i32, %arg1: i32) -> (i32, i32, i32) {
    %c0_i32 = arith.constant 0 : i32
    %c0_i32_0 = arith.constant 0 : i32
    %c0_i32_1 = arith.constant 0 : i32
    return %arg0, %c0_i32, %c0_i32_0 : i32, i32, i32
  }
  func.func @transform_5(%arg0: i32, %arg1: i32) -> (i32, i32, i32) {
    %c0_i32 = arith.constant 0 : i32
    %c0_i32_0 = arith.constant 0 : i32
    %c0_i32_1 = arith.constant 0 : i32
    return %arg0, %c0_i32, %c0_i32_0 : i32, i32, i32
  }
  func.func @transform_6(%arg0: i32, %arg1: i32) -> (i32, i32, i32) {
    %c0_i32 = arith.constant 0 : i32
    %c0_i32_0 = arith.constant 0 : i32
    %c0_i32_1 = arith.constant 0 : i32
    return %arg0, %c0_i32, %c0_i32_0 : i32, i32, i32
  }
  func.func @transform_7(%arg0: i32, %arg1: i32) -> (i32, i32) {
    %c0_i32 = arith.constant 0 : i32
    %c0_i32_0 = arith.constant 0 : i32
    %c0_i32_1 = arith.constant 0 : i32
    return %c0_i32, %c0_i32_0 : i32, i32
  }
  func.func @transform_8(%arg0: i32, %arg1: i32) -> (i32, i32) {
    %c0_i32 = arith.constant 0 : i32
    %c0_i32_0 = arith.constant 0 : i32
    %c0_i32_1 = arith.constant 0 : i32
    return %c0_i32, %c0_i32_0 : i32, i32
  }
  func.func @transform_9(%arg0: i32, %arg1: i32) -> (i32, i32) {
    %c0_i32 = arith.constant 0 : i32
    %c0_i32_0 = arith.constant 0 : i32
    %c0_i32_1 = arith.constant 0 : i32
    return %c0_i32, %c0_i32_0 : i32, i32
  }
  func.func @transform_10(%arg0: i32, %arg1: i32) -> (i32, i32) {
    %c0_i32 = arith.constant 0 : i32
    %c0_i32_0 = arith.constant 0 : i32
    %c0_i32_1 = arith.constant 0 : i32
    return %c0_i32, %c0_i32_0 : i32, i32
  }
  func.func @transform_11(%arg0: i32, %arg1: i32) -> (i32, i32) {
    %c0_i32 = arith.constant 0 : i32
    %c0_i32_0 = arith.constant 0 : i32
    %c0_i32_1 = arith.constant 0 : i32
    return %c0_i32, %c0_i32_0 : i32, i32
  }
  func.func @transform_12(%arg0: i32, %arg1: i32) -> (i32, i32) {
    %c0_i32 = arith.constant 0 : i32
    %c0_i32_0 = arith.constant 0 : i32
    %c0_i32_1 = arith.constant 0 : i32
    return %c0_i32, %c0_i32_0 : i32, i32
  }
  func.func @transform_13(%arg0: i32, %arg1: i32) -> (i32, i32) {
    %c0_i32 = arith.constant 0 : i32
    %c0_i32_0 = arith.constant 0 : i32
    %c0_i32_1 = arith.constant 0 : i32
    return %c0_i32, %c0_i32_0 : i32, i32
  }
  func.func @transform_14(%arg0: i32, %arg1: i32) -> (i32, i32) {
    %c0_i32 = arith.constant 0 : i32
    %c0_i32_0 = arith.constant 0 : i32
    %c0_i32_1 = arith.constant 0 : i32
    return %c0_i32, %c0_i32_0 : i32, i32
  }
  func.func @transform_15(%arg0: i32, %arg1: i32) -> (i32, i32) {
    %c0_i32 = arith.constant 0 : i32
    %c0_i32_0 = arith.constant 0 : i32
    %c0_i32_1 = arith.constant 0 : i32
    return %c0_i32, %c0_i32_0 : i32, i32
  }
  func.func @transform_16(%arg0: i32, %arg1: i32) -> (i32, i32) {
    %c0_i32 = arith.constant 0 : i32
    %c0_i32_0 = arith.constant 0 : i32
    %c0_i32_1 = arith.constant 0 : i32
    return %c0_i32, %c0_i32_0 : i32, i32
  }
  func.func @transform_17(%arg0: i32, %arg1: i32) -> (i32, i32, i32) {
    %c0_i32 = arith.constant 0 : i32
    %c0_i32_0 = arith.constant 0 : i32
    return %arg0, %arg1, %c0_i32 : i32, i32, i32
  }
  func.func @transform_18(%arg0: i32, %arg1: i32) -> (i32, i32, i32, i32) {
    %c0_i32 = arith.constant 0 : i32
    %c0_i32_0 = arith.constant 0 : i32
    %c0_i32_1 = arith.constant 0 : i32
    return %arg0, %arg1, %c0_i32, %c0_i32_0 : i32, i32, i32, i32
  }
  func.func @transform_19(%arg0: i32, %arg1: i32) -> (i32, i32, i32, i32) {
    %c0_i32 = arith.constant 0 : i32
    %c0_i32_0 = arith.constant 0 : i32
    %c0_i32_1 = arith.constant 0 : i32
    return %arg0, %arg1, %c0_i32, %c0_i32_0 : i32, i32, i32, i32
  }
}

</mosaic_0001>

<bundles_post_ra>
// kernel: tpu_custom_call.1
= control target key start
LH: loop header
LB: loop body
LE: loop exit
PB: predicated region body
PF: predicated region fallthrough
CT: control target
= control target key end

     0   :  { %s5274_s0 = inlined_call_operand.vmem [shape: f32[2,16,32], index: 0, kind: input, shape index: {}]   ;;  %s5275_s1 = inlined_call_operand.hbm [shape: f32[2,16,16,16], index: 1, kind: input, shape index: {}]   ;;  %s5276_s2 = inlined_call_operand.vmem [shape: f32[2,16,1], index: 2, kind: input, shape index: {}]   ;;  %s5277_s3 = inlined_call_operand.hbm [shape: f32[2,1,32], index: 3, kind: input, shape index: {}]   ;;  %s5278_s4 = inlined_call_operand.hbm [shape: f32[2,1,32], index: 4, kind: input, shape index: {}]   ;;  %s5279_s5 = inlined_call_operand.hbm [shape: f32[2,1,32], index: 5, kind: input, shape index: {}]   ;;  %s5280_s6 = inlined_call_operand.hbm [shape: f32[2,1,32], index: 6, kind: input, shape index: {}]   ;;  %s5281_s7 = inlined_call_operand.vmem [shape: bf16[32,32], index: 7, kind: input, shape index: {}]   ;;  %s5282_s8 = inlined_call_operand.hbm [shape: f32[1,32], index: 8, kind: input, shape index: {}]   ;;  %s5283_s9 = inlined_call_operand.vmem [shape: bf16[32,64], index: 9, kind: input, shape index: {}]   ;;  %s5284_s10 = inlined_call_operand.vmem [shape: f32[1,64], index: 10, kind: input, shape index: {}]   ;;  %s5285_s11 = inlined_call_operand.vmem [shape: bf16[16,64], index: 11, kind: input, shape index: {}]   ;;  %s5286_s12 = inlined_call_operand.vmem [shape: f32[1,64], index: 12, kind: input, shape index: {}]   ;;  %s5287_s13 = inlined_call_operand.vmem [shape: bf16[32,16], index: 13, kind: input, shape index: {}]   ;;  %s5288_s14 = inlined_call_operand.vmem [shape: f32[1,16], index: 14, kind: input, shape index: {}]   ;;  %s5289_s15 = inlined_call_operand.vmem [shape: bf16[32,32], index: 15, kind: input, shape index: {}]   ;;  %s5290_s16 = inlined_call_operand.vmem [shape: f32[1,32], index: 16, kind: input, shape index: {}]   ;;  %s5291_s17 = inlined_call_operand.hbm [shape: f32[2,16,32], index: 17, kind: output, shape index: {0}]   ;;  %s5292_s18 = inlined_call_operand.hbm [shape: f32[2,16,256], index: 18, kind: output, shape index: {1}]   ;;  %s5293_s19 = inlined_call_operand.hbm [shape: f32[2,2,4,16], index: 19, kind: output, shape index: {2}]  }
   0x1   :  { %5335 = sst [smem:[#allocation35_spill]] %s5274_s0 }
   0x2   :  { %5336 = sst [smem:[#allocation36_spill]] %s5275_s1 }
   0x3   :  { %5337 = sst [smem:[#allocation37_spill]] %s5276_s2 }
   0x4   :  { %5338 = sst [smem:[#allocation38_spill]] %s5277_s3 }
   0x5   :  { %5339 = sst [smem:[#allocation39_spill]] %s5278_s4 }
   0x6   :  { %5340 = sst [smem:[#allocation40_spill]] %s5279_s5 }
   0x7   :  { %5341 = sst [smem:[#allocation41_spill]] %s5280_s6 }
   0x8   :  { %5342 = sst [smem:[#allocation42_spill]] %s5281_s7 }
   0x9   :  { %5343 = sst [smem:[#allocation43_spill]] %s5282_s8 }
   0xa   :  { %5344 = sst [smem:[#allocation44_spill]] %s5283_s9 }
   0xb   :  { %5345 = sst [smem:[#allocation45_spill]] %s5284_s10 }
   0xc   :  { %5346 = sst [smem:[#allocation46_spill]] %s5285_s11 }
   0xd   :  { %5347 = sst [smem:[#allocation47_spill]] %s5286_s12 }
   0xe   :  { %5348 = sst [smem:[#allocation48_spill]] %s5287_s13 }
   0xf   :  { %5349 = sst [smem:[#allocation49_spill]] %s5288_s14 }
  0x10   :  { %5350 = sst [smem:[#allocation50_spill]] %s5289_s15 }
  0x11   :  { %5351 = sst [smem:[#allocation51_spill]] %s5290_s16 }
  0x12   :  { %5352 = sst [smem:[#allocation52_spill]] %s5291_s17 }
  0x13   :  { %5353 = sst [smem:[#allocation53_spill]] %s5292_s18 }
  0x14   :  { %5354 = sst [smem:[#allocation54_spill]] %s5293_s19 }
  0x15   :  { %25 = vsyncpa [#allocation3], 0 }
  0x16   :  { %27 = vsyncpa [#allocation3 + $0x1], 0 }
  0x17   :  { %28 = vsyncpa [#allocation6], 0 }
  0x18   :  { %30 = vsyncpa [#allocation6 + $0x1], 0 }
  0x19   :  { %31 = vsyncpa [#allocation9], 0 }
  0x1a   :  { %33 = vsyncpa [#allocation9 + $0x1], 0 }
  0x1b   :  { %34 = vsyncpa [#allocation12], 0 }
  0x1c   :  { %35 = vsyncpa [#allocation4], 0 }
  0x1d   :  { %37 = vsyncpa [#allocation4 + $0x1], 0 }
  0x1e   :  { %38 = vsyncpa [#allocation15], 0 }
  0x1f   :  { %40 = vsyncpa [#allocation15 + $0x1], 0  ;;  %s3964_s0 = smov 0   ;;  %s3966_s30 = smov 0  }
  0x20   :  { %s3968_s20 = smov 0   ;;  %s3970_s21 = smov 0  }
  0x21   :  { %s3972_s1 = smov 0   ;;  %s3974_s22 = smov 0  }
  0x22   :  { %s3976_s2 = smov 0   ;;  %s3978_s23 = smov 0  }
  0x23   :  { %s3980_s24 = smov 0   ;;  %s3982_s25 = smov 0  }
  0x24   :  { %s3984_s3 = smov 0  }
  0x25 LB: > { %5355 = sst [smem:[#allocation23_spill]] %s3802_s30  ;;  %p5304_p0 = scmp.eq.s32.totalorder %s3838_s3, 0  ;;  %s3838_s3 = sphi %s3984_s3, %s46_s3   ;;  %s3834_s25 = sphi %s3982_s25, %s5449_s25   ;;  %s3830_s24 = sphi %s3980_s24, %s5448_s24   ;;  %s3826_s23 = sphi %s3978_s23, %s5447_s23   ;;  %s3822_s2 = sphi %s3976_s2, %s5440_s2   ;;  %s3818_s22 = sphi %s3974_s22, %s5446_s22   ;;  %s3814_s1 = sphi %s3972_s1, %s5445_s1   ;;  %s3810_s21 = sphi %s3970_s21, %s5439_s21   ;;  %s3806_s20 = sphi %s3968_s20, %s5444_s20   ;;  %s3802_s30 = sphi %s3966_s30, %s5443_s30   ;;  %s3798_s0 = sphi %s3964_s0, %s5438_s0  }
  0x26   : > { %5356 = sst [smem:[#allocation24_spill]] %s3810_s21  ;;  %p152_p1 = scmp.ne.s32.totalorder %s3806_s20, %s3802_s30 }
  0x27   : > { %5357 = sst [smem:[#allocation25_spill]] %s3814_s1  ;;  %p5303_p2 = scmp.lt.s32.totalorder %s3838_s3, 4 }
  0x28   : > { %5358 = sst [smem:[#allocation26_spill]] %s3822_s2  ;;  %p154_p3 = por %p152_p1, %p5304_p0 }
  0x29   : > { %5359 = sst [smem:[#allocation27_spill]] %s3826_s23  ;;  %s4029_s29 = sand.u32 1, %s3806_s20  }
  0x2a   : > { %5360 = sst [smem:[#allocation28_spill]] %s3830_s24  ;;  %s4032_s19 = sshll.u32 %s3834_s25, 4 }
  0x2b   : > { %s5361_s16 = sld [smem:[#allocation38_spill]]  ;;  %s635_s27 = scalar_lea.vmem [#allocation5], %s4029_s29 }
  0x2c   : > { %s642_s26 = sshll.u32 %s635_s27, 4  ;;  %p4045_p4 = pnand %p5303_p2, %p154_p3  ;;  %s4041_s26 = int_to_ptr.vmem [resolvable:$true] %s642_s26 }
  0x2d   : > { %s5363_s5 = sld [smem:[#allocation40_spill]]  ;;  %s5364_s18 = sand.u32 1, %s3838_s3  }
  0x2e   : > { %s5362_s28 = scalar_select %p4045_p4, 1, 0 }
  0x2f   : > { %s4057_s13 = scalar_lea.sflag [#allocation6], %s5364_s18  ;;  %p4063_p6 = pneg %p4045_p4 }
  0x31   : > { %s4038_s14 = scalar_lea.hbm %s5361_s16, %s4032_s19  ;;  %s3471_s12 = scalar_lea.hbm %s5361_s16, 32 }
  0x32   : > { %s3466_s10 = scalar_lea.hbm %s4038_s14, 16  ;;  %p3472_p9 = scmp.lt.u32.totalorder %s4038_s14, %s5361_s16 }
  0x33   : > { %s4053_s17 = scalar_lea.hbm %s5363_s5, %s4032_s19  ;;  %p3467_p5 = scmp.ne.s32.totalorder %s4038_s14, %s3466_s10 }
  0x34   : > { %s5365_s27 = scalar_select %p4063_p6, 1, 0 }
  0x35   : > { %p3469_p7 = pnand %p4063_p6, %p3467_p5  ;;  %p3473_p10 = scmp.lt.u32.totalorder %s3471_s12, %s3466_s10 }
  0x36   : > { %p3475_p12 = scmp.lt.u32.totalorder %s3466_s10, %s4038_s14 }
  0x37   : > { %p3470_p8 = pneg %p3469_p7  ;;  %p3474_p11 = por %p3473_p10, %p3472_p9 }
  0x39   : > { %p3476_p13 = por %p3475_p12, %p3474_p11 }
  0x3b   : > { %p3477_p1 = pnand %p3476_p13, %p3470_p8 }
  0x3d   : > { %3480 = shalt.err (!%p3477_p1)
}
  0x3e   : > { %s3481_s18 = scalar_lea.vmem %s4041_s26, 16  ;;  %s3840_s7 = smov [#allocation5]  }
  0x3f   : > { %p3482_p3 = scmp.ne.s32.totalorder %s4041_s26, %s3481_s18  ;;  %s3486_s11 = sshll.u32 %s3840_s7, 4  ;;  %s3487_s11 = int_to_ptr.vmem [resolvable:$false] %s3486_s11 }
  0x40   : > { %s3488_s9 = scalar_lea.vmem %s3487_s11, 32  ;;  %p3489_p2 = scmp.lt.s32.totalorder %s4041_s26, %s3487_s11 }
  0x41   : > { %p3484_p5 = pnand %p3482_p3, %p4063_p6  ;;  %p3490_p0 = scmp.lt.s32.totalorder %s3488_s9, %s3481_s18 }
  0x43   : > { %p3485_p7 = pneg %p3484_p5  ;;  %p3491_p9 = por %p3490_p0, %p3489_p2 }
  0x45   : > { %p3492_p10 = pnand %p3491_p9, %p3485_p7 }
  0x47   : > { %3495 = shalt.err (!%p3492_p10)
}
  0x48   : > { %3277 = dma.hbm_to_vmem [thread:$0]  (!%p4045_p4), %s4038_s14, 16, %s4041_s26, %s4057_s13  }
  0x49   : > { %s669_s10 = scalar_lea.vmem [#allocation8], %s4029_s29  ;;  %s5366_s15 = sand.u32 1, %s3838_s3  }
  0x4a   : > { %s676_s12 = sshll.u32 %s669_s10, 4  ;;  %s4090_s18 = scalar_lea.sflag [#allocation9], %s5366_s15  ;;  %s677_s12 = int_to_ptr.vmem [resolvable:$true] %s676_s12 }
  0x4b   : > { %s3496_s7 = scalar_lea.hbm %s4053_s17, 16  ;;  %s3501_s16 = scalar_lea.hbm %s5363_s5, 32 }
  0x4c   : > { %p3497_p0 = scmp.ne.s32.totalorder %s4053_s17, %s3496_s7  ;;  %p3502_p11 = scmp.lt.u32.totalorder %s4053_s17, %s5363_s5 }
  0x4d   : > { %p3503_p12 = scmp.lt.u32.totalorder %s3501_s16, %s3496_s7  ;;  %p3505_p1 = scmp.lt.u32.totalorder %s3496_s7, %s4053_s17 }
  0x4e   : > { %p3499_p2 = pnand %p3497_p0, %p4063_p6 }
  0x4f   : > { %p3504_p13 = por %p3503_p12, %p3502_p11 }
  0x50   : > { %p3500_p8 = pneg %p3499_p2 }
  0x51   : > { %p3506_p3 = por %p3505_p1, %p3504_p13 }
  0x53   : > { %p3507_p5 = pnand %p3506_p3, %p3500_p8 }
  0x55   : > { %3510 = shalt.err (!%p3507_p5)
}
  0x56   : > { %s3511_s14 = scalar_lea.vmem %s677_s12, 16  ;;  %s3841_s26 = smov [#allocation8]  }
  0x57   : > { %p3512_p7 = scmp.ne.s32.totalorder %s677_s12, %s3511_s14  ;;  %s3516_s10 = sshll.u32 %s3841_s26, 4  ;;  %s3517_s10 = int_to_ptr.vmem [resolvable:$false] %s3516_s10 }
  0x58   : > { %s3518_s15 = scalar_lea.vmem %s3517_s10, 32  ;;  %p3519_p0 = scmp.lt.s32.totalorder %s677_s12, %s3517_s10 }
  0x59   : > { %p3514_p9 = pnand %p3512_p7, %p4063_p6  ;;  %p3520_p2 = scmp.lt.s32.totalorder %s3518_s15, %s3511_s14 }
  0x5b   : > { %p3515_p10 = pneg %p3514_p9  ;;  %p3521_p4 = por %p3520_p2, %p3519_p0 }
  0x5d   : > { %p3522_p11 = pnand %p3521_p4, %p3515_p10 }
  0x5f   : > { %3525 = shalt.err (!%p3522_p11)
}
  0x60   : > { %p5367_p12 = scmp.ne.s32.totalorder %s5362_s28, 0  ;;  %s4111_s16 = sadd.s32 4294967295, %s3838_s3  }
  0x61   : > { %5368 = sst [smem:[#allocation29_spill]] %s4111_s16  ;;  %s5312_s2 = sadd.s32 4294967294, %s3838_s3  }
  0x62   : > { %3283 = dma.hbm_to_vmem [thread:$0]  (!%p5367_p12), %s4053_s17, 16, %s677_s12, %s4090_s18  }
  0x63   : > { %p100_p4 = scmp.ne.s32.totalorder %s3818_s22, %s3814_s1  ;;  %p106_p8 = scmp.ne.s32.totalorder %s3814_s1, %s3810_s21 }
  0x64   : > { %p5320_p13 = scmp.eq.s32.totalorder %s4111_s16, 0  ;;  %p158_p1 = scmp.ne.s32.totalorder %s3802_s30, %s3798_s0 }
  0x65   : > { %p5369_p3 = scmp.eq.s32.totalorder %s3838_s3, 0  ;;  %p472_p7 = scmp.eq.s32.totalorder %s4111_s16, 3 }
  0x66   : > { %p4130_p9 = por %p5320_p13, %p106_p8  ;;  %p4136_p10 = por %p158_p1, %p5320_p13 }
  0x67   : > { %p4123_p5 = por %p5369_p3, %p100_p4  ;;  %p4140_p0 = por %p472_p7, %p100_p4 }
  0x68   : > { %s5371_s17 = scalar_select %p4130_p9, 1, 0 }
  0x69   : > { %s5370_s23 = scalar_select %p4123_p5, 1, 0 }
  0x6a   : > { %5372 = sst [smem:[#allocation30_spill]] %s5371_s17  ;;  %p478_p2 = scmp.eq.s32.totalorder %s5312_s2, 3 }
  0x6b   : > { %s5373_s12 = scalar_select %p4136_p10, 1, 0 }
  0x6c   : > { %s5375_s0 = scalar_select %p4140_p0, 1, 0 }
  0x6d   : > { %5374 = sst [smem:[#allocation31_spill]] %s5373_s12  ;;  %p3080_p11 = scmp.ge.s32.totalorder %s3838_s3, 1 }
  0x6e   : > { %5376 = sst [smem:[#allocation32_spill]] %s5375_s0  ;;  %p541_p3 = scmp.lt.s32.totalorder %s3838_s3, 5 }
  0x6f   : > { %p4148_p12 = por %p478_p2, %p106_p8  ;;  %s3842_s9 = smov [#allocation11]  }
  0x70   : > { %p4152_p6 = pnand %p3080_p11, %p541_p3  ;;  %s557_s14 = sshll.u32 %s3842_s9, 4  ;;  %s558_s14 = int_to_ptr.vmem [resolvable:$true] %s557_s14 }
  0x71   : > { %s5377_s7 = scalar_select %p4148_p12, 1, 0 }
  0x72   : > { %s5379_s11 = scalar_select %p4152_p6, 1, 0 }
  0x73   : > { %5378 = sst [smem:[#allocation33_spill]] %s5377_s7  ;;  %p3267_p4 = pneg %p4152_p6 }
  0x74   : > { %s55_s15 = sadd.s32 1, %s3830_s24  ;;  %s5329_s5 = sand.u32 1, %s3818_s22  }
  0x75   : > { %p4161_p1 = pnand %p3267_p4, %p5320_p13  ;;  %p4166_p8 = scmp.ge.s32.totalorder %s55_s15, 2 }
  0x76   : > { %s5382_s8 = sld [smem:[#allocation43_spill]] }
  0x77   : > { %s5381_s2 = scalar_select %p4166_p8, 1, 0 }
  0x78   : > { %p3528_p2 = pneg %p4161_p1 }
  0x7c   : > { %s3526_s9 = scalar_lea.hbm %s5382_s8, 16 }
  0x7d   : > { %p3527_p7 = scmp.ne.s32.totalorder %s5382_s8, %s3526_s9  ;;  %p3533_p4 = scmp.lt.u32.totalorder %s3526_s9, %s5382_s8 }
  0x7f   : > { %p3529_p11 = pnand %p3528_p2, %p3527_p7 }
  0x81   : > { %p3530_p3 = pneg %p3529_p11 }
  0x83   : > { %p3535_p13 = pnand %p3533_p4, %p3530_p3 }
  0x85   : > { %3538 = shalt.err (!%p3535_p13)
}
  0x86   : > { %s3539_s16 = scalar_lea.vmem %s558_s14, 16  ;;  %s3546_s21 = scalar_lea.vmem %s558_s14, 32 }
  0x87   : > { %p3540_p12 = scmp.ne.s32.totalorder %s558_s14, %s3539_s16  ;;  %p3547_p9 = scmp.lt.s32.totalorder %s558_s14, %s558_s14 }
  0x88   : > { %p3548_p6 = scmp.lt.s32.totalorder %s3546_s21, %s3539_s16 }
  0x89   : > { %p3542_p0 = pnand %p3540_p12, %p3528_p2 }
  0x8a   : > { %p3549_p5 = por %p3548_p6, %p3547_p9 }
  0x8b   : > { %p3543_p10 = pneg %p3542_p0 }
  0x8d   : > { %p3550_p8 = pnand %p3549_p5, %p3543_p10 }
  0x8f   : > { %3553 = shalt.err (!%p3550_p8)
}
  0x90   : > { %3270 = dma.hbm_to_vmem [thread:$0]  (!%p4161_p1), %s5382_s8, 16, %s558_s14, [#allocation12]  }
  0x91   : > { %p5383_p12 = scmp.ne.s32.totalorder %s5381_s2, 0  ;;  %s5385_s30 = sadd.s32 1, %s3834_s25 }
  0x92   : > { %s3083_s7 = sshll.u32 %s5329_s5, 7  ;;  %s3154_s26 = sshll.u32 %s3830_s24, 4 }
  0x93   : > { %s5451_s15 = smov (%p5383_p12, %s55_s15), 0  ;;  %s5453_s30 = smov (!%p5383_p12, %s5385_s30), %s3834_s25 }
  0x94   : > { %5384 = sst [smem:[#allocation34_spill]] %s5451_s15  ;;  %s89_s16 = ssub.s32 %s3830_s24, %s5451_s15 }
  0x95   : > { %p60_p6 = scmp.ge.s32.totalorder %s5453_s30, 2  ;;  %s3086_s14 = sshll.u32 %s3834_s25, 5 }
  0x96   : > { %s611_s10 = sadd.s32 %s3154_s26, %s3086_s14  ;;  %s604_s2 = scalar_lea.vmem [#allocation2], %s3083_s7 }
  0x97   : > { %s5455_s30 = smov (%p60_p6, %s5453_s30), 0  ;;  %s614_s9 = sshll.u32 %s604_s2, 4  ;;  %s4221_s9 = int_to_ptr.vmem [resolvable:$true] %s614_s9 }
  0x98   : > { %s88_s21 = ssub.s32 %s3834_s25, %s5455_s30  ;;  %s3087_s12 = sshll.u32 %s611_s10, 7 }
  0x99   : > { %s90_s0 = sor.u32 %s89_s16, %s88_s21  ;;  %p143_p13 = scmp.eq.s32.totalorder %s88_s21, 0 }
  0x9a   : > { %p91_p5 = scmp.eq.s32.totalorder %s90_s0, 0  ;;  %s5386_s5 = sld [smem:[#allocation36_spill]] }
  0x9b   : > { %s5387_s1 = sadd.s32 1, %s3806_s20  ;;  %s5388_s26 = sadd.s32 1, %s3818_s22 }
  0x9c   : > { %s4214_s24 = scalar_select %p143_p13, %s3806_s20, %s5387_s1  }
  0x9d   : > { %s4219_s7 = scalar_select %p91_p5, %s3818_s22, %s5388_s26  }
  0x9e   : > { %p5389_p9 = scmp.ne.s32.totalorder %s5370_s23, 0  ;;  %p5390_p10 = scmp.lt.s32.totalorder %s3838_s3, 4 }
  0x9f   : > { %s5392_s8 = sand.u32 1, %s3818_s22  }
  0xa0   : > { %s4209_s17 = scalar_lea.hbm %s5386_s5, %s3087_s12  ;;  %p4227_p0 = pnand %p5390_p10, %p5389_p9 }
  0xa1   : > { %s4233_s15 = scalar_lea.sflag [#allocation3], %s5392_s8  ;;  %s3554_s14 = scalar_lea.hbm %s4209_s17, 2048 }
  0xa2   : > { %p3555_p1 = scmp.ne.s32.totalorder %s4209_s17, %s3554_s14  ;;  %p3556_p8 = pneg %p4227_p0 }
  0xa3   : > { %s3559_s10 = scalar_lea.hbm %s5386_s5, 8192  ;;  %p3560_p11 = scmp.lt.u32.totalorder %s4209_s17, %s5386_s5 }
  0xa4   : > { %p3557_p7 = pnand %p3556_p8, %p3555_p1  ;;  %p3561_p3 = scmp.lt.u32.totalorder %s3559_s10, %s3554_s14 }
  0xa5   : > { %p3563_p12 = scmp.lt.u32.totalorder %s3554_s14, %s4209_s17 }
  0xa6   : > { %p3558_p2 = pneg %p3557_p7  ;;  %p3562_p4 = por %p3561_p3, %p3560_p11 }
  0xa8   : > { %p3564_p6 = por %p3563_p12, %p3562_p4 }
  0xaa   : > { %p3565_p13 = pnand %p3564_p6, %p3558_p2 }
  0xac   : > { %3568 = shalt.err (!%p3565_p13)
}
  0xad   : > { %s3569_s12 = scalar_lea.vmem %s4221_s9, 2048  ;;  %s3843_s0 = smov [#allocation2]  }
  0xae   : > { %p3570_p5 = scmp.ne.s32.totalorder %s4221_s9, %s3569_s12  ;;  %s3574_s26 = sshll.u32 %s3843_s0, 4  ;;  %s3575_s26 = int_to_ptr.vmem [resolvable:$false] %s3574_s26 }
  0xaf   : > { %s3576_s8 = scalar_lea.vmem %s3575_s26, 4096  ;;  %p3577_p1 = scmp.lt.s32.totalorder %s4221_s9, %s3575_s26 }
  0xb0   : > { %p3572_p9 = pnand %p3570_p5, %p3556_p8  ;;  %p3578_p7 = scmp.lt.s32.totalorder %s3576_s8, %s3569_s12 }
  0xb2   : > { %p3573_p10 = pneg %p3572_p9  ;;  %p3579_p11 = por %p3578_p7, %p3577_p1 }
  0xb4   : > { %p3580_p3 = pnand %p3579_p11, %p3573_p10 }
  0xb6   : > { %3583 = shalt.err (!%p3580_p3)
}
  0xb7   : > { %s3844_s14 = smov 128   ;;  %s3845_s1 = smov 8  }
  0xb8   : > { %3274 = dma.hbm_to_vmem [thread:$0]  (!%p4227_p0), %s4209_s17, 2048, %s4221_s9, %s4233_s15, %s3844_s14, %s3844_s14, %s3845_s1  }
  0xb9   : > { %s5393_s4 = sld [smem:[#allocation39_spill]]  ;;  %s652_s21 = scalar_lea.vmem [#allocation7], %s4029_s29 }
  0xba   : > { %s659_s12 = sshll.u32 %s652_s21, 4  ;;  %p5394_p2 = scmp.ne.s32.totalorder %s5365_s27, 0  ;;  %s660_s12 = int_to_ptr.vmem [resolvable:$true] %s659_s12 }
  0xbf   : > { %s4265_s2 = scalar_lea.hbm %s5393_s4, %s4032_s19  ;;  %s3589_s17 = scalar_lea.hbm %s5393_s4, 32 }
  0xc0   : > { %s3584_s0 = scalar_lea.hbm %s4265_s2, 16  ;;  %p3590_p0 = scmp.lt.u32.totalorder %s4265_s2, %s5393_s4 }
  0xc1   : > { %p3585_p8 = scmp.ne.s32.totalorder %s4265_s2, %s3584_s0  ;;  %p3591_p6 = scmp.lt.u32.totalorder %s3589_s17, %s3584_s0 }
  0xc2   : > { %p3593_p5 = scmp.lt.u32.totalorder %s3584_s0, %s4265_s2 }
  0xc3   : > { %p3587_p4 = pnand %p3585_p8, %p5394_p2  ;;  %p3592_p13 = por %p3591_p6, %p3590_p0 }
  0xc5   : > { %p3588_p12 = pneg %p3587_p4  ;;  %p3594_p9 = por %p3593_p5, %p3592_p13 }
  0xc7   : > { %p3595_p10 = pnand %p3594_p9, %p3588_p12 }
  0xc9   : > { %3598 = shalt.err (!%p3595_p10)
}
  0xca   : > { %s3599_s8 = scalar_lea.vmem %s660_s12, 16  ;;  %s3846_s14 = smov [#allocation7]  }
  0xcb   : > { %p3600_p1 = scmp.ne.s32.totalorder %s660_s12, %s3599_s8  ;;  %s3604_s1 = sshll.u32 %s3846_s14, 4  ;;  %s3605_s1 = int_to_ptr.vmem [resolvable:$false] %s3604_s1 }
  0xcc   : > { %s3606_s23 = scalar_lea.vmem %s3605_s1, 32  ;;  %p3607_p3 = scmp.lt.s32.totalorder %s660_s12, %s3605_s1 }
  0xcd   : > { %p3602_p7 = pnand %p3600_p1, %p5394_p2  ;;  %p3608_p8 = scmp.lt.s32.totalorder %s3606_s23, %s3599_s8 }
  0xcf   : > { %p3603_p11 = pneg %p3602_p7  ;;  %p3609_p4 = por %p3608_p8, %p3607_p3 }
  0xd1   : > { %p3610_p0 = pnand %p3609_p4, %p3603_p11 }
  0xd3   : > { %3613 = shalt.err (!%p3610_p0)
}
  0xd4   : > { %p5395_p6 = scmp.ne.s32.totalorder %s5362_s28, 0  ;;  %s5396_s6 = sld [smem:[#allocation41_spill]] }
  0xd5   : > { %s686_s26 = scalar_lea.vmem [#allocation10], %s4029_s29 }
  0xd6   : > { %3280 = dma.hbm_to_vmem [thread:$0]  (!%p5395_p6), %s4265_s2, 16, %s660_s12, %s4057_s13  }
  0xd7   : > { %s693_s16 = sshll.u32 %s686_s26, 4  ;;  %s694_s16 = int_to_ptr.vmem [resolvable:$true] %s693_s16 }
  0xda   : > { %s4290_s0 = scalar_lea.hbm %s5396_s6, %s4032_s19  ;;  %s3619_s13 = scalar_lea.hbm %s5396_s6, 32 }
  0xdb   : > { %s3614_s17 = scalar_lea.hbm %s4290_s0, 16  ;;  %p3620_p9 = scmp.lt.u32.totalorder %s4290_s0, %s5396_s6 }
  0xdc   : > { %p3615_p12 = scmp.ne.s32.totalorder %s4290_s0, %s3614_s17  ;;  %p3621_p10 = scmp.lt.u32.totalorder %s3619_s13, %s3614_s17 }
  0xdd   : > { %p3623_p7 = scmp.lt.u32.totalorder %s3614_s17, %s4290_s0 }
  0xde   : > { %p3617_p13 = pnand %p3615_p12, %p5394_p2  ;;  %p3622_p1 = por %p3621_p10, %p3620_p9 }
  0xe0   : > { %p3618_p5 = pneg %p3617_p13  ;;  %p3624_p11 = por %p3623_p7, %p3622_p1 }
  0xe2   : > { %p3625_p3 = pnand %p3624_p11, %p3618_p5 }
  0xe4   : > { %3628 = shalt.err (!%p3625_p3)
}
  0xe5   : > { %s3629_s19 = scalar_lea.vmem %s694_s16, 16  ;;  %s3847_s29 = smov [#allocation10]  }
  0xe6   : > { %p3630_p8 = scmp.ne.s32.totalorder %s694_s16, %s3629_s19  ;;  %s3634_s8 = sshll.u32 %s3847_s29, 4  ;;  %s3635_s8 = int_to_ptr.vmem [resolvable:$false] %s3634_s8 }
  0xe7   : > { %s3636_s14 = scalar_lea.vmem %s3635_s8, 32  ;;  %p3637_p12 = scmp.lt.s32.totalorder %s694_s16, %s3635_s8 }
  0xe8   : > { %p3632_p4 = pnand %p3630_p8, %p5394_p2  ;;  %p3638_p13 = scmp.lt.s32.totalorder %s3636_s14, %s3629_s19 }
  0xea   : > { %p3633_p0 = pneg %p3632_p4  ;;  %p3639_p6 = por %p3638_p13, %p3637_p12 }
  0xec   : > { %p3640_p9 = pnand %p3639_p6, %p3633_p0 }
  0xee   : > { %3643 = shalt.err (!%p3640_p9)
}
  0xef   : > { %p5397_p10 = scmp.ne.s32.totalorder %s5362_s28, 0  ;;  %p5398_p5 = scmp.ne.s32.totalorder %s5379_s11, 0 }
  0xf0   : > { %s5399_s27 = sld [smem:[#allocation25_spill]] (!%p5398_p5)  ;;  %s5400_s1 = sld [smem:[#allocation30_spill]] (!%p5398_p5) }
  0xf1   : > { %3286 = dma.hbm_to_vmem [thread:$0]  (!%p5397_p10), %s4290_s0, 16, %s694_s16, %s4090_s18  }
  0xf2   : > { %702 = sbr.rel (%p5398_p5) target bundleno = 1061 (0x425), region = 88 }
  0xf6   : > { %s4314_s23 = sand.u32 (!%p5398_p5), 1, %s5399_s27   ;;  %p5401_p2 = scmp.ne.s32.totalorder (!%p5398_p5), %s5400_s1, 0 }
  0xf7   : > { %s3093_s10 = sshll.u32 (!%p5398_p5), %s4314_s23, 7  ;;  %s705_s21 = scalar_lea.sflag (!%p5398_p5), [#allocation3], %s4314_s23 }
  0xf8   : > { %s4318_s26 = scalar_lea.vmem (!%p5398_p5), [#allocation2], %s3093_s10 }
  0xf9   : > { %3773 = dma.done.wait (%p5401_p2), %s705_s21, 2048  }
  0xfa   : > { %3775 = vsyncadd (%p5401_p2), %s705_s21, 4294965248  ;;  %s5402_s28 = sld [smem:[#allocation29_spill]]  ;;  %s5403_s18 = sld [smem:[#allocation23_spill]] }
  0xfb   : > { %s5404_s0 = sld [smem:[#allocation31_spill]] }
 0x100   : > { %s4325_s11 = sand.u32 1, %s5402_s28   ;;  %s4328_s16 = sand.u32 1, %s5403_s18  }
 0x101   : > { %s714_s17 = scalar_lea.sflag [#allocation6], %s4325_s11  ;;  %p5405_p6 = scmp.ne.s32.totalorder %s5404_s0, 0 }
 0x103   : > { %3777 = dma.done.wait (%p5405_p6), %s714_s17, 32  }
 0x104   : > { %3779 = vsyncadd (%p5405_p6), %s714_s17, 4294967264  ;;  %s730_s13 = scalar_lea.sflag [#allocation9], %s4325_s11 }
 0x105   : > { %3781 = dma.done.wait (%p5405_p6), %s730_s13, 32  }
 0x106   : > { %3783 = vsyncadd (%p5405_p6), %s730_s13, 4294967264  ;;  %p5406_p1 = scmp.eq.s32.totalorder %s5402_s28, 0 }
 0x108   : > { %3785 = dma.done.wait (%p5406_p1), [#allocation12], 16   ;;  %p5407_p7 = pmov %p5406_p1 }
 0x109   : > { %s5408_s19 = sld [smem:[#allocation27_spill]]  ;;  %s5409_s29 = sld [smem:[#allocation26_spill]]  ;;  %v3848_v0 = vmov 0.0   ;;  %vm3849_vm0 = vmmov 0   ;;  %v3850_v1 = vmov 0   ;;  %vm880_vm1 = vcmask 261120  }
 0x10a   : > { %3787 = vsyncadd (%p5407_p7), [#allocation12], 4294967280  ;;  %3185 = vmatprep.subr.bf16.mxu0 %v3848_v0  ;;  %3193 = vmatprep.subr.bf16.mxu1 %v3848_v0  ;;  %s5410_s10 = sld [smem:[#allocation35_spill]]  ;;  %s5411_s17 = sld [smem:[#allocation44_spill]]  ;;  %v1011_v12 = vld [vmem:[%s4318_s26] sm:$0xff]  ;;  %v1012_v13 = vld [vmem:[%s4318_s26 + $0x8] sm:$0xff] }
 0x10b   : > { %3189 = vmatprep.mubr.msk.bf16.mxu0 %vm3849_vm0, %v3848_v0  ;;  %3197 = vmatprep.mubr.msk.bf16.mxu1 %vm3849_vm0, %v3848_v0  ;;  %s5412_s12 = sld [smem:[#allocation42_spill]]  ;;  %s5413_s18 = sld [smem:[#allocation46_spill]]  ;;  %vm1050_vm2 = vcmask 130048   ;;  %v4387_v14 = vld [vmem:[%s4318_s26 + $0x10] sm:$0xff]  ;;  %v1029_v15 = vpack.c.bf16 %v1012_v13, %v1011_v12  ;;  %v4395_v19 = vld [vmem:[%s4318_s26 + $0x18] sm:$0xff]  ;;  %v1015_v20 = vld [vmem:[%s4318_s26 + $0x20] sm:$0xff]  ;;  %v2696_v26 = vmul.f32 %v1011_v12, %v1011_v12  ;;  %v2697_v27 = vmul.f32 %v1012_v13, %v1012_v13 }
 0x10c   : > { %3405 = vset.pattern.permute.xlu0 %v3850_v1  ;;  %3406 = vset.pattern.permute.xlu1 %v3850_v1  ;;  %v2585_v16 = vsel %vm1050_vm2, %v1011_v12, 0.0  ;;  %v2586_v17 = vsel %vm1050_vm2, %v1012_v13, 0.0  ;;  %v4392_v18 = vsel %vm1050_vm2, %v1011_v12, inf  ;;  %v1016_v21 = vld [vmem:[%s4318_s26 + $0x28] sm:$0xff]  ;;  %v4400_v23 = vsel %vm1050_vm2, %v1012_v13, inf  ;;  %v4425_v38 = vld [vmem:[%s4318_s26 + $0x30] sm:$0xff] }
 0x10d   : > { %v2587_v22 = vadd.f32 %v2586_v17, %v2585_v16  ;;  %v4403_v24 = vsel %vm1050_vm2, %v1011_v12, -inf  ;;  %v4406_v25 = vsel %vm1050_vm2, %v1012_v13, -inf  ;;  %v1030_v28 = vpack.c.bf16 %v4395_v19, %v4387_v14  ;;  %v4428_v39 = vld [vmem:[%s4318_s26 + $0x38] sm:$0xff]  ;;  %s5414_s15 = sld [smem:[#allocation37_spill]]  ;;  %s5416_s1 = sld [smem:[#allocation48_spill]] }
 0x10e   : > { %v2588_v29 = vsel %vm1050_vm2, %v4387_v14, 0.0  ;;  %v2698_v30 = vmul.f32 %v4387_v14, %v4387_v14  ;;  %v2699_v31 = vmul.f32 %v4395_v19, %v4395_v19  ;;  %v1031_v32 = vpack.c.bf16 %v1016_v21, %v1015_v20  ;;  %s5415_s0 = sld [smem:[#allocation45_spill]]  ;;  %s5418_s4 = sld [smem:[#allocation47_spill]] }
 0x10f   : > { %p835_p11 = scmp.lt.s32.totalorder %s5408_s19, 1  ;;  %s3102_s28 = sshll.u32 %s5409_s29, 3  ;;  %v2590_v33 = vsel %vm1050_vm2, %v4395_v19, 0.0  ;;  %v2712_v34 = vsel %vm1050_vm2, %v2696_v26, 0.0  ;;  %v2713_v35 = vsel %vm1050_vm2, %v2697_v27, 0.0  ;;  %v2589_v36 = vadd.f32 %v2588_v29, %v2587_v22 }
 0x110   : > { %v3407_v2 = vld [vmem:[%s5411_s17] sm:$0xff]   ;;  %v3409_v4 = vld [vmem:[%s5411_s17 + $0x8] sm:$0xff]   ;;  %v2592_v37 = vsel %vm1050_vm2, %v1015_v20, 0.0  ;;  %v2714_v40 = vadd.f32 %v2713_v35, %v2712_v34  ;;  %v2715_v41 = vsel %vm1050_vm2, %v2698_v30, 0.0  ;;  %v2594_v42 = vsel %vm1050_vm2, %v1016_v21, 0.0  ;;  %s5422_s2 = scalar_lea.vmem [#allocation5], %s4328_s16 }
 0x111   : > { %s4356_s8 = scalar_select %p835_p11, %s5408_s19, 1  ;;  %v3408_v3 = vld [vmem:[%s5412_s12] sm:$0xff]   ;;  %3186 = vmatpush3.bf16.msra.mxu0 %v3407_v2  ;;  %v3410_v5 = vld [vmem:[%s5412_s12 + $0x8] sm:$0xff]   ;;  %v2626_v43 = vsel %vm1050_vm2, %v1015_v20, inf  ;;  %v2591_v45 = vadd.f32 %v2590_v33, %v2589_v36  ;;  %v2628_v47 = vsel %vm1050_vm2, %v1016_v21, inf  ;;  %v2663_v48 = vsel %vm1050_vm2, %v1015_v20, -inf }
 0x112   : > { %3194 = vmatpush3.bf16.msra.mxu1 %v3408_v3  ;;  %3187 = vmatprep.subr.bf16.mxu0 %v3848_v0  ;;  %v3411_v10 = vld [vmem:[%s5413_s18] sm:$0xff]   ;;  %v2627_v46 = vmin.f32 %v4392_v18, %v2626_v43  ;;  %v2629_v49 = vmin.f32 %v4400_v23, %v2628_v47  ;;  %v2664_v50 = vmax.f32 %v4403_v24, %v2663_v48  ;;  %v2665_v51 = vsel %vm1050_vm2, %v1016_v21, -inf  ;;  %v1022_v33 = vld [vmem:[%s4318_s26 + $0x58] sm:$0xff]  ;;  %s5423_s18 = scalar_lea.vmem [#allocation10], %s4328_s16  ;;  %s3860_s27 = smov 112  }
 0x113   : > { %s3155_s14 = sshll.u32 %s4356_s8, 4  ;;  %3195 = vmatprep.subr.bf16.mxu1 %v3848_v0  ;;  %v2700_v52 = vmul.f32 %v1015_v20, %v1015_v20  ;;  %v2593_v53 = vadd.f32 %v2592_v37, %v2591_v45  ;;  %v2666_v54 = vmax.f32 %v4406_v25, %v2665_v51  ;;  %v2701_v55 = vmul.f32 %v1016_v21, %v1016_v21 }
 0x114   : > { %s839_s21 = scalar_lea.vmem %s5410_s10, %s3155_s14  ;;  %v2716_v56 = vadd.f32 %v2715_v41, %v2714_v40  ;;  %v2717_v57 = vsel %vm1050_vm2, %v2699_v31, 0.0  ;;  %v1032_v59 = vpack.c.bf16 %v4428_v39, %v4425_v38  ;;  %v2596_v60 = vsel %vm1050_vm2, %v4425_v38, 0.0  ;;  %s5417_s10 = smov %s5416_s1 }
 0x115   : > { %s852_s9 = scalar_lea.vmem %s839_s21, %s3102_s28  ;;  %v848_v6 = vld [vmem:[%s839_s21] sm:$0xff]  ;;  %v849_v7 = vld [vmem:[%s839_s21 + $0x8] sm:$0xff]  ;;  %3188 = vmatpush3.bf16.msra.mxu0 %v3409_v4  ;;  %s4435_s21 = scalar_lea.vmem %s5414_s15, %s3155_s14  ;;  %v2719_v58 = vsel %vm1050_vm2, %v2700_v52, 0.0  ;;  %v2595_v61 = vadd.f32 %v2594_v42, %v2593_v53  ;;  %v2721_v63 = vsel %vm1050_vm2, %v2701_v55, 0.0  ;;  %v2598_v1 = vsel %vm1050_vm2, %v4428_v39, 0.0 }
 0x116   : > { %v853_v8 = vld [vmem:[%s852_s9] sm:$0xff]  ;;  %v860_v9 = vpack.c.bf16 %v849_v7, %v848_v6  ;;  %3196 = vmatpush3.bf16.msra.mxu1 %v3410_v5  ;;  %3201 = vmatprep.subr.bf16.mxu0 %v3411_v10  ;;  %v4442_v44 = vld [vmem:[%s4435_s21 + $0x8] sm:$0xff]  ;;  %v2718_v62 = vadd.f32 %v2717_v57, %v2716_v56  ;;  %v2624_v2 = vsel %vm1050_vm2, %v4387_v14, inf  ;;  %v2625_v3 = vsel %vm1050_vm2, %v4395_v19, inf  ;;  %s854_s8 = scalar_lea.vmem %s4435_s21, %s3102_s28  ;;  %s5425_s15 = sld [smem:[#allocation49_spill]] }
 0x117   : > { %v941_v11 = vpack.c.bf16 %v853_v8, %v853_v8  ;;  %932 = vperm.xlu1 %3406, %v4442_v44   ;;  %v2630_v4 = vsel %vm1050_vm2, %v4425_v38, inf  ;;  %v2632_v5 = vsel %vm1050_vm2, %v4428_v39, inf  ;;  %v2597_v7 = vadd.f32 %v2596_v60, %v2595_v61  ;;  %v1023_v55 = vld [vmem:[%s4318_s26 + $0x60] sm:$0xff]  ;;  %v1024_v56 = vld [vmem:[%s4318_s26 + $0x68] sm:$0xff]  ;;  %s3856_s14 = smov 32   ;;  %s3857_s28 = smov 48  }
 0x118   : > { %3190 = vmatmul.mubr.msk.bf16.vlgmr.msra.gmra.mrb[0].mxu0 %vm880_vm1, %v860_v9  ;;  %v2720_v6 = vadd.f32 %v2719_v58, %v2718_v62  ;;  %v2631_v8 = vmin.f32 %v2624_v2, %v2630_v4  ;;  %v2633_v9 = vmin.f32 %v2625_v3, %v2632_v5  ;;  %v2661_v12 = vsel %vm1050_vm2, %v4387_v14, -inf  ;;  %s3861_s9 = smov [#allocation13]  }
 0x119   : > { %3198 = vmatmul.mubr.msk.bf16.vlgmr.msra.gmra.mrb[0].mxu1 %vm880_vm1, %v941_v11  ;;  %3202 = vmatpush3.bf16.msra.mxu0 %v3411_v10  ;;  %v1019_v10 = vld [vmem:[%s4318_s26 + $0x40] sm:$0xff]  ;;  %v1020_v11 = vld [vmem:[%s4318_s26 + $0x48] sm:$0xff]  ;;  %v2662_v13 = vsel %vm1050_vm2, %v4395_v19, -inf  ;;  %v2669_v16 = vsel %vm1050_vm2, %v4428_v39, -inf  ;;  %v2599_v18 = vadd.f32 %v2598_v1, %v2597_v7  ;;  %v2702_v22 = vmul.f32 %v4425_v38, %v4425_v38 }
 0x11a   : > { %3203 = vmatprep.mubr.msk.bf16.mxu0 %vm1050_vm2, %v1029_v15  ;;  %3239 = vmatprep.subr.bf16.mxu0 %v3848_v0  ;;  %v2667_v15 = vsel %vm1050_vm2, %v4425_v38, -inf  ;;  %v2722_v17 = vadd.f32 %v2721_v63, %v2720_v6  ;;  %v2670_v21 = vmax.f32 %v2662_v13, %v2669_v16  ;;  %v2703_v14 = vmul.f32 %v4428_v39, %v4428_v39 }
 0x11b   : > { %v2668_v20 = vmax.f32 %v2661_v12, %v2667_v15  ;;  %v1033_v23 = vpack.c.bf16 %v1020_v11, %v1019_v10  ;;  %v2600_v19 = vsel %vm1050_vm2, %v1019_v10, 0.0  ;;  %v2602_v25 = vsel %vm1050_vm2, %v1020_v11, 0.0 }
 0x11c   : > { %v2601_v24 = vadd.f32 %v2600_v19, %v2599_v18  ;;  %v2634_v26 = vsel %vm1050_vm2, %v1019_v10, inf  ;;  %v2636_v27 = vsel %vm1050_vm2, %v1020_v11, inf  ;;  %v2725_v29 = vsel %vm1050_vm2, %v2703_v14, 0.0 }
 0x11d   : > { %v2635_v30 = vmin.f32 %v2627_v46, %v2634_v26  ;;  %v2637_v31 = vmin.f32 %v2629_v49, %v2636_v27  ;;  %v2671_v36 = vsel %vm1050_vm2, %v1019_v10, -inf  ;;  %v2673_v37 = vsel %vm1050_vm2, %v1020_v11, -inf }
 0x11e   : > { %v2603_v35 = vadd.f32 %v2602_v25, %v2601_v24  ;;  %v2672_v38 = vmax.f32 %v2664_v50, %v2671_v36  ;;  %v2674_v39 = vmax.f32 %v2666_v54, %v2673_v37  ;;  %v2704_v40 = vmul.f32 %v1019_v10, %v1019_v10  ;;  %v1025_v10 = vld [vmem:[%s4318_s26 + $0x70] sm:$0xff]  ;;  %v4529_v36 = vld [vmem:[%s854_s8] sm:$0xff]  ;;  %s5419_s8 = scalar_lea.vmem [#allocation7], %s4328_s16 }
 0x11f   : > { %v2705_v41 = vmul.f32 %v1020_v11, %v1020_v11  ;;  %v2606_v46 = vsel %vm1050_vm2, %v1022_v33, 0.0  ;;  %v2640_v53 = vsel %vm1050_vm2, %v1022_v33, inf  ;;  %v2677_v60 = vsel %vm1050_vm2, %v1022_v33, -inf  ;;  %v1026_v11 = vld [vmem:[%s4318_s26 + $0x78] sm:$0xff] }
 0x120   : > { %3204 = vmatmul.mubr.msk.bf16.vlgmr.msra.gmra.mrb[4].mxu0 %vm1050_vm2, %v1030_v28  ;;  %v2723_v28 = vsel %vm1050_vm2, %v2702_v22, 0.0  ;;  %v2727_v47 = vsel %vm1050_vm2, %v2704_v40, 0.0  ;;  %v2641_v58 = vmin.f32 %v2633_v9, %v2640_v53  ;;  %v2678_v62 = vmax.f32 %v2670_v21, %v2677_v60 }
 0x121   : > { %3207 = vmatprep.mubr.msk.bf16.mxu0 %vm1050_vm2, %v1031_v32  ;;  %v1021_v32 = vld [vmem:[%s4318_s26 + $0x50] sm:$0xff]  ;;  %v2724_v34 = vadd.f32 %v2723_v28, %v2722_v17  ;;  %v2729_v48 = vsel %vm1050_vm2, %v2705_v41, 0.0  ;;  %v2707_v1 = vmul.f32 %v1022_v33, %v1022_v33  ;;  %v1035_v2 = vpack.c.bf16 %v1024_v56, %v1023_v55 }
 0x122   : > { %v1034_v43 = vpack.c.bf16 %v1022_v33, %v1021_v32  ;;  %v2604_v45 = vsel %vm1050_vm2, %v1021_v32, 0.0  ;;  %v2638_v51 = vsel %vm1050_vm2, %v1021_v32, inf  ;;  %v2675_v54 = vsel %vm1050_vm2, %v1021_v32, -inf }
 0x123   : > { %v2726_v42 = vadd.f32 %v2725_v29, %v2724_v34  ;;  %v2605_v49 = vadd.f32 %v2604_v45, %v2603_v35  ;;  %v2639_v50 = vmin.f32 %v2631_v8, %v2638_v51  ;;  %v2706_v63 = vmul.f32 %v1021_v32, %v1021_v32 }
 0x124   : > { %v2608_v3 = vsel %vm1050_vm2, %v1023_v55, 0.0  ;;  %v2610_v4 = vsel %vm1050_vm2, %v1024_v56, 0.0  ;;  %v2642_v5 = vsel %vm1050_vm2, %v1023_v55, inf  ;;  %v2733_v7 = vsel %vm1050_vm2, %v2707_v1, 0.0  ;;  %v3103_v1 = vld [vmem:[%s5415_s0] ss:$0 sm:$0xff] }
 0x125   : > { %v2728_v52 = vadd.f32 %v2727_v47, %v2726_v42  ;;  %v2607_v57 = vadd.f32 %v2606_v46, %v2605_v49  ;;  %v2731_v6 = vsel %vm1050_vm2, %v2706_v63, 0.0  ;;  %v2643_v9 = vmin.f32 %v2635_v30, %v2642_v5  ;;  %s5420_s0 = sld [smem:[#allocation50_spill]] }
 0x126   : > { %v2644_v13 = vsel %vm1050_vm2, %v1024_v56, inf  ;;  %v2679_v15 = vsel %vm1050_vm2, %v1023_v55, -inf  ;;  %v2681_v16 = vsel %vm1050_vm2, %v1024_v56, -inf  ;;  %v2708_v14 = vmul.f32 %v1023_v55, %v1023_v55 }
 0x127   : > { %v2730_v61 = vadd.f32 %v2729_v48, %v2728_v52  ;;  %v2609_v8 = vadd.f32 %v2608_v3, %v2607_v57  ;;  %v2645_v18 = vmin.f32 %v2637_v31, %v2644_v13  ;;  %v2682_v21 = vmax.f32 %v2674_v39, %v2681_v16 }
 0x128   : > { %3208 = vmatmul.mubr.msk.bf16.gmra.mrb[8].mxu0 %vm1050_vm2, %v1032_v59  ;;  %v2676_v59 = vmax.f32 %v2668_v20, %v2675_v54  ;;  %v2680_v20 = vmax.f32 %v2672_v38, %v2679_v15  ;;  %v1036_v19 = vpack.c.bf16 %v1026_v11, %v1025_v10  ;;  %v2612_v26 = vsel %vm1050_vm2, %v1025_v10, 0.0 }
 0x129   : > { %3211 = vmatprep.mubr.msk.bf16.mxu0 %vm1050_vm2, %v1033_v23  ;;  %v2732_v12 = vadd.f32 %v2731_v6, %v2730_v61  ;;  %v2611_v17 = vadd.f32 %v2610_v4, %v2609_v8  ;;  %v2709_v23 = vmul.f32 %v1024_v56, %v1024_v56  ;;  %v2650_v24 = vmin.f32 %v2643_v9, %v2645_v18 }
 0x12a   : > { %v2687_v25 = vmax.f32 %v2680_v20, %v2682_v21  ;;  %v2614_v27 = vsel %vm1050_vm2, %v1026_v11, 0.0  ;;  %v2735_v28 = vsel %vm1050_vm2, %v2708_v14, 0.0  ;;  %v2646_v31 = vsel %vm1050_vm2, %v1025_v10, inf }
 0x12b   : > { %v2734_v22 = vadd.f32 %v2733_v7, %v2732_v12  ;;  %v2737_v29 = vsel %vm1050_vm2, %v2709_v23, 0.0  ;;  %v2613_v30 = vadd.f32 %v2612_v26, %v2611_v17  ;;  %v2647_v33 = vmin.f32 %v2639_v50, %v2646_v31  ;;  %v4546_v50 = vld [vmem:[%s4435_s21] sm:$0xff]  ;;  %v3414_v26 = vld [vmem:[%s5417_s10 + $0x8] sm:$0xff]   ;;  %s3852_s21 = smov 96   ;;  %s5421_s13 = smov %s5420_s0 }
 0x12c   : > { %v2648_v34 = vsel %vm1050_vm2, %v1026_v11, inf  ;;  %v2683_v35 = vsel %vm1050_vm2, %v1025_v10, -inf  ;;  %v2685_v40 = vsel %vm1050_vm2, %v1026_v11, -inf  ;;  %v1004_v46 = vmul.f32 0.35355338, %v4529_v36  ;;  %v3413_v11 = vld [vmem:[%s5416_s1] sm:$0xff]  }
 0x12d   : > { %v2736_v32 = vadd.f32 %v2735_v28, %v2734_v22  ;;  %v4531_v37 = vadd.f32 %v2614_v27, %v2613_v30  ;;  %v2649_v38 = vmin.f32 %v2641_v58, %v2648_v34  ;;  %v2684_v39 = vmax.f32 %v2676_v59, %v2683_v35  ;;  %v3107_v58 = vld [vmem:[#allocation11] ss:$0 sm:$0xff]  ;;  %v4564_v17 = vld [vmem:[%s5418_s4] ss:$0 sm:$0xff]  ;;  %3219 = vmatprep.subr.bf16.mxu1 %v3413_v11  ;;  %s5424_s4 = scalar_lea.vmem [#allocation8], %s4328_s16  ;;  %s3097_s1 = sshll.u32 %s4314_s23, 2 }
 0x12e   : > { %v2686_v42 = vmax.f32 %v2678_v62, %v2685_v40  ;;  %1007 = vperm.xlu0 %3405, %v1004_v46   ;;  %v3851_v53 = vmov 1966171168   ;;  %v1177_v55 = vlaneseq  ;;  %3220 = vmatpush3.bf16.msra.mxu1 %v3413_v11  ;;  %vm2489_vm3 = vcmask 1041409  }
 0x12f   : > { %v2738_v41 = vadd.f32 %v2737_v29, %v2736_v32  ;;  %v2651_v45 = vmin.f32 %v2647_v33, %v2649_v38  ;;  %v1175_v54 = vunpack.c.l.s4 %v3851_v53  ;;  %3221 = vmatprep.subr.bf16.mxu1 %v3414_v26  ;;  %vm2491_vm4 = vcmask 1042434  }
 0x130   : > { %3212 = vmatmul.mubr.msk.bf16.gmra.mrb[12].mxu0 %vm1050_vm2, %v1034_v43  ;;  %v2710_v43 = vmul.f32 %v1025_v10, %v1025_v10  ;;  %v2688_v47 = vmax.f32 %v2684_v39, %v2686_v42  ;;  %v4549_v57 = vshrl.u32 %v1177_v55, 7  ;;  %vm2493_vm5 = vcmask 1043459  }
 0x131   : > { %3215 = vmatprep.mubr.msk.bf16.mxu0 %vm1050_vm2, %v1035_v2  ;;  %v4539_v49 = vmin.f32 %v2650_v24, %v2651_v45  ;;  %v1176_v56 = vunpack.c.0.s8 %v1175_v54  ;;  %vm2495_vm6 = vcmask 1044484   ;;  %vm2497_vm7 = vcmask 1045509  }
 0x132   : > { %v2739_v48 = vsel %vm1050_vm2, %v2710_v43, 0.0  ;;  %v4543_v52 = vmax.f32 %v2687_v25, %v2688_v47  ;;  %927 = vperm.xlu0 %3405, %v4546_v50   ;;  %v4567_v18 = vsub.s32 0, %v4549_v57  ;;  %3222 = vmatpush3.bf16.msra.mxu1 %v3414_v26  ;;  %vm2499_vm8 = vcmask 1046534  }
 0x133   : > { %v4541_v51 = vadd.f32 %v2739_v48, %v2738_v41  ;;  %v4552_v63 = vsub.s32 %v1176_v56, %v4549_v57  ;;  %vm2501_vm9 = vcmask 1047559   ;;  %vm2749_vm10 = vcmask 1040384  }
 0x134   : > { %vm2751_vm11 = vcmask 1041408   ;;  %vm2753_vm12 = vcmask 1042432   ;;  %vm2755_vm13 = vcmask 125952  }
 0x138   : > { %3216 = vmatmul.mubr.msk.bf16.gmra.mrb[16].mxu0 %vm1050_vm2, %v1036_v19 }
 0x139   : > { %3243 = vmatprep.mubr.msk.bf16.mxu0 %vm3849_vm0, %v3848_v0 }
 0x196   : > { %v933_v16 = vpop.permute.xlu1 %932 }
 0x1ad   : > { %v1008_v59 = vpop.permute.xlu0 %1007 }
 0x1b1   : > { %v928_v15 = vpop.permute.xlu0 %927 }
 0x1eb   : > { %v918_v60 = vpop.f32.mrb[0].mxu0 }
 0x1ec   : > { %v998_v61 = vpop.f32.mrb[0].mxu1  ;;  %v3191_v62 = vpop.f32.mrb[1].mxu0  ;;  %v919_v9 = vadd.f32 %v3103_v1, %v918_v60 }
 0x1ed   : > { %v999_v2 = vadd.f32 %v3107_v58, %v998_v61  ;;  %v921_v3 = vpop.f32.mrb[2].mxu0  ;;  %v3199_v4 = vpop.f32.mrb[1].mxu1 }
 0x1ee   : > { %v3192_v5 = vpop.f32.mrb[3].mxu0  ;;  %v1001_v6 = vpop.f32.mrb[2].mxu1  ;;  %v922_v10 = vadd.f32 %v3103_v1, %v921_v3  ;;  %v4571_v23 = vmul.f32 %v928_v15, %v919_v9 }
 0x1ef   : > { %v1010_v7 = vmul.f32 %v1008_v59, %v999_v2  ;;  %v3200_v8 = vpop.f32.mrb[3].mxu1 }
 0x1f0   : > { %v4573_v19 = vmul.f32 %v933_v16, %v922_v10 }
 0x1f1   : > { %v1173_v12 = vcombine.high %v1010_v7, %v1010_v7  ;;  %v1180_v13 = vrot.slane %v1010_v7, %v4552_v63 }
 0x1f3   : > { %v1187_v20 = vrot.slane %v1173_v12, %v4552_v63  ;;  %v1188_v21 = vcombine.high %v1180_v13, %v1180_v13  ;;  %v1196_v22 = vrot.slane %v1180_v13, %v4552_v63  ;;  %v3205_v14 = vpop.f32.mrb[4].mxu0 }
 0x1f4   : > { %v1118_v24 = vadd.f32 %v3205_v14, %v4564_v17  ;;  %v1109_v25 = vpop.f32.mrb[5].mxu0 }
 0x1f5   : > { %v1189_v27 = vcombine.high %v1187_v20, %v1187_v20  ;;  %v1110_v28 = vadd.f32 %v4564_v17, %v1109_v25  ;;  %v3206_v29 = vpop.f32.mrb[6].mxu0  ;;  %v1225_v30 = vrot.slane %v1196_v22, %v4567_v18  ;;  %v1210_v31 = vrot.slane %v1188_v21, %v4552_v63 }
 0x1f6   : > { %v1280_v32 = vadd.f32 1.0, %v1118_v24  ;;  %v1121_v33 = vadd.f32 %v3206_v29, %v4564_v17  ;;  %v1112_v34 = vpop.f32.mrb[7].mxu0  ;;  %v1218_v35 = vcombine.high %v1196_v22, %v1196_v22  ;;  %v1203_v38 = vrot.slane %v1187_v20, %v4552_v63 }
 0x1f7   : > { %v1278_v39 = vadd.f32 1.0, %v1110_v28  ;;  %v1113_v40 = vadd.f32 %v4564_v17, %v1112_v34  ;;  %1326 = vrot.lane.b32.xlu1 %v1110_v28, %s3852_s21  ;;  %v1262_v41 = vmul.f32 %v1225_v30, %v4571_v23  ;;  %v1263_v42 = vmul.f32 %v1225_v30, %v4573_v19 }
 0x1f8   : > { %v1281_v43 = vadd.f32 1.0, %v1121_v33  ;;  %v1229_v45 = vrot.slane %v1210_v31, %v4567_v18  ;;  %v1233_v46 = vrot.slane %v1218_v35, %v4567_v18  ;;  %v1220_v47 = vcombine.high %v1210_v31, %v1210_v31 }
 0x1f9   : > { %v1279_v48 = vadd.f32 1.0, %v1113_v40  ;;  %1328 = vrot.lane.b32.xlu0 %v1113_v40, %s3852_s21  ;;  %v4591_v53 = vmul.f32 %v1278_v39, %v1262_v41  ;;  %v1241_v54 = vrot.slane %v1203_v38, %v4567_v18  ;;  %v1217_v55 = vrot.slane %v1189_v27, %v4552_v63 }
 0x1fa   : > { %v1264_v56 = vmul.f32 %v1229_v45, %v4571_v23  ;;  %v1265_v58 = vmul.f32 %v1229_v45, %v4573_v19  ;;  %v1266_v59 = vmul.f32 %v1233_v46, %v4571_v23  ;;  %v1267_v60 = vmul.f32 %v1233_v46, %v4573_v19 }
 0x1fb   : > { %v3209_v61 = vpop.f32.mrb[8].mxu0  ;;  %1330 = vrot.lane.b32.xlu1 %v1118_v24, %s3852_s21  ;;  %v4600_v62 = vmul.f32 %v1279_v48, %v1263_v42  ;;  %v1237_v1 = vrot.slane %v1220_v47, %v4567_v18  ;;  %v1270_v2 = vmul.f32 %v1241_v54, %v4571_v23  ;;  %v1271_v3 = vmul.f32 %v1241_v54, %v4573_v19 }
 0x1fc   : > { %v1134_v4 = vadd.f32 %v3209_v61, %v4564_v17  ;;  %v1125_v5 = vpop.f32.mrb[9].mxu0  ;;  %v4606_v6 = vmul.f32 %v1280_v32, %v1264_v56  ;;  %v4608_v7 = vmul.f32 %v1281_v43, %v1265_v58  ;;  %v1245_v8 = vrot.slane %v1217_v55, %v4567_v18 }
 0x1fd   : > { %v1126_v9 = vadd.f32 %v4564_v17, %v1125_v5  ;;  %v3210_v10 = vpop.f32.mrb[10].mxu0  ;;  %1332 = vrot.lane.b32.xlu0 %v1121_v33, %s3852_s21  ;;  %v1268_v11 = vmul.f32 %v1237_v1, %v4571_v23  ;;  %v1269_v12 = vmul.f32 %v1237_v1, %v4573_v19  ;;  %v1219_v13 = vcombine.high %v1203_v38, %v1203_v38 }
 0x1fe   : > { %v1284_v15 = vadd.f32 1.0, %v1134_v4  ;;  %v1137_v16 = vadd.f32 %v3210_v10, %v4564_v17  ;;  %v1128_v20 = vpop.f32.mrb[11].mxu0  ;;  %v1272_v21 = vmul.f32 %v1245_v8, %v4571_v23  ;;  %v1273_v22 = vmul.f32 %v1245_v8, %v4573_v19 }
 0x1ff   : > { %v1282_v14 = vadd.f32 1.0, %v1126_v9  ;;  %v1129_v24 = vadd.f32 %v4564_v17, %v1128_v20  ;;  %1334 = vrot.lane.b32.xlu1 %v1126_v9, %s3852_s21  ;;  %v1249_v25 = vrot.slane %v1219_v13, %v4567_v18  ;;  %v1221_v26 = vcombine.high %v1217_v55, %v1217_v55 }
 0x200   : > { %v1285_v27 = vadd.f32 1.0, %v1137_v16  ;;  %v4621_v28 = vmul.f32 %v1284_v15, %v1268_v11  ;;  %v1444_v13 = vrot.slane %v4529_v36, %v4552_v63 }
 0x201   : > { %v1283_v29 = vadd.f32 1.0, %v1129_v24  ;;  %1336 = vrot.lane.b32.xlu0 %v1129_v24, %s3852_s21  ;;  %v4624_v30 = vmul.f32 %v1282_v14, %v1266_v59  ;;  %v1274_v31 = vmul.f32 %v1249_v25, %v4571_v23  ;;  %v1275_v32 = vmul.f32 %v1249_v25, %v4573_v19 }
 0x202   : > { %v4628_v33 = vmul.f32 %v1285_v27, %v1269_v12  ;;  %v1253_v34 = vrot.slane %v1221_v26, %v4567_v18  ;;  %v3135_v14 = vadd.f32 -1.0, %v4442_v44  ;;  %v1452_v27 = vcombine.high %v1444_v13, %v1444_v13 }
 0x203   : > { %v3213_v35 = vpop.f32.mrb[12].mxu0  ;;  %1338 = vrot.lane.b32.xlu1 %v1134_v4, %s3852_s21  ;;  %v4632_v38 = vmul.f32 %v1283_v29, %v1267_v60 }
 0x204   : > { %v1150_v39 = vadd.f32 %v3213_v35, %v4564_v17  ;;  %v1141_v40 = vpop.f32.mrb[13].mxu0  ;;  %v1276_v41 = vmul.f32 %v1253_v34, %v4571_v23  ;;  %v1277_v42 = vmul.f32 %v1253_v34, %v4573_v19  ;;  %v2142_v34 = vmul.f32 1e+30, %v3135_v14 }
 0x205   : > { %v1142_v43 = vadd.f32 %v4564_v17, %v1141_v40  ;;  %v3214_v45 = vpop.f32.mrb[14].mxu0  ;;  %1340 = vrot.lane.b32.xlu0 %v1137_v16, %s3852_s21 }
 0x206   : > { %v1288_v46 = vadd.f32 1.0, %v1150_v39  ;;  %v1153_v47 = vadd.f32 %v3214_v45, %v4564_v17  ;;  %v1144_v48 = vpop.f32.mrb[15].mxu0 }
 0x207   : > { %v1286_v54 = vadd.f32 1.0, %v1142_v43  ;;  %v1145_v55 = vadd.f32 %v4564_v17, %v1144_v48  ;;  %1342 = vrot.lane.b32.xlu1 %v1142_v43, %s3852_s21 }
 0x208   : > { %v1289_v56 = vadd.f32 1.0, %v1153_v47  ;;  %v4642_v58 = vmul.f32 %v1288_v46, %v1272_v21 }
 0x209   : > { %v1287_v59 = vadd.f32 1.0, %v1145_v55  ;;  %1344 = vrot.lane.b32.xlu0 %v1145_v55, %s3852_s21  ;;  %v4645_v60 = vmul.f32 %v1286_v54, %v1270_v2 }
 0x20a   : > { %v4647_v61 = vmul.f32 %v1289_v56, %v1273_v22 }
 0x20b   : > { %v3217_v1 = vpop.f32.mrb[16].mxu0  ;;  %1346 = vrot.lane.b32.xlu1 %v1150_v39, %s3852_s21  ;;  %v4650_v4 = vmul.f32 %v1287_v59, %v1271_v3  ;;  %v3134_v3 = vadd.f32 -1.0, %v4546_v50  ;;  %v1474_v39 = vrot.slane %v1452_v27, %v4552_v63 }
 0x20c   : > { %v1166_v5 = vadd.f32 %v3217_v1, %v4564_v17  ;;  %v1157_v8 = vpop.f32.mrb[17].mxu0 }
 0x20d   : > { %v1158_v9 = vadd.f32 %v4564_v17, %v1157_v8  ;;  %v3218_v10 = vpop.f32.mrb[18].mxu0  ;;  %1348 = vrot.lane.b32.xlu0 %v1153_v47, %s3852_s21  ;;  %v2141_v26 = vmul.f32 1e+30, %v3134_v3  ;;  %v1484_v46 = vcombine.high %v1474_v39, %v1474_v39 }
 0x20e   : > { %v1292_v11 = vadd.f32 1.0, %v1166_v5  ;;  %v1169_v12 = vadd.f32 %v3218_v10, %v4564_v17  ;;  %v1160_v2 = vpop.f32.mrb[19].mxu0 }
 0x20f   : > { %v1290_v15 = vadd.f32 1.0, %v1158_v9  ;;  %v1161_v16 = vadd.f32 %v4564_v17, %v1160_v2  ;;  %1350 = vrot.lane.b32.xlu1 %v1158_v9, %s3852_s21  ;;  %v1460_v17 = vrot.slane %v1444_v13, %v4552_v63  ;;  %v1501_v54 = vrot.slane %v1484_v46, %v4567_v18 }
 0x210   : > { %v1293_v20 = vadd.f32 1.0, %v1169_v12  ;;  %v4661_v21 = vmul.f32 %v1292_v11, %v1276_v41 }
 0x211   : > { %v1291_v22 = vadd.f32 1.0, %v1161_v16  ;;  %1352 = vrot.lane.b32.xlu0 %v1161_v16, %s3852_s21  ;;  %v4665_v24 = vmul.f32 %v1290_v15, %v1274_v31  ;;  %v1489_v35 = vrot.slane %v1460_v17, %v4567_v18  ;;  %v1437_v31 = vcombine.high %v4529_v36, %v4529_v36 }
 0x212   : > { %v4667_v25 = vmul.f32 %v1293_v20, %v1277_v42  ;;  %v1482_v41 = vcombine.high %v1460_v17, %v1460_v17  ;;  %v1532_v59 = vmul.f32 %v1501_v54, %v4546_v50  ;;  %v1533_v8 = vmul.f32 %v1501_v54, %v4442_v44 }
 0x213   : > { %1354 = vrot.lane.b32.xlu1 %v1166_v5, %s3852_s21  ;;  %v4671_v29 = vmul.f32 %v1291_v22, %v1275_v32  ;;  %v1526_v40 = vmul.f32 %v1489_v35, %v4546_v50  ;;  %v1493_v32 = vrot.slane %v1474_v39, %v4567_v18  ;;  %v1527_v42 = vmul.f32 %v1489_v35, %v4442_v44  ;;  %v4730_v35 = vld [vmem:[%s5422_s2] ss:$0 sm:$0xff]  ;;  %s3145_s2 = sshll.u32 %s5408_s19, 1 }
 0x214   : > { %v1497_v45 = vrot.slane %v1482_v41, %v4567_v18  ;;  %v1451_v47 = vrot.slane %v1437_v31, %v4552_v63 }
 0x215   : > { %1356 = vrot.lane.b32.xlu0 %v1169_v12, %s3852_s21  ;;  %v1528_v43 = vmul.f32 %v1493_v32, %v4546_v50 }
 0x216   : > { %v1530_v48 = vmul.f32 %v1497_v45, %v4546_v50  ;;  %v1453_v55 = vcombine.high %v1451_v47, %v1451_v47  ;;  %v1531_v56 = vmul.f32 %v1497_v45, %v4442_v44 }
 0x217   : > { %2145 = vperm.xlu1 %3406, %v2141_v26   ;;  %v4711_v26 = vld [vmem:[%s5419_s8] ss:$0 sm:$0xff]  ;;  %s3855_s8 = smov 16  }
 0x218   : > { %v1481_v5 = vrot.slane %v1453_v55, %v4552_v63 }
 0x219   : > { %2150 = vperm.xlu0 %3405, %v2142_v34  }
 0x21a   : > { %v1509_v10 = vrot.slane %v1481_v5, %v4567_v18  ;;  %v1485_v15 = vcombine.high %v1481_v5, %v1481_v5 }
 0x21b   : > { %2363 = vrot.lane.b32.xlu1 %v4571_v23, %s3852_s21  ;;  %v1529_v23 = vmul.f32 %v1493_v32, %v4442_v44 }
 0x21c   : > { %v1536_v2 = vmul.f32 %v1509_v10, %v4546_v50  ;;  %v1517_v3 = vrot.slane %v1485_v15, %v4567_v18 }
 0x21d   : > { %2365 = vrot.lane.b32.xlu0 %v4573_v19, %s3852_s21  ;;  %v1467_v19 = vrot.slane %v1451_v47, %v4552_v63  ;;  %v1537_v63 = vmul.f32 %v1509_v10, %v4442_v44 }
 0x21e   : > { %v1540_v22 = vmul.f32 %v1517_v3, %v4546_v50  ;;  %v1541_v14 = vmul.f32 %v1517_v3, %v4442_v44 }
 0x21f   : > { %1696 = vperm.xlu1 %3406, %v1526_v40   ;;  %v1505_v1 = vrot.slane %v1467_v19, %v4567_v18  ;;  %v1483_v11 = vcombine.high %v1467_v19, %v1467_v19 }
 0x221   : > { %1701 = vperm.xlu0 %3405, %v1527_v42   ;;  %v1534_v9 = vmul.f32 %v1505_v1, %v4546_v50  ;;  %v1535_v12 = vmul.f32 %v1505_v1, %v4442_v44  ;;  %v1513_v13 = vrot.slane %v1483_v11, %v4567_v18  ;;  %v3415_v18 = vld [vmem:[%s5420_s0] sm:$0xff]   ;;  %s3858_s0 = smov 64  }
 0x222   : > { %3240 = vmatpush3.bf16.msra.mxu0 %v3415_v18 }
 0x223   : > { %1706 = vperm.xlu1 %3406, %v1528_v43   ;;  %v1538_v16 = vmul.f32 %v1513_v13, %v4546_v50  ;;  %v1539_v20 = vmul.f32 %v1513_v13, %v4442_v44  ;;  %v3416_v44 = vld [vmem:[%s5421_s13 + $0x8] sm:$0xff]   ;;  %3241 = vmatprep.subr.bf16.mxu0 %v3848_v0 }
 0x225   : > { %1711 = vperm.xlu0 %3405, %v1529_v23  }
 0x226   : > { %3242 = vmatpush3.bf16.msra.mxu0 %v3416_v44 }
 0x227   : > { %1716 = vperm.xlu1 %3406, %v1530_v48  }
 0x229   : > { %1721 = vperm.xlu0 %3405, %v1531_v56  }
 0x22b   : > { %1726 = vperm.xlu1 %3406, %v1532_v59  }
 0x22d   : > { %1731 = vperm.xlu0 %3405, %v1533_v8  }
 0x22f   : > { %1736 = vperm.xlu1 %3406, %v1534_v9  }
 0x231   : > { %1741 = vperm.xlu0 %3405, %v1535_v12  }
 0x233   : > { %1746 = vperm.xlu1 %3406, %v1536_v2  }
 0x235   : > { %1751 = vperm.xlu0 %3405, %v1537_v63  }
 0x237   : > { %1756 = vperm.xlu1 %3406, %v1538_v16  }
 0x239   : > { %1761 = vperm.xlu0 %3405, %v1539_v20  }
 0x23b   : > { %1766 = vperm.xlu1 %3406, %v1540_v22  }
 0x23d   : > { %1771 = vperm.xlu0 %3405, %v1541_v14  }
 0x23f   : > { %2580 = vperm.xlu1 %3406, %v4529_v36  }
 0x269   : > { %v1327_v17 = vpop.permute.xlu1 %1326 }
 0x26a   : > { %v4717_v27 = vadd.f32 %v1327_v17, %v4591_v53 }
 0x26b   : > { %v1329_v50 = vpop.permute.xlu0 %1328 }
 0x26c   : > { %v1398_v36 = vmul.f32 %v4711_v26, %v4717_v27  ;;  %v4725_v34 = vadd.f32 %v1329_v50, %v4600_v62 }
 0x26d   : > { %v1331_v39 = vpop.permute.xlu1 %1330 }
 0x26e   : > { %v1399_v53 = vmul.f32 %v4711_v26, %v4725_v34  ;;  %v4735_v31 = vadd.f32 %v1331_v39, %v4606_v6  ;;  %v1420_v32 = vadd.f32 %v4730_v35, %v1398_v36 }
 0x26f   : > { %v1333_v40 = vpop.permute.xlu0 %1332 }
 0x270   : > { %v1421_v41 = vadd.f32 %v4730_v35, %v1399_v53  ;;  %v1400_v62 = vmul.f32 %v4711_v26, %v4735_v31  ;;  %v4742_v0 = vadd.f32 %v1333_v40, %v4608_v7 }
 0x271   : > { %v1335_v42 = vpop.permute.xlu1 %1334 }
 0x272   : > { %v1546_v43 = vpack.c.bf16 %v1421_v41, %v1420_v32  ;;  %v1401_v45 = vmul.f32 %v4711_v26, %v4742_v0  ;;  %v4747_v6 = vadd.f32 %v1335_v42, %v4624_v30  ;;  %v1422_v47 = vadd.f32 %v4730_v35, %v1400_v62 }
 0x273   : > { %v1337_v46 = vpop.permute.xlu0 %1336 }
 0x274   : > { %v1423_v23 = vadd.f32 %v4730_v35, %v1401_v45  ;;  %v1402_v48 = vmul.f32 %v4711_v26, %v4747_v6  ;;  %v4754_v54 = vadd.f32 %v1337_v46, %v4632_v38  ;;  %3223 = vmatprep.mubr.msk.bf16.mxu1 %vm880_vm1, %v1546_v43 }
 0x275   : > { %v1339_v7 = vpop.permute.xlu1 %1338 }
 0x276   : > { %v1547_v19 = vpack.c.bf16 %v1423_v23, %v1422_v47  ;;  %v1403_v55 = vmul.f32 %v4711_v26, %v4754_v54  ;;  %v1380_v30 = vadd.f32 %v1339_v7, %v4621_v28  ;;  %v1424_v59 = vadd.f32 %v4730_v35, %v1402_v48 }
 0x277   : > { %v1341_v56 = vpop.permute.xlu0 %1340 }
 0x278   : > { %v1425_v1 = vadd.f32 %v4730_v35, %v1403_v55  ;;  %v1404_v5 = vmul.f32 %v4711_v26, %v1380_v30  ;;  %v4764_v8 = vadd.f32 %v1341_v56, %v4628_v33  ;;  %3224 = vmatmul.mubr.msk.bf16.vlgmr.msra.gmra.mrb[4].mxu1 %vm880_vm1, %v1547_v19 }
 0x279   : > { %v1343_v38 = vpop.permute.xlu1 %1342 }
 0x27a   : > { %v1548_v9 = vpack.c.bf16 %v1425_v1, %v1424_v59  ;;  %v1405_v10 = vmul.f32 %v4711_v26, %v4764_v8  ;;  %v1382_v11 = vadd.f32 %v1343_v38, %v4645_v60  ;;  %v1426_v12 = vadd.f32 %v4730_v35, %v1404_v5 }
 0x27b   : > { %v1345_v28 = vpop.permute.xlu0 %1344 }
 0x27c   : > { %v1427_v2 = vadd.f32 %v4730_v35, %v1405_v10  ;;  %v1406_v13 = vmul.f32 %v4711_v26, %v1382_v11  ;;  %v1383_v15 = vadd.f32 %v1345_v28, %v4650_v4  ;;  %3227 = vmatprep.mubr.msk.bf16.mxu1 %vm880_vm1, %v1548_v9 }
 0x27d   : > { %v1347_v33 = vpop.permute.xlu1 %1346 }
 0x27e   : > { %v1549_v63 = vpack.c.bf16 %v1427_v2, %v1426_v12  ;;  %v1407_v16 = vmul.f32 %v4711_v26, %v1383_v15  ;;  %v1384_v3 = vadd.f32 %v1347_v33, %v4642_v58  ;;  %v1428_v60 = vadd.f32 %v4730_v35, %v1406_v13 }
 0x27f   : > { %v1349_v20 = vpop.permute.xlu0 %1348 }
 0x280   : > { %v1429_v22 = vadd.f32 %v4730_v35, %v1407_v16  ;;  %v1408_v14 = vmul.f32 %v4711_v26, %v1384_v3  ;;  %v1385_v17 = vadd.f32 %v1349_v20, %v4647_v61  ;;  %3228 = vmatmul.mubr.msk.bf16.gmra.mrb[8].mxu1 %vm880_vm1, %v1549_v63 }
 0x281   : > { %v1351_v4 = vpop.permute.xlu1 %1350 }
 0x282   : > { %v1550_v18 = vpack.c.bf16 %v1429_v22, %v1428_v60  ;;  %v1409_v50 = vmul.f32 %v4711_v26, %v1385_v17  ;;  %v1386_v44 = vadd.f32 %v1351_v4, %v4665_v24  ;;  %v1430_v58 = vadd.f32 %v4730_v35, %v1408_v14 }
 0x283   : > { %v1353_v36 = vpop.permute.xlu0 %1352 }
 0x284   : > { %v1431_v39 = vadd.f32 %v4730_v35, %v1409_v50  ;;  %v1410_v53 = vmul.f32 %v4711_v26, %v1386_v44  ;;  %v1387_v40 = vadd.f32 %v1353_v36, %v4671_v29  ;;  %3231 = vmatprep.mubr.msk.bf16.mxu1 %vm880_vm1, %v1550_v18 }
 0x285   : > { %v1355_v61 = vpop.permute.xlu1 %1354 }
 0x286   : > { %v1551_v32 = vpack.c.bf16 %v1431_v39, %v1430_v58  ;;  %v1411_v41 = vmul.f32 %v4711_v26, %v1387_v40  ;;  %v1388_v62 = vadd.f32 %v1355_v61, %v4661_v21  ;;  %v1432_v24 = vadd.f32 %v4730_v35, %v1410_v53 }
 0x287   : > { %v1357_v42 = vpop.permute.xlu0 %1356 }
 0x288   : > { %v1433_v43 = vadd.f32 %v4730_v35, %v1411_v41  ;;  %v1412_v45 = vmul.f32 %v4711_v26, %v1388_v62  ;;  %v1389_v46 = vadd.f32 %v1357_v42, %v4667_v25  ;;  %3232 = vmatmul.mubr.msk.bf16.gmra.mrb[12].mxu1 %vm880_vm1, %v1551_v32 }
 0x28a   : > { %v1552_v29 = vpack.c.bf16 %v1433_v43, %v1432_v24  ;;  %v1413_v47 = vmul.f32 %v4711_v26, %v1389_v46  ;;  %v1434_v23 = vadd.f32 %v4730_v35, %v1412_v45 }
 0x28c   : > { %v1435_v48 = vadd.f32 %v4730_v35, %v1413_v47  ;;  %3235 = vmatprep.mubr.msk.bf16.mxu1 %vm880_vm1, %v1552_v29 }
 0x28e   : > { %v1553_v21 = vpack.c.bf16 %v1435_v48, %v1434_v23 }
 0x290   : > { %3236 = vmatmul.mubr.msk.bf16.gmra.mrb[16].mxu1 %vm880_vm1, %v1553_v21 }
 0x296   : > { %v2146_v7 = vpop.permute.xlu1 %2145 }
 0x297   : > { %v4802_v19 = vadd.f32 %v2146_v7, %v4717_v27  ;;  %v4805_v25 = vadd.f32 %v2146_v7, %v4735_v31  ;;  %v4808_v55 = vadd.f32 %v2146_v7, %v4747_v6  ;;  %v4810_v26 = vadd.f32 %v2146_v7, %v1380_v30 }
 0x298   : > { %v4812_v56 = vadd.f32 %v2146_v7, %v1382_v11  ;;  %v4814_v35 = vadd.f32 %v2146_v7, %v1384_v3  ;;  %v4816_v59 = vadd.f32 %v2146_v7, %v1386_v44  ;;  %v4818_v1 = vadd.f32 %v2146_v7, %v1388_v62  ;;  %v2151_v5 = vpop.permute.xlu0 %2150 }
 0x299   : > { %v2169_v27 = vsel %vm880_vm1, %v4802_v19, -inf  ;;  %v2178_v31 = vsel %vm880_vm1, %v4805_v25, -inf  ;;  %v2187_v6 = vsel %vm880_vm1, %v4808_v55, -inf  ;;  %v2196_v30 = vsel %vm880_vm1, %v4810_v26, -inf }
 0x29a   : > { %v2205_v38 = vsel %vm880_vm1, %v4812_v56, -inf  ;;  %v2214_v9 = vsel %vm880_vm1, %v4814_v35, -inf  ;;  %v2223_v10 = vsel %vm880_vm1, %v4816_v59, -inf  ;;  %v2232_v11 = vsel %vm880_vm1, %v4818_v1, -inf }
 0x29b   : > { %v4837_v28 = vadd.f32 %v2151_v5, %v4725_v34  ;;  %v4840_v12 = vadd.f32 %v2151_v5, %v4742_v0  ;;  %v4843_v2 = vadd.f32 %v2151_v5, %v4754_v54  ;;  %v4846_v13 = vadd.f32 %v2151_v5, %v4764_v8 }
 0x29c   : > { %v4848_v33 = vadd.f32 %v2151_v5, %v1383_v15  ;;  %v4850_v63 = vadd.f32 %v2151_v5, %v1385_v17  ;;  %v4852_v16 = vadd.f32 %v2151_v5, %v1387_v40  ;;  %v4854_v3 = vadd.f32 %v2151_v5, %v1389_v46 }
 0x29d   : > { %v2170_v34 = vsel %vm880_vm1, %v4837_v28, -inf  ;;  %v2179_v0 = vsel %vm880_vm1, %v4840_v12, -inf  ;;  %v2188_v54 = vsel %vm880_vm1, %v4843_v2, -inf  ;;  %v2197_v8 = vsel %vm880_vm1, %v4846_v13, -inf }
 0x29e   : > { %v2171_v15 = vmax.f32 %v2169_v27, %v2170_v34  ;;  %v2180_v20 = vmax.f32 %v2178_v31, %v2179_v0  ;;  %v2189_v60 = vmax.f32 %v2187_v6, %v2188_v54  ;;  %v2198_v22 = vmax.f32 %v2196_v30, %v2197_v8 }
 0x29f   : > { %v2206_v14 = vsel %vm880_vm1, %v4848_v33, -inf  ;;  %v2215_v17 = vsel %vm880_vm1, %v4850_v63, -inf  ;;  %v2224_v4 = vsel %vm880_vm1, %v4852_v16, -inf  ;;  %v2233_v18 = vsel %vm880_vm1, %v4854_v3, -inf }
 0x2a0   : > { %v2172_v50 = vrot.slane %v2171_v15, 4  ;;  %v2181_v44 = vrot.slane %v2180_v20, 4  ;;  %v2190_v36 = vrot.slane %v2189_v60, 4  ;;  %v2199_v58 = vrot.slane %v2198_v22, 4 }
 0x2a1   : > { %v2207_v39 = vmax.f32 %v2205_v38, %v2206_v14  ;;  %v2216_v53 = vmax.f32 %v2214_v9, %v2215_v17  ;;  %v2225_v40 = vmax.f32 %v2223_v10, %v2224_v4  ;;  %v2234_v61 = vmax.f32 %v2232_v11, %v2233_v18 }
 0x2a2   : > { %v2173_v32 = vmax.f32 %v2171_v15, %v2172_v50  ;;  %v2182_v41 = vmax.f32 %v2180_v20, %v2181_v44  ;;  %v2191_v62 = vmax.f32 %v2189_v60, %v2190_v36  ;;  %v2200_v42 = vmax.f32 %v2198_v22, %v2199_v58 }
 0x2a3   : > { %v2208_v24 = vrot.slane %v2207_v39, 4  ;;  %v2217_v43 = vrot.slane %v2216_v53, 4  ;;  %v2226_v45 = vrot.slane %v2225_v40, 4  ;;  %v2235_v46 = vrot.slane %v2234_v61, 4 }
 0x2a4   : > { %v2174_v29 = vrot.slane %v2173_v32, 2  ;;  %v2183_v47 = vrot.slane %v2182_v41, 2  ;;  %v2192_v23 = vrot.slane %v2191_v62, 2  ;;  %v2201_v48 = vrot.slane %v2200_v42, 2 }
 0x2a5   : > { %v2209_v21 = vmax.f32 %v2207_v39, %v2208_v24  ;;  %v2218_v7 = vmax.f32 %v2216_v53, %v2217_v43  ;;  %v2227_v5 = vmax.f32 %v2225_v40, %v2226_v45  ;;  %v2236_v27 = vmax.f32 %v2234_v61, %v2235_v46 }
 0x2a6   : > { %v2175_v31 = vmax.f32 %v2173_v32, %v2174_v29  ;;  %v2184_v6 = vmax.f32 %v2182_v41, %v2183_v47  ;;  %v2193_v30 = vmax.f32 %v2191_v62, %v2192_v23  ;;  %v2202_v38 = vmax.f32 %v2200_v42, %v2201_v48 }
 0x2a7   : > { %v2210_v9 = vrot.slane %v2209_v21, 2  ;;  %v2219_v10 = vrot.slane %v2218_v7, 2  ;;  %v2228_v11 = vrot.slane %v2227_v5, 2  ;;  %v2237_v34 = vrot.slane %v2236_v27, 2 }
 0x2a8   : > { %v2176_v0 = vrot.slane %v2175_v31, 1  ;;  %v2185_v54 = vrot.slane %v2184_v6, 1  ;;  %v2194_v8 = vrot.slane %v2193_v30, 1  ;;  %v2203_v15 = vrot.slane %v2202_v38, 1 }
 0x2a9   : > { %v2211_v20 = vmax.f32 %v2209_v21, %v2210_v9  ;;  %v2220_v60 = vmax.f32 %v2218_v7, %v2219_v10  ;;  %v2229_v22 = vmax.f32 %v2227_v5, %v2228_v11  ;;  %v2238_v14 = vmax.f32 %v2236_v27, %v2237_v34 }
 0x2aa   : > { %v2177_v17 = vmax.f32 %v2175_v31, %v2176_v0  ;;  %v2186_v4 = vmax.f32 %v2184_v6, %v2185_v54  ;;  %v2195_v18 = vmax.f32 %v2193_v30, %v2194_v8  ;;  %v2204_v50 = vmax.f32 %v2202_v38, %v2203_v15  ;;  %v4891_v54 = vpop.permute.xlu1 %2363 }
 0x2ab   : > { %v2212_v44 = vrot.slane %v2211_v20, 1  ;;  %v2221_v36 = vrot.slane %v2220_v60, 1  ;;  %v2230_v58 = vrot.slane %v2229_v22, 1  ;;  %v2239_v39 = vrot.slane %v2238_v14, 1 }
 0x2ac   : > { %v2241_v53 = vsub.f32 %v4802_v19, %v2177_v17  ;;  %v2242_v40 = vsub.f32 %v4837_v28, %v2177_v17  ;;  %v2243_v61 = vsub.f32 %v4805_v25, %v2186_v4  ;;  %v2244_v32 = vsub.f32 %v4840_v12, %v2186_v4 }
 0x2ad   : > { %v2213_v41 = vmax.f32 %v2211_v20, %v2212_v44  ;;  %v2222_v62 = vmax.f32 %v2220_v60, %v2221_v36  ;;  %v2231_v42 = vmax.f32 %v2229_v22, %v2230_v58  ;;  %v2240_v24 = vmax.f32 %v2238_v14, %v2239_v39 }
 0x2ae   : > { %v2245_v43 = vsub.f32 %v4808_v55, %v2195_v18  ;;  %v2246_v45 = vsub.f32 %v4843_v2, %v2195_v18  ;;  %v2247_v46 = vsub.f32 %v4810_v26, %v2204_v50  ;;  %v2248_v29 = vsub.f32 %v4846_v13, %v2204_v50 }
 0x2af   : > { %v2249_v19 = vsub.f32 %v4812_v56, %v2213_v41  ;;  %v2250_v28 = vsub.f32 %v4848_v33, %v2213_v41  ;;  %v2251_v25 = vsub.f32 %v4814_v35, %v2222_v62  ;;  %v2252_v12 = vsub.f32 %v4850_v63, %v2222_v62 }
 0x2b0   : > { %v2253_v47 = vsub.f32 %v4816_v59, %v2231_v42  ;;  %v2254_v23 = vsub.f32 %v4852_v16, %v2231_v42  ;;  %v2255_v55 = vsub.f32 %v4818_v1, %v2240_v24  ;;  %v2256_v2 = vsub.f32 %v4854_v3, %v2240_v24 }
 0x2b1   : > { %v2257_v48 = vmul.f32 1.442695, %v2241_v53  ;;  %v2259_v26 = vmul.f32 1.442695, %v2242_v40  ;;  %v2261_v21 = vmul.f32 1.442695, %v2243_v61  ;;  %v4901_v40 = vpop.permute.xlu0 %2365 }
 0x2b2   : > { %v2263_v13 = vmul.f32 1.442695, %v2244_v32  ;;  %v2265_v56 = vmul.f32 1.442695, %v2245_v43  ;;  %v2267_v33 = vmul.f32 1.442695, %v2246_v45 }
 0x2b3   : > { %3417 = vpow2.f32 %v2257_v48  ;;  %v2269_v35 = vmul.f32 1.442695, %v2247_v46  ;;  %v2271_v63 = vmul.f32 1.442695, %v2248_v29  ;;  %v2273_v59 = vmul.f32 1.442695, %v2249_v19 }
 0x2b4   : > { %3419 = vpow2.f32 %v2259_v26  ;;  %v2275_v16 = vmul.f32 1.442695, %v2250_v28  ;;  %v2277_v1 = vmul.f32 1.442695, %v2251_v25  ;;  %v2279_v3 = vmul.f32 1.442695, %v2252_v12 }
 0x2b5   : > { %3421 = vpow2.f32 %v2261_v21  ;;  %v2281_v7 = vmul.f32 1.442695, %v2253_v47  ;;  %v2283_v5 = vmul.f32 1.442695, %v2254_v23  ;;  %v2285_v31 = vmul.f32 1.442695, %v2255_v55 }
 0x2b6   : > { %3423 = vpow2.f32 %v2263_v13  ;;  %v2287_v30 = vmul.f32 1.442695, %v2256_v2 }
 0x2b7   : > { %3425 = vpow2.f32 %v2265_v56 }
 0x2b8   : > { %3427 = vpow2.f32 %v2267_v33 }
 0x2b9   : > { %3429 = vpow2.f32 %v2269_v35 }
 0x2ba   : > { %3431 = vpow2.f32 %v2271_v63 }
 0x2bb   : > { %3433 = vpow2.f32 %v2273_v59 }
 0x2bc   : > { %3435 = vpow2.f32 %v2275_v16 }
 0x2bd   : > { %v3418_v27 = vpop.eup %3417  ;;  %3437 = vpow2.f32 %v2277_v1 }
 0x2be   : > { %v3420_v6 = vpop.eup %3419  ;;  %3439 = vpow2.f32 %v2279_v3  ;;  %v2289_v38 = vsel %vm880_vm1, %v3418_v27, 0.0  ;;  %v2369_v20 = vmul.f32 %v3418_v27, %v4891_v54 }
 0x2bf   : > { %v3422_v9 = vpop.eup %3421  ;;  %3441 = vpow2.f32 %v2281_v7  ;;  %v2290_v10 = vsel %vm880_vm1, %v3420_v6, 0.0  ;;  %v4909_v62 = vmul.f32 %v3420_v6, %v4901_v40 }
 0x2c0   : > { %v3424_v11 = vpop.eup %3423  ;;  %3443 = vpow2.f32 %v2283_v5  ;;  %v2291_v34 = vadd.f32 %v2290_v10, %v2289_v38  ;;  %v2298_v0 = vsel %vm880_vm1, %v3422_v9, 0.0  ;;  %v2371_v50 = vmul.f32 %v3422_v9, %v4891_v54 }
 0x2c1   : > { %v3426_v8 = vpop.eup %3425  ;;  %3445 = vpow2.f32 %v2285_v31  ;;  %v2299_v15 = vsel %vm880_vm1, %v3424_v11, 0.0  ;;  %v4906_v41 = vsel %vm880_vm1, %v2369_v20, 0.0  ;;  %v4912_v42 = vmul.f32 %v3424_v11, %v4901_v40 }
 0x2c2   : > { %v3428_v60 = vpop.eup %3427  ;;  %3447 = vpow2.f32 %v2287_v30  ;;  %v2292_v22 = vrot.slane %v2291_v34, 4  ;;  %v2300_v14 = vadd.f32 %v2299_v15, %v2298_v0  ;;  %v2307_v17 = vsel %vm880_vm1, %v3426_v8, 0.0 }
 0x2c3   : > { %v3430_v4 = vpop.eup %3429  ;;  %v2308_v18 = vsel %vm880_vm1, %v3428_v60, 0.0  ;;  %v2373_v12 = vmul.f32 %v3426_v8, %v4891_v54  ;;  %v4921_v47 = vsel %vm880_vm1, %v2371_v50, 0.0  ;;  %v4929_v35 = vmul.f32 %v3428_v60, %v4901_v40 }
 0x2c4   : > { %v4898_v44 = vpop.eup %3431  ;;  %v2293_v36 = vadd.f32 %v2292_v22, %v2291_v34  ;;  %v2301_v58 = vrot.slane %v2300_v14, 4  ;;  %v2309_v39 = vadd.f32 %v2308_v18, %v2307_v17  ;;  %v2316_v53 = vsel %vm880_vm1, %v3430_v4, 0.0 }
 0x2c5   : > { %v3434_v61 = vpop.eup %3433  ;;  %v2317_v32 = vsel %vm880_vm1, %v4898_v44, 0.0  ;;  %v2375_v11 = vmul.f32 %v3430_v4, %v4891_v54 }
 0x2c6   : > { %v4914_v24 = vpop.eup %3435  ;;  %v2294_v43 = vrot.slane %v2293_v36, 2  ;;  %v2302_v45 = vadd.f32 %v2301_v58, %v2300_v14  ;;  %v2310_v46 = vrot.slane %v2309_v39, 4  ;;  %v2318_v29 = vadd.f32 %v2317_v32, %v2316_v53 }
 0x2c7   : > { %v3438_v19 = vpop.eup %3437  ;;  %v2325_v28 = vsel %vm880_vm1, %v3434_v61, 0.0  ;;  %v2326_v25 = vsel %vm880_vm1, %v4914_v24, 0.0  ;;  %v2377_v32 = vmul.f32 %v3434_v61, %v4891_v54  ;;  %v2412_v61 = vsel %vm880_vm1, %v2375_v11, 0.0 }
 0x2c8   : > { %v4923_v23 = vpop.eup %3439  ;;  %v2295_v55 = vadd.f32 %v2294_v43, %v2293_v36  ;;  %v2303_v2 = vrot.slane %v2302_v45, 2  ;;  %v2311_v48 = vadd.f32 %v2310_v46, %v2309_v39  ;;  %v2319_v26 = vrot.slane %v2318_v29, 4 }
 0x2c9   : > { %v3442_v21 = vpop.eup %3441  ;;  %v2327_v13 = vadd.f32 %v2326_v25, %v2325_v28  ;;  %v2334_v56 = vsel %vm880_vm1, %v3438_v19, 0.0  ;;  %v2335_v33 = vsel %vm880_vm1, %v4923_v23, 0.0  ;;  %v2379_v28 = vmul.f32 %v3438_v19, %v4891_v54 }
 0x2ca   : > { %v3444_v63 = vpop.eup %3443  ;;  %v2296_v59 = vrot.slane %v2295_v55, 1  ;;  %v2304_v16 = vadd.f32 %v2303_v2, %v2302_v45  ;;  %v2312_v1 = vrot.slane %v2311_v48, 2  ;;  %v2320_v3 = vadd.f32 %v2319_v26, %v2318_v29 }
 0x2cb   : > { %v3446_v7 = vpop.eup %3445  ;;  %v2328_v5 = vrot.slane %v2327_v13, 4  ;;  %v2336_v27 = vadd.f32 %v2335_v33, %v2334_v56  ;;  %v2343_v31 = vsel %vm880_vm1, %v3442_v21, 0.0  ;;  %v2344_v6 = vsel %vm880_vm1, %v3444_v63, 0.0 }
 0x2cc   : > { %v3448_v30 = vpop.eup %3447  ;;  %v2305_v38 = vrot.slane %v2304_v16, 1  ;;  %v2313_v9 = vadd.f32 %v2312_v1, %v2311_v48  ;;  %v2321_v10 = vrot.slane %v2320_v3, 2  ;;  %v2345_v8 = vadd.f32 %v2344_v6, %v2343_v31 }
 0x2cd   : > { %v2329_v34 = vadd.f32 %v2328_v5, %v2327_v13  ;;  %v2337_v0 = vrot.slane %v2336_v27, 4  ;;  %v2352_v15 = vsel %vm880_vm1, %v3446_v7, 0.0  ;;  %v2297_v20 = vadd.f32 %v2296_v59, %v2295_v55 }
 0x2ce   : > { %v2314_v60 = vrot.slane %v2313_v9, 1  ;;  %v2322_v22 = vadd.f32 %v2321_v10, %v2320_v3  ;;  %v2353_v14 = vsel %vm880_vm1, %v3448_v30, 0.0  ;;  %v2346_v50 = vrot.slane %v2345_v8, 4 }
 0x2cf   : > { %v2330_v17 = vrot.slane %v2329_v34, 2  ;;  %v2338_v18 = vadd.f32 %v2337_v0, %v2336_v27  ;;  %v2354_v36 = vadd.f32 %v2353_v14, %v2352_v15  ;;  %v2306_v58 = vadd.f32 %v2305_v38, %v2304_v16 }
 0x2d0   : > { %v2315_v39 = vadd.f32 %v2314_v60, %v2313_v9  ;;  %v2323_v53 = vrot.slane %v2322_v22, 1  ;;  %v2347_v45 = vadd.f32 %v2346_v50, %v2345_v8  ;;  %v2403_v25 = vsel %vm880_vm1, %v2373_v12, 0.0 }
 0x2d1   : > { %v2331_v4 = vadd.f32 %v2330_v17, %v2329_v34  ;;  %v2339_v43 = vrot.slane %v2338_v18, 2  ;;  %v2355_v46 = vrot.slane %v2354_v36, 4  ;;  %v2376_v55 = vmul.f32 %v4898_v44, %v4901_v40 }
 0x2d2   : > { %v2324_v29 = vadd.f32 %v2323_v53, %v2322_v22  ;;  %3449 = vrcp.f32 %v2297_v20  ;;  %v2381_v48 = vmul.f32 %v3442_v21, %v4891_v54  ;;  %v2383_v26 = vmul.f32 %v3446_v7, %v4891_v54 }
 0x2d3   : > { %v2332_v2 = vrot.slane %v2331_v4, 1  ;;  %v2340_v13 = vadd.f32 %v2339_v43, %v2338_v18  ;;  %3451 = vrcp.f32 %v2306_v58  ;;  %v2421_v56 = vsel %vm880_vm1, %v2377_v32, 0.0 }
 0x2d4   : > { %v2348_v59 = vrot.slane %v2347_v45, 2  ;;  %v4945_v19 = vadd.f32 %v2355_v46, %v2354_v36  ;;  %3453 = vrcp.f32 %v2315_v39  ;;  %v2378_v44 = vmul.f32 %v4914_v24, %v4901_v40 }
 0x2d5   : > { %v2333_v33 = vadd.f32 %v2332_v2, %v2331_v4  ;;  %3455 = vrcp.f32 %v2324_v29  ;;  %v2380_v12 = vmul.f32 %v4923_v23, %v4901_v40  ;;  %v2382_v54 = vmul.f32 %v3444_v63, %v4901_v40 }
 0x2d6   : > { %v2430_v21 = vsel %vm880_vm1, %v2379_v28, 0.0  ;;  %v2439_v16 = vsel %vm880_vm1, %v2381_v48, 0.0  ;;  %v2448_v1 = vsel %vm880_vm1, %v2383_v26, 0.0  ;;  %v2384_v3 = vmul.f32 %v3448_v30, %v4901_v40 }
 0x2d7   : > { %3457 = vrcp.f32 %v2333_v33  ;;  %v2386_v7 = vsel %vm880_vm1, %v4909_v62, 0.0  ;;  %v2395_v24 = vsel %vm880_vm1, %v4912_v42, 0.0  ;;  %v2404_v23 = vsel %vm880_vm1, %v4929_v35, 0.0 }
 0x2d8   : > { %v2387_v63 = vadd.f32 %v2386_v7, %v4906_v41  ;;  %v2396_v5 = vadd.f32 %v2395_v24, %v4921_v47  ;;  %v2405_v27 = vadd.f32 %v2404_v23, %v2403_v25  ;;  %v2413_v31 = vsel %vm880_vm1, %v2376_v55, 0.0 }
 0x2d9   : > { %v2414_v6 = vadd.f32 %v2413_v31, %v2412_v61  ;;  %v2422_v38 = vsel %vm880_vm1, %v2378_v44, 0.0  ;;  %v2431_v40 = vsel %vm880_vm1, %v2380_v12, 0.0  ;;  %v2440_v62 = vsel %vm880_vm1, %v2382_v54, 0.0 }
 0x2da   : > { %v2388_v30 = vrot.slane %v2387_v63, 4  ;;  %v2397_v9 = vrot.slane %v2396_v5, 4  ;;  %v2406_v42 = vrot.slane %v2405_v27, 4  ;;  %v2423_v10 = vadd.f32 %v2422_v38, %v2421_v56 }
 0x2db   : > { %v2415_v11 = vrot.slane %v2414_v6, 4  ;;  %v2432_v35 = vadd.f32 %v2431_v40, %v2430_v21  ;;  %v2441_v34 = vadd.f32 %v2440_v62, %v2439_v16  ;;  %v2449_v41 = vsel %vm880_vm1, %v2384_v3, 0.0 }
 0x2dc   : > { %v3450_v47 = vpop.eup %3449  ;;  %v2389_v0 = vadd.f32 %v2388_v30, %v2387_v63  ;;  %v2398_v8 = vadd.f32 %v2397_v9, %v2396_v5  ;;  %v2407_v15 = vadd.f32 %v2406_v42, %v2405_v27  ;;  %v2424_v20 = vrot.slane %v2423_v10, 4 }
 0x2dd   : > { %v3452_v60 = vpop.eup %3451  ;;  %v2341_v22 = vrot.slane %v2340_v13, 1  ;;  %v2416_v14 = vadd.f32 %v2415_v11, %v2414_v6  ;;  %v2433_v17 = vrot.slane %v2432_v35, 4  ;;  %v2450_v18 = vadd.f32 %v2449_v41, %v2448_v1 }
 0x2de   : > { %v3454_v50 = vpop.eup %3453  ;;  %v2390_v36 = vrot.slane %v2389_v0, 2  ;;  %v2399_v58 = vrot.slane %v2398_v8, 2  ;;  %v2408_v39 = vrot.slane %v2407_v15, 2  ;;  %v2425_v53 = vadd.f32 %v2424_v20, %v2423_v10 }
 0x2df   : > { %v3456_v32 = vpop.eup %3455  ;;  %v2349_v4 = vadd.f32 %v2348_v59, %v2347_v45  ;;  %v2357_v43 = vrot.slane %v4945_v19, 2  ;;  %v2417_v46 = vrot.slane %v2416_v14, 2  ;;  %v2442_v29 = vrot.slane %v2441_v34, 4 }
 0x2e0   : > { %v2391_v25 = vadd.f32 %v2390_v36, %v2389_v0  ;;  %v2400_v55 = vadd.f32 %v2399_v58, %v2398_v8  ;;  %v2409_v2 = vadd.f32 %v2408_v39, %v2407_v15  ;;  %v2426_v48 = vrot.slane %v2425_v53, 2 }
 0x2e1   : > { %v3458_v28 = vpop.eup %3457  ;;  %v2342_v26 = vadd.f32 %v2341_v22, %v2340_v13  ;;  %v2418_v61 = vadd.f32 %v2417_v46, %v2416_v14  ;;  %v2434_v56 = vadd.f32 %v2433_v17, %v2432_v35  ;;  %v2451_v33 = vrot.slane %v2450_v18, 4  ;;  %v3137_v46 = vld [vmem:[%s5424_s4] ss:$0 sm:$0xff]  ;;  %s5115_s4 = sadd.s32 %s5409_s29, %s3145_s2 }
 0x2e2   : > { %v2392_v44 = vrot.slane %v2391_v25, 1  ;;  %v2401_v12 = vrot.slane %v2400_v55, 1  ;;  %v2410_v54 = vrot.slane %v2409_v2, 1  ;;  %v2427_v21 = vadd.f32 %v2426_v48, %v2425_v53  ;;  %v1702_v48 = vpop.permute.xlu0 %1701 }
 0x2e3   : > { %v2350_v16 = vrot.slane %v2349_v4, 1  ;;  %v2358_v45 = vadd.f32 %v2357_v43, %v4945_v19  ;;  %v2419_v59 = vrot.slane %v2418_v61, 1  ;;  %v2443_v1 = vadd.f32 %v2442_v29, %v2441_v34 }
 0x2e4   : > { %v2393_v3 = vadd.f32 %v2392_v44, %v2391_v25  ;;  %v2402_v7 = vadd.f32 %v2401_v12, %v2400_v55  ;;  %v2411_v24 = vadd.f32 %v2410_v54, %v2409_v2  ;;  %v2428_v23 = vrot.slane %v2427_v21, 1  ;;  %v1697_v2 = vpop.permute.xlu1 %1696 }
 0x2e5   : > { %v2420_v63 = vadd.f32 %v2419_v59, %v2418_v61  ;;  %v2435_v5 = vrot.slane %v2434_v56, 2  ;;  %v2452_v27 = vadd.f32 %v2451_v33, %v2450_v18  ;;  %v2444_v40 = vrot.slane %v2443_v1, 2 }
 0x2e6   : > { %v2429_v13 = vadd.f32 %v2428_v23, %v2427_v21  ;;  %v2465_v31 = vmul.f32 %v3450_v47, %v2393_v3  ;;  %v2466_v6 = vmul.f32 %v3452_v60, %v2402_v7  ;;  %v2467_v38 = vmul.f32 %v3454_v50, %v2411_v24  ;;  %v1712_v61 = vpop.permute.xlu0 %1711  ;;  %v4979_v3 = vld [vmem:[%s5425_s15] ss:$0 sm:$0xff]  ;;  %s5426_s15 = sld [smem:[#allocation51_spill]] }
 0x2e7   : > { %v2468_v62 = vmul.f32 %v3456_v32, %v2420_v63  ;;  %v2351_v19 = vadd.f32 %v2350_v16, %v2349_v4  ;;  %v2359_v9 = vrot.slane %v2358_v45, 1  ;;  %3459 = vrcp.f32 %v2342_v26  ;;  %v3136_v4 = vld [vmem:[%s5423_s18] ss:$0 sm:$0xff]  ;;  %s3095_s18 = sshll.u32 %s4314_s23, 3 }
 0x2e8   : > { %v2469_v30 = vmul.f32 %v3458_v28, %v2429_v13  ;;  %v2436_v42 = vadd.f32 %v2435_v5, %v2434_v56  ;;  %v2453_v10 = vrot.slane %v2452_v27, 2  ;;  %v2490_v11 = vsel %vm2489_vm3, %v2466_v6, %v2465_v31  ;;  %v1707_v26 = vpop.permute.xlu1 %1706 }
 0x2e9   : > { %v2360_v35 = vadd.f32 %v2359_v9, %v2358_v45  ;;  %3461 = vrcp.f32 %v2351_v19  ;;  %v2492_v34 = vsel %vm2491_vm4, %v2467_v38, %v2490_v11  ;;  %v2445_v41 = vadd.f32 %v2444_v40, %v2443_v1 }
 0x2ea   : > { %v2494_v0 = vsel %vm2493_vm5, %v2468_v62, %v2492_v34  ;;  %v2437_v8 = vrot.slane %v2436_v42, 1  ;;  %v2454_v15 = vadd.f32 %v2453_v10, %v2452_v27  ;;  %v1722_v33 = vpop.permute.xlu0 %1721  ;;  %v3853_v16 = vmov 1983009808  }
 0x2eb   : > { %3463 = vrcp.f32 %v2360_v35  ;;  %v2496_v47 = vsel %vm2495_vm6, %v2469_v30, %v2494_v0  ;;  %v2446_v20 = vrot.slane %v2445_v41, 1  ;;  %v1793_v45 = vunpack.c.l.s4 %v3853_v16 }
 0x2ec   : > { %v2438_v60 = vadd.f32 %v2437_v8, %v2436_v42  ;;  %v2455_v22 = vrot.slane %v2454_v15, 1  ;;  %v1717_v56 = vpop.permute.xlu1 %1716  ;;  %v3854_v11 = vmov 1934713408  }
 0x2ed   : > { %v2447_v17 = vadd.f32 %v2446_v20, %v2445_v41  ;;  %v1794_v7 = vunpack.c.0.s8 %v1793_v45  ;;  %v1857_v35 = vunpack.c.l.s4 %v3854_v11 }
 0x2ee   : > { %v2456_v36 = vadd.f32 %v2455_v22, %v2454_v15  ;;  %v1732_v1 = vpop.permute.xlu0 %1731 }
 0x2ef   : > { %v4992_v30 = vsub.s32 %v1794_v7, %v4549_v57 }
 0x2f0   : > { %v1727_v54 = vpop.permute.xlu1 %1726 }
 0x2f1   : > { %v3460_v14 = vpop.eup %3459 }
 0x2f2   : > { %v2470_v18 = vmul.f32 %v3460_v14, %v2438_v60  ;;  %v4987_v6 = vpop.permute.xlu0 %1741 }
 0x2f3   : > { %v3462_v50 = vpop.eup %3461 }
 0x2f4   : > { %v2471_v58 = vmul.f32 %v3462_v50, %v2447_v17  ;;  %v2498_v39 = vsel %vm2497_vm7, %v2470_v18, %v2496_v47  ;;  %v4982_v23 = vpop.permute.xlu1 %1736 }
 0x2f5   : > { %v3464_v53 = vpop.eup %3463 }
 0x2f6   : > { %v2472_v32 = vmul.f32 %v3464_v53, %v2456_v36  ;;  %v2500_v43 = vsel %vm2499_vm8, %v2471_v58, %v2498_v39  ;;  %v1752_v53 = vpop.permute.xlu0 %1751 }
 0x2f8   : > { %v2502_v29 = vsel %vm2501_vm9, %v2472_v32, %v2500_v43  ;;  %v1747_v60 = vpop.permute.xlu1 %1746 }
 0x2f9   : > { %v2504_v28 = vmul.f32 %v3136_v4, %v2502_v29 }
 0x2fa   : > { %v1762_v45 = vpop.permute.xlu0 %1761 }
 0x2fb   : > { %v2511_v25 = vadd.f32 %v3137_v46, %v2504_v28 }
 0x2fd   : > { %v2516_v55 = vpack.c.bf16 %v2511_v25, %v2511_v25 }
 0x2ff   : > { %3244 = vmatmul.mubr.msk.bf16.vlgmr.msra.gmra.mrb[20].mxu0 %vm880_vm1, %v2516_v55 }
 0x34b   : > { %v3225_v44 = vpop.f32.mrb[4].mxu1 }
 0x34c   : > { %v1631_v12 = vpop.f32.mrb[5].mxu1  ;;  %v1640_v24 = vadd.f32 %v3225_v44, %v4979_v3 }
 0x34d   : > { %v3226_v21 = vpop.f32.mrb[6].mxu1  ;;  %v1632_v63 = vadd.f32 %v4979_v3, %v1631_v12 }
 0x34e   : > { %v1634_v59 = vpop.f32.mrb[7].mxu1  ;;  %v1643_v27 = vadd.f32 %v3226_v21, %v4979_v3  ;;  %v1776_v19 = vmul.f32 %v1707_v26, %v1640_v24 }
 0x34f   : > { %v1635_v38 = vadd.f32 %v4979_v3, %v1634_v59  ;;  %v1774_v34 = vmul.f32 %v1697_v2, %v1632_v63 }
 0x350   : > { %v1777_v47 = vmul.f32 %v1712_v61, %v1643_v27 }
 0x351   : > { %v1775_v22 = vmul.f32 %v1702_v48, %v1635_v38 }
 0x353   : > { %v3229_v5 = vpop.f32.mrb[8].mxu1 }
 0x354   : > { %v1656_v13 = vadd.f32 %v3229_v5, %v4979_v3  ;;  %v1647_v31 = vpop.f32.mrb[9].mxu1 }
 0x355   : > { %v1648_v40 = vadd.f32 %v4979_v3, %v1647_v31  ;;  %v3230_v62 = vpop.f32.mrb[10].mxu1 }
 0x356   : > { %v1780_v9 = vmul.f32 %v1727_v54, %v1656_v13  ;;  %v1659_v42 = vadd.f32 %v3230_v62, %v4979_v3  ;;  %v1650_v10 = vpop.f32.mrb[11].mxu1  ;;  %v1757_v54 = vpop.permute.xlu1 %1756 }
 0x357   : > { %v1778_v41 = vmul.f32 %v1717_v56, %v1648_v40  ;;  %v1651_v0 = vadd.f32 %v4979_v3, %v1650_v10  ;;  %v1858_v56 = vunpack.c.0.s8 %v1857_v35 }
 0x358   : > { %v1806_v8 = vcombine.low %v1776_v19, %v1780_v9  ;;  %v1807_v15 = vcombine.high %v1776_v19, %v1780_v9  ;;  %v1781_v20 = vmul.f32 %v1732_v1, %v1659_v42 }
 0x359   : > { %v1790_v14 = vcombine.low %v1774_v34, %v1778_v41  ;;  %v1791_v17 = vcombine.high %v1774_v34, %v1778_v41  ;;  %v1779_v18 = vmul.f32 %v1722_v33, %v1651_v0  ;;  %v5021_v63 = vsub.s32 %v1858_v56, %v4549_v57  ;;  %v1772_v0 = vpop.permute.xlu0 %1771 }
 0x35a   : > { %v1814_v50 = vrot.slane %v1806_v8, %v4992_v30  ;;  %v4998_v36 = vrot.slane %v1807_v15, %v4992_v30  ;;  %v1942_v58 = vcombine.low %v1777_v47, %v1781_v20  ;;  %v1943_v39 = vcombine.high %v1777_v47, %v1781_v20  ;;  %v1767_v62 = vpop.permute.xlu1 %1766 }
 0x35b   : > { %v1798_v32 = vrot.slane %v1790_v14, %v4992_v30  ;;  %v5002_v4 = vrot.slane %v1791_v17, %v4992_v30  ;;  %v1926_v43 = vcombine.low %v1775_v22, %v1779_v18  ;;  %v1927_v46 = vcombine.high %v1775_v22, %v1779_v18  ;;  %v3233_v29 = vpop.f32.mrb[12].mxu1 }
 0x35c   : > { %v1950_v28 = vrot.slane %v1942_v58, %v4992_v30  ;;  %v1663_v25 = vpop.f32.mrb[13].mxu1  ;;  %v5006_v55 = vrot.slane %v1943_v39, %v4992_v30  ;;  %v1672_v59 = vadd.f32 %v3233_v29, %v4979_v3 }
 0x35d   : > { %v1934_v2 = vrot.slane %v1926_v43, %v4992_v30  ;;  %v5010_v48 = vrot.slane %v1927_v46, %v4992_v30  ;;  %v3234_v26 = vpop.f32.mrb[14].mxu1  ;;  %v1854_v61 = vcombine.low %v1798_v32, %v1814_v50  ;;  %v1855_v44 = vcombine.high %v1798_v32, %v1814_v50 }
 0x35e   : > { %v1666_v33 = vpop.f32.mrb[15].mxu1  ;;  %v1870_v12 = vcombine.low %v5002_v4, %v4998_v36  ;;  %v1664_v1 = vadd.f32 %v4979_v3, %v1663_v25  ;;  %v1871_v24 = vcombine.high %v5002_v4, %v4998_v36  ;;  %v1675_v5 = vadd.f32 %v3234_v26, %v4979_v3 }
 0x35f   : > { %v1990_v21 = vcombine.low %v1934_v2, %v1950_v28  ;;  %v1991_v16 = vcombine.high %v1934_v2, %v1950_v28  ;;  %v2006_v7 = vcombine.low %v5010_v48, %v5006_v55  ;;  %v2007_v27 = vcombine.high %v5010_v48, %v5006_v55 }
 0x360   : > { %v1667_v31 = vadd.f32 %v4979_v3, %v1666_v33  ;;  %v1784_v19 = vmul.f32 %v1747_v60, %v1672_v59  ;;  %v1782_v9 = vmul.f32 %v4982_v23, %v1664_v1  ;;  %v1785_v57 = vmul.f32 %v1752_v53, %v1675_v5 }
 0x361   : > { %v5032_v41 = vrot.slane %v1854_v61, %v5021_v63  ;;  %v5036_v15 = vrot.slane %v1855_v44, %v5021_v63  ;;  %v5039_v23 = vrot.slane %v1870_v12, %v5021_v63  ;;  %v5043_v36 = vrot.slane %v1990_v21, %v5021_v63 }
 0x362   : > { %v1783_v20 = vmul.f32 %v4987_v6, %v1667_v31  ;;  %v2005_v28 = vrot.slane %v1991_v16, %v5021_v63  ;;  %v5053_v25 = vrot.slane %v2006_v7, %v5021_v63  ;;  %v5058_v56 = vrot.slane %v1871_v24, %v5021_v63 }
 0x363   : > { %v3237_v13 = vpop.f32.mrb[16].mxu1  ;;  %v5061_v44 = vrot.slane %v2007_v27, %v5021_v63 }
 0x364   : > { %v1688_v38 = vadd.f32 %v3237_v13, %v4979_v3  ;;  %v1679_v40 = vpop.f32.mrb[17].mxu1 }
 0x365   : > { %v1680_v42 = vadd.f32 %v4979_v3, %v1679_v40  ;;  %v3238_v10 = vpop.f32.mrb[18].mxu1 }
 0x366   : > { %v1788_v11 = vmul.f32 %v1767_v62, %v1688_v38  ;;  %v1691_v35 = vadd.f32 %v3238_v10, %v4979_v3  ;;  %v1682_v34 = vpop.f32.mrb[19].mxu1 }
 0x367   : > { %v1786_v47 = vmul.f32 %v1757_v54, %v1680_v42  ;;  %v1683_v8 = vadd.f32 %v4979_v3, %v1682_v34 }
 0x368   : > { %v1838_v60 = vcombine.low %v1784_v19, %v1788_v11  ;;  %v1839_v22 = vcombine.high %v1784_v19, %v1788_v11  ;;  %v1789_v14 = vmul.f32 %v1772_v0, %v1691_v35 }
 0x369   : > { %v1822_v17 = vcombine.low %v1782_v9, %v1786_v47  ;;  %v1823_v18 = vcombine.high %v1782_v9, %v1786_v47  ;;  %v1787_v50 = vmul.f32 %v1762_v45, %v1683_v8  ;;  %v2616_v47 = vrot.slane %v4531_v37, 4 }
 0x36a   : > { %v1846_v58 = vrot.slane %v1838_v60, %v4992_v30  ;;  %v1853_v3 = vrot.slane %v1839_v22, %v4992_v30  ;;  %v1974_v39 = vcombine.low %v1785_v57, %v1789_v14  ;;  %v1975_v53 = vcombine.high %v1785_v57, %v1789_v14 }
 0x36b   : > { %v1830_v32 = vrot.slane %v1822_v17, %v4992_v30  ;;  %v1837_v4 = vrot.slane %v1823_v18, %v4992_v30  ;;  %v1958_v6 = vcombine.low %v1783_v20, %v1787_v50  ;;  %v1959_v43 = vcombine.high %v1783_v20, %v1787_v50 }
 0x36c   : > { %v1982_v46 = vrot.slane %v1974_v39, %v4992_v30  ;;  %v1989_v29 = vrot.slane %v1975_v53, %v4992_v30  ;;  %v2653_v22 = vrot.slane %v4539_v49, 4  ;;  %v2690_v50 = vrot.slane %v4543_v52, 4 }
 0x36d   : > { %v1966_v55 = vrot.slane %v1958_v6, %v4992_v30  ;;  %v1973_v2 = vrot.slane %v1959_v43, %v4992_v30  ;;  %v1886_v48 = vcombine.low %v1830_v32, %v1846_v58  ;;  %v1887_v26 = vcombine.high %v1830_v32, %v1846_v58 }
 0x36e   : > { %v1902_v61 = vcombine.low %v1837_v4, %v1853_v3  ;;  %v1903_v33 = vcombine.high %v1837_v4, %v1853_v3  ;;  %v2654_v18 = vmin.f32 %v4539_v49, %v2653_v22  ;;  %v2691_v39 = vmax.f32 %v4543_v52, %v2690_v50 }
 0x36f   : > { %v5064_v12 = vrot.slane %v1886_v48, %v5021_v63  ;;  %v2022_v54 = vcombine.low %v1966_v55, %v1982_v46  ;;  %v1901_v21 = vrot.slane %v1887_v26, %v5021_v63  ;;  %v2023_v16 = vcombine.high %v1966_v55, %v1982_v46 }
 0x370   : > { %v1910_v45 = vrot.slane %v1902_v61, %v5021_v63  ;;  %v2038_v30 = vcombine.low %v1973_v2, %v1989_v29  ;;  %v5069_v59 = vrot.slane %v1903_v33, %v5021_v63  ;;  %v2039_v1 = vcombine.high %v1973_v2, %v1989_v29 }
 0x371   : > { %v1919_v7 = vcombine.high %v5032_v41, %v5064_v12  ;;  %v5074_v24 = vrot.slane %v2022_v54, %v5021_v63  ;;  %v1920_v5 = vcombine.low %v5036_v15, %v1901_v21  ;;  %v2037_v27 = vrot.slane %v2023_v16, %v5021_v63 }
 0x372   : > { %v1921_v13 = vcombine.high %v5036_v15, %v1901_v21  ;;  %v1922_v31 = vcombine.low %v5039_v23, %v1910_v45  ;;  %v2046_v38 = vrot.slane %v2038_v30, %v5021_v63  ;;  %v1923_v40 = vcombine.high %v5039_v23, %v1910_v45  ;;  %v3465_v23 = vld [vmem:[%s4318_s26 + $0x78] sm:$0xff]  ;;  %s3859_s26 = smov 80   ;;  %v2581_v21 = vpop.permute.xlu1 %2580 }
 0x373   : > { %2063 = vrot.lane.b32.xlu0 %v1919_v7, %s3855_s8  ;;  %v2055_v62 = vcombine.high %v5043_v36, %v5074_v24  ;;  %v2056_v19 = vcombine.low %v2005_v28, %v2037_v27  ;;  %v2057_v9 = vcombine.high %v2005_v28, %v2037_v27  ;;  %v1924_v42 = vcombine.low %v5058_v56, %v5069_v59 }
 0x374   : > { %v2058_v10 = vcombine.low %v5053_v25, %v2046_v38  ;;  %v2059_v57 = vcombine.high %v5053_v25, %v2046_v38  ;;  %v2053_v11 = vrot.slane %v2039_v1, %v5021_v63  ;;  %v1925_v35 = vcombine.high %v5058_v56, %v5069_v59  ;;  %v3138_v56 = vld [vmem:[%s5426_s15] ss:$0 sm:$0xff]  ;;  %s3648_s15 = sshll.u32 %s3861_s9, 4  ;;  %s3649_s15 = int_to_ptr.vmem [resolvable:$false] %s3648_s15 }
 0x375   : > { %2091 = vrot.lane.b32.xlu1 %v2055_v62, %s3855_s8  ;;  %v1918_v34 = vcombine.low %v5032_v41, %v5064_v12  ;;  %v2054_v0 = vcombine.low %v5043_v36, %v5074_v24  ;;  %v2617_v63 = vadd.f32 %v2616_v47, %v4531_v37  ;;  %v2711_v20 = vmul.f32 %v3465_v23, %v3465_v23  ;;  %s5427_s8 = sld [smem:[#allocation32_spill]]  ;;  %s3650_s6 = scalar_lea.vmem %s3649_s15, 256 }
 0x376   : > { %v2060_v8 = vcombine.low %v5061_v44, %v2053_v11  ;;  %v2061_v15 = vcombine.high %v5061_v44, %v2053_v11  ;;  %v2655_v3 = vrot.slane %v2654_v18, 2  ;;  %v2692_v4 = vrot.slane %v2691_v39, 2 }
 0x377   : > { %2067 = vrot.lane.b32.xlu0 %v1920_v5, %s3856_s14  ;;  %v2618_v60 = vrot.slane %v2617_v63, 2  ;;  %v2741_v14 = vsel %vm1050_vm2, %v2711_v20, 0.0 }
 0x378   : > { %v2742_v37 = vadd.f32 %v2741_v14, %v4541_v51  ;;  %v2656_v32 = vmin.f32 %v2654_v18, %v2655_v3  ;;  %v2693_v46 = vmax.f32 %v2691_v39, %v2692_v4 }
 0x379   : > { %2095 = vrot.lane.b32.xlu1 %v2056_v19, %s3856_s14  ;;  %v2619_v17 = vadd.f32 %v2618_v60, %v2617_v63  ;;  %s3146_s14 = sshll.u32 %s5115_s4, 7 }
 0x37a   : > { %v2743_v53 = vrot.slane %v2742_v37, 4  ;;  %v2657_v49 = vrot.slane %v2656_v32, 1  ;;  %v2694_v28 = vrot.slane %v2693_v46, 1 }
 0x37b   : > { %2071 = vrot.lane.b32.xlu0 %v1921_v13, %s3857_s28  ;;  %v2620_v58 = vrot.slane %v2619_v17, 1  ;;  %p5430_p8 = scmp.ne.s32.totalorder %s5427_s8, 0 }
 0x37c   : > { %v2744_v6 = vadd.f32 %v2743_v53, %v2742_v37  ;;  %v2658_v51 = vmin.f32 %v2656_v32, %v2657_v49  ;;  %v2695_v52 = vmax.f32 %v2693_v46, %v2694_v28 }
 0x37d   : > { %2099 = vrot.lane.b32.xlu1 %v2057_v9, %s3857_s28  ;;  %v2621_v43 = vadd.f32 %v2620_v58, %v2619_v17  ;;  %s820_s28 = scalar_lea.vmem [#allocation13], %s3095_s18  ;;  %s2758_s18 = scalar_lea.sflag [#allocation4], %s4314_s23 }
 0x37e   : > { %v2745_v29 = vrot.slane %v2744_v6, 2 }
 0x37f   : > { %2075 = vrot.lane.b32.xlu0 %v1922_v31, %s3858_s0  ;;  %v2750_v2 = vsel %vm2749_vm10, %v2621_v43, %v2658_v51 }
 0x380   : > { %v2746_v25 = vadd.f32 %v2745_v29, %v2744_v6  ;;  %v2752_v26 = vsel %vm2751_vm11, %v2750_v2, %v2695_v52 }
 0x381   : > { %2103 = vrot.lane.b32.xlu1 %v2058_v10, %s3858_s0  ;;  %s2783_s0 = sshll.u32 %s820_s28, 4  ;;  %s5126_s0 = int_to_ptr.vmem [resolvable:$true] %s2783_s0 }
 0x382   : > { %v2747_v55 = vrot.slane %v2746_v25, 1  ;;  %s3644_s16 = scalar_lea.vmem %s5126_s0, 128  ;;  %p3651_p12 = scmp.lt.s32.totalorder %s5126_s0, %s3649_s15 }
 0x383   : > { %2079 = vrot.lane.b32.xlu0 %v1923_v40, %s3859_s26  ;;  %p3645_p3 = scmp.ne.s32.totalorder %s5126_s0, %s3644_s16  ;;  %p3652_p13 = scmp.lt.s32.totalorder %s3650_s6, %s3644_s16 }
 0x384   : > { %v2748_v48 = vadd.f32 %v2747_v55, %v2746_v25 }
 0x385   : > { %2107 = vrot.lane.b32.xlu1 %v2059_v57, %s3859_s26  ;;  %p3646_p4 = pnand %p3645_p3, %p5430_p8  ;;  %p3653_p9 = por %p3652_p13, %p3651_p12 }
 0x386   : > { %v2754_v61 = vsel %vm2753_vm12, %v2752_v26, %v2748_v48 }
 0x387   : > { %2083 = vrot.lane.b32.xlu0 %v1924_v42, %s3852_s21  ;;  %p3647_p0 = pneg %p3646_p4 }
 0x389   : > { %2111 = vrot.lane.b32.xlu1 %v2060_v8, %s3852_s21  ;;  %s5109_s21 = scalar_lea.vmem [#allocation16], %s3097_s1  ;;  %s5428_s1 = sld [smem:[#allocation52_spill]] }
 0x38a   : > { %2756 = vst.msk [vmem:[%s5109_s21] sm:$0xf] %vm2755_vm13, %v2754_v61  ;;  %p3654_p10 = pnand %p3653_p9, %p3647_p0 }
 0x38b   : > { %2087 = vrot.lane.b32.xlu0 %v1925_v35, %s3860_s27 }
 0x38d   : > { %2115 = vrot.lane.b32.xlu1 %v2061_v15, %s3860_s27 }
 0x38f   : > { %s5429_s5 = smov %s5428_s1  ;;  %s5124_s2 = scalar_lea.hbm %s5428_s1, %s3146_s14 }
 0x3d2   : > { %v2573_v33 = vpop.f32.mrb[20].mxu0 }
 0x3d3   : > { %v2574_v44 = vadd.f32 %v3138_v56, %v2573_v33  ;;  %v3245_v54 = vpop.f32.mrb[21].mxu0 }
 0x3d4   : > { %v2576_v16 = vpop.f32.mrb[22].mxu0 }
 0x3d5   : > { %v2583_v45 = vmul.f32 %v2581_v21, %v2574_v44  ;;  %v3246_v30 = vpop.f32.mrb[23].mxu0 }
 0x3d7   : > { %2584 = vst.msk [vmem:[%s820_s28] sm:$0xff] %vm880_vm1, %v2583_v45 }
 0x3d8   : > { %3657 = shalt.err (!%p3654_p10)
}
 0x3d9   : > { %s3658_s14 = scalar_lea.hbm %s5124_s2, 128  ;;  %s3662_s27 = scalar_lea.hbm %s5429_s5, 512 }
 0x3da   : > { %p3659_p5 = scmp.ne.s32.totalorder %s5124_s2, %s3658_s14  ;;  %p3663_p1 = scmp.lt.u32.totalorder %s5124_s2, %s5429_s5 }
 0x3db   : > { %p3664_p7 = scmp.lt.u32.totalorder %s3662_s27, %s3658_s14  ;;  %p3666_p3 = scmp.lt.u32.totalorder %s3658_s14, %s5124_s2 }
 0x3dc   : > { %p3660_p2 = pnand %p3659_p5, %p5430_p8 }
 0x3dd   : > { %p3665_p11 = por %p3664_p7, %p3663_p1 }
 0x3de   : > { %p3661_p6 = pneg %p3660_p2 }
 0x3df   : > { %p3667_p4 = por %p3666_p3, %p3665_p11 }
 0x3e1   : > { %p3668_p0 = pnand %p3667_p4, %p3661_p6 }
 0x3e3   : > { %3671 = shalt.err (!%p3668_p0)
}
 0x3e4   : > { %3261 = dma.vmem_to_hbm [thread:$0]  (%p5430_p8), %s5126_s0, 128, %s5124_s2, %s2758_s18   ;;  %vm2120_vm14 = vcmask 392192   ;;  %vm2122_vm15 = vcmask 523264   ;;  %vm2124_vm0 = vcmask 654336   ;;  %vm2126_vm3 = vcmask 785408  }
 0x3e5   : > { %v2064_v59 = vpop.permute.xlu0 %2063  ;;  %s3096_s6 = sshll.u32 %s4314_s23, 4  ;;  %s3147_s16 = sshll.u32 %s5409_s29, 1  ;;  %vm2128_vm4 = vcmask 916480  }
 0x3e6   : > { %s3148_s15 = sshll.u32 %s5408_s19, 2  ;;  %v2118_v19 = vsel %vm1050_vm2, %v1918_v34, %v2064_v59  ;;  %s827_s23 = scalar_lea.vmem [#allocation14], %s3096_s6 }
 0x3e7   : > { %v2092_v1 = vpop.permute.xlu1 %2091  ;;  %s2795_s0 = sadd.s32 %s3148_s15, %s3147_s16  ;;  %s2799_s19 = sshll.u32 %s827_s23, 4  ;;  %s5178_s19 = int_to_ptr.vmem [resolvable:$true] %s2799_s19 }
 0x3e8   : > { %v2130_v10 = vsel %vm1050_vm2, %v2054_v0, %v2092_v1  ;;  %s3149_s29 = sshll.u32 %s2795_s0, 7  ;;  %s3151_s2 = sshll.u32 %s5115_s4, 6 }
 0x3e9   : > { %v2068_v7 = vpop.permute.xlu0 %2067  ;;  %s2814_s18 = sshll.u32 %s5109_s21, 4  ;;  %s5431_s26 = sld [smem:[#allocation53_spill]]  ;;  %s5186_s18 = int_to_ptr.vmem [resolvable:$true] %s2814_s18 }
 0x3ea   : > { %v2119_v9 = vsel %vm880_vm1, %v2118_v19, %v2068_v7  ;;  %s5432_s1 = sld [smem:[#allocation54_spill]]  ;;  %s2763_s16 = scalar_lea.sflag [#allocation15], %s4325_s11 }
 0x3eb   : > { %v2096_v5 = vpop.permute.xlu1 %2095  ;;  %s3672_s15 = scalar_lea.vmem %s5178_s19, 256  ;;  %s3862_s0 = smov [#allocation14]  }
 0x3ec   : > { %v2131_v11 = vsel %vm880_vm1, %v2130_v10, %v2096_v5  ;;  %p3673_p12 = scmp.ne.s32.totalorder %s5178_s19, %s3672_s15 }
 0x3ed   : > { %v2072_v27 = vpop.permute.xlu0 %2071 }
 0x3ee   : > { %v2121_v57 = vsel %vm2120_vm14, %v2119_v9, %v2072_v27  ;;  %p3674_p13 = pnand %p3673_p12, %p5430_p8 }
 0x3ef   : > { %v2100_v13 = vpop.permute.xlu1 %2099  ;;  %s5176_s27 = scalar_lea.hbm %s5431_s26, %s3149_s29  ;;  %s3676_s29 = sshll.u32 %s3862_s0, 4  ;;  %s3677_s29 = int_to_ptr.vmem [resolvable:$false] %s3676_s29 }
 0x3f0   : > { %v2132_v35 = vsel %vm2120_vm14, %v2131_v11, %v2100_v13  ;;  %s5433_s9 = smov %s5432_s1  ;;  %s5184_s6 = scalar_lea.hbm %s5432_s1, %s3151_s2 }
 0x3f1   : > { %v2076_v31 = vpop.permute.xlu0 %2075  ;;  %p3675_p9 = pneg %p3674_p13  ;;  %s3678_s14 = scalar_lea.vmem %s3677_s29, 512 }
 0x3f2   : > { %v2123_v41 = vsel %vm2122_vm15, %v2121_v57, %v2076_v31  ;;  %p3679_p10 = scmp.lt.s32.totalorder %s5178_s19, %s3677_s29  ;;  %p3680_p5 = scmp.lt.s32.totalorder %s3678_s14, %s3672_s15 }
 0x3f3   : > { %v2104_v38 = vpop.permute.xlu1 %2103 }
 0x3f4   : > { %v2133_v36 = vsel %vm2122_vm15, %v2132_v35, %v2104_v38  ;;  %p3681_p2 = por %p3680_p5, %p3679_p10 }
 0x3f5   : > { %v2080_v40 = vpop.permute.xlu0 %2079 }
 0x3f6   : > { %v2125_v34 = vsel %vm2124_vm0, %v2123_v41, %v2080_v40  ;;  %p3682_p6 = pnand %p3681_p2, %p3675_p9 }
 0x3f7   : > { %v2108_v62 = vpop.permute.xlu1 %2107 }
 0x3f8   : > { %v2134_v47 = vsel %vm2124_vm0, %v2133_v36, %v2108_v62 }
 0x3f9   : > { %v2084_v42 = vpop.permute.xlu0 %2083 }
 0x3fa   : > { %v2127_v24 = vsel %vm2126_vm3, %v2125_v34, %v2084_v42 }
 0x3fb   : > { %v2112_v12 = vpop.permute.xlu1 %2111 }
 0x3fc   : > { %v2135_v15 = vsel %vm2126_vm3, %v2134_v47, %v2112_v12 }
 0x3fd   : > { %v2088_v0 = vpop.permute.xlu0 %2087 }
 0x3fe   : > { %v2129_v8 = vsel %vm2128_vm4, %v2127_v24, %v2088_v0 }
 0x3ff   : > { %2137 = vst [vmem:[%s827_s23] sm:$0xff] %v2129_v8  ;;  %v2116_v63 = vpop.permute.xlu1 %2115 }
 0x400   : > { %v2136_v23 = vsel %vm2128_vm4, %v2135_v15, %v2116_v63 }
 0x401   : > { %2138 = vst [vmem:[%s827_s23 + $0x8] sm:$0xff] %v2136_v23 }
 0x402   : > { %3685 = shalt.err (!%p3682_p6)
}
 0x403   : > { %s3686_s23 = scalar_lea.hbm %s5176_s27, 256  ;;  %s3690_s21 = scalar_lea.hbm %s5431_s26, 1024 }
 0x404   : > { %p3687_p1 = scmp.ne.s32.totalorder %s5176_s27, %s3686_s23  ;;  %p3691_p3 = scmp.lt.u32.totalorder %s5176_s27, %s5431_s26 }
 0x405   : > { %p3692_p4 = scmp.lt.u32.totalorder %s3690_s21, %s3686_s23  ;;  %p3694_p12 = scmp.lt.u32.totalorder %s3686_s23, %s5176_s27 }
 0x406   : > { %p3688_p7 = pnand %p3687_p1, %p5430_p8 }
 0x407   : > { %p3693_p0 = por %p3692_p4, %p3691_p3 }
 0x408   : > { %p3689_p11 = pneg %p3688_p7 }
 0x409   : > { %p3695_p13 = por %p3694_p12, %p3693_p0 }
 0x40b   : > { %p3696_p9 = pnand %p3695_p13, %p3689_p11 }
 0x40d   : > { %3699 = shalt.err (!%p3696_p9)
}
 0x40e   : > { %3262 = dma.vmem_to_hbm [thread:$0]  (%p5430_p8), %s5178_s19, 256, %s5176_s27, %s2763_s16  }
 0x40f   : > { %s3700_s15 = scalar_lea.vmem %s5186_s18, 64  ;;  %s3863_s0 = smov [#allocation16]  }
 0x410   : > { %p3701_p10 = scmp.ne.s32.totalorder %s5186_s18, %s3700_s15  ;;  %s3704_s29 = sshll.u32 %s3863_s0, 4  ;;  %s3705_s29 = int_to_ptr.vmem [resolvable:$false] %s3704_s29 }
 0x411   : > { %s3706_s14 = scalar_lea.vmem %s3705_s29, 128  ;;  %p3707_p6 = scmp.lt.s32.totalorder %s5186_s18, %s3705_s29 }
 0x412   : > { %p3702_p5 = pnand %p3701_p10, %p5430_p8  ;;  %p3708_p1 = scmp.lt.s32.totalorder %s3706_s14, %s3700_s15 }
 0x414   : > { %p3703_p2 = pneg %p3702_p5  ;;  %p3709_p7 = por %p3708_p1, %p3707_p6 }
 0x416   : > { %p3710_p11 = pnand %p3709_p7, %p3703_p2 }
 0x418   : > { %3713 = shalt.err (!%p3710_p11)
}
 0x419   : > { %s3714_s19 = scalar_lea.hbm %s5184_s6, 64  ;;  %s3718_s2 = scalar_lea.hbm %s5433_s9, 256 }
 0x41a   : > { %p3715_p3 = scmp.ne.s32.totalorder %s5184_s6, %s3714_s19  ;;  %p3719_p12 = scmp.lt.u32.totalorder %s5184_s6, %s5433_s9 }
 0x41b   : > { %p3720_p13 = scmp.lt.u32.totalorder %s3718_s2, %s3714_s19  ;;  %p3722_p10 = scmp.lt.u32.totalorder %s3714_s19, %s5184_s6 }
 0x41c   : > { %p3716_p4 = pnand %p3715_p3, %p5430_p8 }
 0x41d   : > { %p3721_p9 = por %p3720_p13, %p3719_p12 }
 0x41e   : > { %p3717_p0 = pneg %p3716_p4 }
 0x41f   : > { %p3723_p5 = por %p3722_p10, %p3721_p9 }
 0x421   : > { %p3724_p2 = pnand %p3723_p5, %p3717_p0 }
 0x423   : > { %3727 = shalt.err (!%p3724_p2)
}
 0x424   : > { %3263 = dma.vmem_to_hbm [thread:$0]  (%p5430_p8), %s5186_s18, 64, %s5184_s6, %s2763_s16  }
 0x425 PF: > { %s5434_s4 = sld [smem:[#allocation24_spill]]  ;;  %s5435_s1 = sld [smem:[#allocation33_spill]] }
 0x426   : > { %p3300_p6 = scmp.ge.s32.totalorder %s3838_s3, 2 }
 0x42b   : > { %s2826_s15 = sand.u32 1, %s5434_s4   ;;  %p5436_p1 = scmp.ne.s32.totalorder %s5435_s1, 0 }
 0x42c   : > { %s2827_s0 = scalar_lea.sflag [#allocation4], %s2826_s15 }
 0x42d   : > { %p3288_p7 = pnand %p3300_p6, %p5436_p1 }
 0x42f   : > { %3789 = dma.done.wait (!%p3288_p7), %s2827_s0, 128  }
 0x430   : > { %3791 = vsyncadd (!%p3288_p7), %s2827_s0, 4294967168  ;;  %s5437_s29 = sadd.s32 4294967294, %s3838_s3  }
 0x431   : > { %s2835_s14 = sand.u32 1, %s5437_s29  }
 0x432   : > { %s2836_s8 = scalar_lea.sflag [#allocation15], %s2835_s14 }
 0x433   : > { %3793 = dma.done.wait (!%p3288_p7), %s2836_s8, 320  }
 0x434   : > { %3795 = vsyncadd (!%p3288_p7), %s2836_s8, 4294966976  ;;  %s46_s3 = sadd.s32 1, %s3838_s3   ;;  %s5438_s0 = sld [smem:[#allocation23_spill]] }
 0x435   : > { %p43_p8 = scmp.ge.s32.totalorder %s46_s3, 6   ;;  %s5439_s21 = sld [smem:[#allocation25_spill]] }
 0x436   : > { %s5440_s2 = sld [smem:[#allocation28_spill]]  ;;  %s5441_s11 = sld [smem:[#allocation34_spill]] }
 0x437   : > { %s5442_s18 = smov %s5455_s30  ;;  %s5443_s30 = smov %s3806_s20 }
 0x438   : > { %s5444_s20 = smov %s4214_s24  ;;  %s5445_s1 = smov %s3818_s22 }
 0x439   : > { %s5446_s22 = smov %s4219_s7  ;;  %s5447_s23 = smov %s3834_s25 }
 0x43a   : > { %s5449_s25 = smov %s5442_s18  ;;  %45 = sbr.rel (!%p43_p8) target bundleno = 37 (0x25), region = 225 }
 0x43c   : > { %s5448_s24 = smov %s5441_s11 }
 0x441   :  { %2850 = vsyncpa [#allocation3], 1 }
 0x442   :  { %2852 = vsyncpa [#allocation3 + $0x1], 1 }
 0x443   :  { %2853 = vsyncpa [#allocation6], 1 }
 0x444   :  { %2855 = vsyncpa [#allocation6 + $0x1], 1 }
 0x445   :  { %2856 = vsyncpa [#allocation9], 1 }
 0x446   :  { %2858 = vsyncpa [#allocation9 + $0x1], 1 }
 0x447   :  { %2859 = vsyncpa [#allocation12], 1 }
 0x448   :  { %2860 = vsyncpa [#allocation4], 1 }
 0x449   :  { %2862 = vsyncpa [#allocation4 + $0x1], 1 }
 0x44a   :  { %2863 = vsyncpa [#allocation15], 1 }
 0x44b   :  { %2865 = vsyncpa [#allocation15 + $0x1], 1 }

// kernel: tpu_custom_call.1
= control target key start
LH: loop header
LB: loop body
LE: loop exit
PB: predicated region body
PF: predicated region fallthrough
CT: control target
= control target key end

     0   :  { %s4845_s0 = inlined_call_operand.vmem [shape: f32[2,16,32], index: 0, kind: input, shape index: {}]   ;;  %s4846_s1 = inlined_call_operand.hbm [shape: f32[2,16,16,16], index: 1, kind: input, shape index: {}]   ;;  %s4847_s2 = inlined_call_operand.vmem [shape: f32[2,16,1], index: 2, kind: input, shape index: {}]   ;;  %s4848_s3 = inlined_call_operand.hbm [shape: f32[2,1,32], index: 3, kind: input, shape index: {}]   ;;  %s4849_s4 = inlined_call_operand.hbm [shape: f32[2,1,32], index: 4, kind: input, shape index: {}]   ;;  %s4850_s5 = inlined_call_operand.hbm [shape: f32[2,1,32], index: 5, kind: input, shape index: {}]   ;;  %s4851_s6 = inlined_call_operand.hbm [shape: f32[2,1,32], index: 6, kind: input, shape index: {}]   ;;  %s4852_s7 = inlined_call_operand.vmem [shape: bf16[32,32], index: 7, kind: input, shape index: {}]   ;;  %s4853_s8 = inlined_call_operand.hbm [shape: f32[1,32], index: 8, kind: input, shape index: {}]   ;;  %s4854_s9 = inlined_call_operand.vmem [shape: bf16[32,64], index: 9, kind: input, shape index: {}]   ;;  %s4855_s10 = inlined_call_operand.vmem [shape: f32[1,64], index: 10, kind: input, shape index: {}]   ;;  %s4856_s11 = inlined_call_operand.vmem [shape: bf16[16,64], index: 11, kind: input, shape index: {}]   ;;  %s4857_s12 = inlined_call_operand.vmem [shape: f32[1,64], index: 12, kind: input, shape index: {}]   ;;  %s4858_s13 = inlined_call_operand.vmem [shape: bf16[32,16], index: 13, kind: input, shape index: {}]   ;;  %s4859_s14 = inlined_call_operand.vmem [shape: f32[1,16], index: 14, kind: input, shape index: {}]   ;;  %s4860_s15 = inlined_call_operand.vmem [shape: bf16[32,32], index: 15, kind: input, shape index: {}]   ;;  %s4861_s16 = inlined_call_operand.vmem [shape: f32[1,32], index: 16, kind: input, shape index: {}]   ;;  %s4862_s17 = inlined_call_operand.hbm [shape: f32[2,16,32], index: 17, kind: output, shape index: {0}]   ;;  %s4863_s18 = inlined_call_operand.hbm [shape: f32[2,16,16,16], index: 18, kind: output, shape index: {1}]   ;;  %s4864_s19 = inlined_call_operand.hbm [shape: f32[2,2,4,16], index: 19, kind: output, shape index: {2}]  }
   0x1   :  { %4907 = sst [smem:[#allocation35_spill]] %s4845_s0 }
   0x2   :  { %4908 = sst [smem:[#allocation36_spill]] %s4846_s1 }
   0x3   :  { %4909 = sst [smem:[#allocation37_spill]] %s4847_s2 }
   0x4   :  { %4910 = sst [smem:[#allocation38_spill]] %s4848_s3 }
   0x5   :  { %4911 = sst [smem:[#allocation39_spill]] %s4849_s4 }
   0x6   :  { %4912 = sst [smem:[#allocation40_spill]] %s4850_s5 }
   0x7   :  { %4913 = sst [smem:[#allocation41_spill]] %s4851_s6 }
   0x8   :  { %4914 = sst [smem:[#allocation42_spill]] %s4852_s7 }
   0x9   :  { %4915 = sst [smem:[#allocation43_spill]] %s4853_s8 }
   0xa   :  { %4916 = sst [smem:[#allocation44_spill]] %s4854_s9 }
   0xb   :  { %4917 = sst [smem:[#allocation45_spill]] %s4855_s10 }
   0xc   :  { %4918 = sst [smem:[#allocation46_spill]] %s4856_s11 }
   0xd   :  { %4919 = sst [smem:[#allocation47_spill]] %s4857_s12 }
   0xe   :  { %4920 = sst [smem:[#allocation48_spill]] %s4858_s13 }
   0xf   :  { %4921 = sst [smem:[#allocation49_spill]] %s4859_s14 }
  0x10   :  { %4922 = sst [smem:[#allocation50_spill]] %s4860_s15 }
  0x11   :  { %4923 = sst [smem:[#allocation51_spill]] %s4861_s16 }
  0x12   :  { %4924 = sst [smem:[#allocation52_spill]] %s4862_s17 }
  0x13   :  { %4925 = sst [smem:[#allocation53_spill]] %s4863_s18 }
  0x14   :  { %4926 = sst [smem:[#allocation54_spill]] %s4864_s19 }
  0x15   :  { %25 = vsyncpa [#allocation3], 0 }
  0x16   :  { %27 = vsyncpa [#allocation3 + $0x1], 0 }
  0x17   :  { %28 = vsyncpa [#allocation6], 0 }
  0x18   :  { %30 = vsyncpa [#allocation6 + $0x1], 0 }
  0x19   :  { %31 = vsyncpa [#allocation9], 0 }
  0x1a   :  { %33 = vsyncpa [#allocation9 + $0x1], 0 }
  0x1b   :  { %34 = vsyncpa [#allocation12], 0 }
  0x1c   :  { %35 = vsyncpa [#allocation4], 0 }
  0x1d   :  { %37 = vsyncpa [#allocation4 + $0x1], 0 }
  0x1e   :  { %38 = vsyncpa [#allocation15], 0 }
  0x1f   :  { %40 = vsyncpa [#allocation15 + $0x1], 0  ;;  %s3625_s0 = smov 0   ;;  %s3627_s30 = smov 0  }
  0x20   :  { %s3629_s20 = smov 0   ;;  %s3631_s21 = smov 0  }
  0x21   :  { %s3633_s1 = smov 0   ;;  %s3635_s22 = smov 0  }
  0x22   :  { %s3637_s2 = smov 0   ;;  %s3639_s23 = smov 0  }
  0x23   :  { %s3641_s24 = smov 0   ;;  %s3643_s25 = smov 0  }
  0x24   :  { %s3645_s3 = smov 0  }
  0x25 LB: > { %4927 = sst [smem:[#allocation23_spill]] %s3469_s30  ;;  %p4875_p0 = scmp.eq.s32.totalorder %s3505_s3, 0  ;;  %s3505_s3 = sphi %s3645_s3, %s46_s3   ;;  %s3501_s25 = sphi %s3643_s25, %s5019_s25   ;;  %s3497_s24 = sphi %s3641_s24, %s5018_s24   ;;  %s3493_s23 = sphi %s3639_s23, %s5017_s23   ;;  %s3489_s2 = sphi %s3637_s2, %s5010_s2   ;;  %s3485_s22 = sphi %s3635_s22, %s5016_s22   ;;  %s3481_s1 = sphi %s3633_s1, %s5015_s1   ;;  %s3477_s21 = sphi %s3631_s21, %s5009_s21   ;;  %s3473_s20 = sphi %s3629_s20, %s5014_s20   ;;  %s3469_s30 = sphi %s3627_s30, %s5013_s30   ;;  %s3465_s0 = sphi %s3625_s0, %s5008_s0  }
  0x26   : > { %4928 = sst [smem:[#allocation24_spill]] %s3477_s21  ;;  %p152_p1 = scmp.ne.s32.totalorder %s3473_s20, %s3469_s30 }
  0x27   : > { %4929 = sst [smem:[#allocation25_spill]] %s3481_s1  ;;  %p4874_p2 = scmp.lt.s32.totalorder %s3505_s3, 4 }
  0x28   : > { %4930 = sst [smem:[#allocation26_spill]] %s3489_s2  ;;  %p154_p3 = por %p152_p1, %p4875_p0 }
  0x29   : > { %4931 = sst [smem:[#allocation27_spill]] %s3493_s23  ;;  %s3690_s29 = sand.u32 1, %s3473_s20  }
  0x2a   : > { %4932 = sst [smem:[#allocation28_spill]] %s3497_s24  ;;  %s3693_s17 = sshll.u32 %s3501_s25, 4 }
  0x2b   : > { %s4933_s18 = sld [smem:[#allocation38_spill]]  ;;  %s635_s27 = scalar_lea.vmem [#allocation5], %s3690_s29 }
  0x2c   : > { %s642_s26 = sshll.u32 %s635_s27, 4  ;;  %p3706_p4 = pnand %p4874_p2, %p154_p3  ;;  %s3702_s26 = int_to_ptr.vmem [resolvable:$true] %s642_s26 }
  0x2d   : > { %s4935_s5 = sld [smem:[#allocation40_spill]]  ;;  %s4936_s19 = sand.u32 1, %s3505_s3  }
  0x2e   : > { %s4934_s28 = scalar_select %p3706_p4, 1, 0 }
  0x2f   : > { %s3718_s13 = scalar_lea.sflag [#allocation6], %s4936_s19  ;;  %p3724_p6 = pneg %p3706_p4 }
  0x31   : > { %s3699_s14 = scalar_lea.hbm %s4933_s18, %s3693_s17  ;;  %s3138_s12 = scalar_lea.hbm %s4933_s18, 32 }
  0x32   : > { %s3133_s10 = scalar_lea.hbm %s3699_s14, 16  ;;  %p3139_p9 = scmp.lt.u32.totalorder %s3699_s14, %s4933_s18 }
  0x33   : > { %s3714_s16 = scalar_lea.hbm %s4935_s5, %s3693_s17  ;;  %p3134_p5 = scmp.ne.s32.totalorder %s3699_s14, %s3133_s10 }
  0x34   : > { %s4937_s27 = scalar_select %p3724_p6, 1, 0 }
  0x35   : > { %p3136_p7 = pnand %p3724_p6, %p3134_p5  ;;  %p3140_p10 = scmp.lt.u32.totalorder %s3138_s12, %s3133_s10 }
  0x36   : > { %p3142_p12 = scmp.lt.u32.totalorder %s3133_s10, %s3699_s14 }
  0x37   : > { %p3137_p8 = pneg %p3136_p7  ;;  %p3141_p11 = por %p3140_p10, %p3139_p9 }
  0x39   : > { %p3143_p13 = por %p3142_p12, %p3141_p11 }
  0x3b   : > { %p3144_p1 = pnand %p3143_p13, %p3137_p8 }
  0x3d   : > { %3147 = shalt.err (!%p3144_p1)
}
  0x3e   : > { %s3148_s19 = scalar_lea.vmem %s3702_s26, 16  ;;  %s3507_s7 = smov [#allocation5]  }
  0x3f   : > { %p3149_p3 = scmp.ne.s32.totalorder %s3702_s26, %s3148_s19  ;;  %s3153_s11 = sshll.u32 %s3507_s7, 4  ;;  %s3154_s11 = int_to_ptr.vmem [resolvable:$false] %s3153_s11 }
  0x40   : > { %s3155_s9 = scalar_lea.vmem %s3154_s11, 32  ;;  %p3156_p2 = scmp.lt.s32.totalorder %s3702_s26, %s3154_s11 }
  0x41   : > { %p3151_p5 = pnand %p3149_p3, %p3724_p6  ;;  %p3157_p0 = scmp.lt.s32.totalorder %s3155_s9, %s3148_s19 }
  0x43   : > { %p3152_p7 = pneg %p3151_p5  ;;  %p3158_p9 = por %p3157_p0, %p3156_p2 }
  0x45   : > { %p3159_p10 = pnand %p3158_p9, %p3152_p7 }
  0x47   : > { %3162 = shalt.err (!%p3159_p10)
}
  0x48   : > { %2950 = dma.hbm_to_vmem [thread:$0]  (!%p3706_p4), %s3699_s14, 16, %s3702_s26, %s3718_s13  }
  0x49   : > { %s669_s10 = scalar_lea.vmem [#allocation8], %s3690_s29  ;;  %s4938_s15 = sand.u32 1, %s3505_s3  }
  0x4a   : > { %s676_s12 = sshll.u32 %s669_s10, 4  ;;  %s3751_s19 = scalar_lea.sflag [#allocation9], %s4938_s15  ;;  %s677_s12 = int_to_ptr.vmem [resolvable:$true] %s676_s12 }
  0x4b   : > { %s3163_s7 = scalar_lea.hbm %s3714_s16, 16  ;;  %s3168_s18 = scalar_lea.hbm %s4935_s5, 32 }
  0x4c   : > { %p3164_p0 = scmp.ne.s32.totalorder %s3714_s16, %s3163_s7  ;;  %p3169_p11 = scmp.lt.u32.totalorder %s3714_s16, %s4935_s5 }
  0x4d   : > { %p3170_p12 = scmp.lt.u32.totalorder %s3168_s18, %s3163_s7  ;;  %p3172_p1 = scmp.lt.u32.totalorder %s3163_s7, %s3714_s16 }
  0x4e   : > { %p3166_p2 = pnand %p3164_p0, %p3724_p6 }
  0x4f   : > { %p3171_p13 = por %p3170_p12, %p3169_p11 }
  0x50   : > { %p3167_p8 = pneg %p3166_p2 }
  0x51   : > { %p3173_p3 = por %p3172_p1, %p3171_p13 }
  0x53   : > { %p3174_p5 = pnand %p3173_p3, %p3167_p8 }
  0x55   : > { %3177 = shalt.err (!%p3174_p5)
}
  0x56   : > { %s3178_s14 = scalar_lea.vmem %s677_s12, 16  ;;  %s3508_s26 = smov [#allocation8]  }
  0x57   : > { %p3179_p7 = scmp.ne.s32.totalorder %s677_s12, %s3178_s14  ;;  %s3183_s10 = sshll.u32 %s3508_s26, 4  ;;  %s3184_s10 = int_to_ptr.vmem [resolvable:$false] %s3183_s10 }
  0x58   : > { %s3185_s15 = scalar_lea.vmem %s3184_s10, 32  ;;  %p3186_p0 = scmp.lt.s32.totalorder %s677_s12, %s3184_s10 }
  0x59   : > { %p3181_p9 = pnand %p3179_p7, %p3724_p6  ;;  %p3187_p2 = scmp.lt.s32.totalorder %s3185_s15, %s3178_s14 }
  0x5b   : > { %p3182_p10 = pneg %p3181_p9  ;;  %p3188_p4 = por %p3187_p2, %p3186_p0 }
  0x5d   : > { %p3189_p11 = pnand %p3188_p4, %p3182_p10 }
  0x5f   : > { %3192 = shalt.err (!%p3189_p11)
}
  0x60   : > { %p4939_p12 = scmp.ne.s32.totalorder %s4934_s28, 0  ;;  %s3772_s18 = sadd.s32 4294967295, %s3505_s3  }
  0x61   : > { %4940 = sst [smem:[#allocation29_spill]] %s3772_s18  ;;  %s4883_s2 = sadd.s32 4294967294, %s3505_s3  }
  0x62   : > { %2956 = dma.hbm_to_vmem [thread:$0]  (!%p4939_p12), %s3714_s16, 16, %s677_s12, %s3751_s19  }
  0x63   : > { %p100_p4 = scmp.ne.s32.totalorder %s3485_s22, %s3481_s1  ;;  %p106_p8 = scmp.ne.s32.totalorder %s3481_s1, %s3477_s21 }
  0x64   : > { %p4891_p13 = scmp.eq.s32.totalorder %s3772_s18, 0  ;;  %p158_p1 = scmp.ne.s32.totalorder %s3469_s30, %s3465_s0 }
  0x65   : > { %p4941_p3 = scmp.eq.s32.totalorder %s3505_s3, 0  ;;  %p472_p7 = scmp.eq.s32.totalorder %s3772_s18, 3 }
  0x66   : > { %p3791_p9 = por %p4891_p13, %p106_p8  ;;  %p3797_p10 = por %p158_p1, %p4891_p13 }
  0x67   : > { %p3784_p5 = por %p4941_p3, %p100_p4  ;;  %p3801_p0 = por %p472_p7, %p100_p4 }
  0x68   : > { %s4943_s16 = scalar_select %p3791_p9, 1, 0 }
  0x69   : > { %s4942_s23 = scalar_select %p3784_p5, 1, 0 }
  0x6a   : > { %4944 = sst [smem:[#allocation30_spill]] %s4943_s16  ;;  %p478_p2 = scmp.eq.s32.totalorder %s4883_s2, 3 }
  0x6b   : > { %s4945_s12 = scalar_select %p3797_p10, 1, 0 }
  0x6c   : > { %s4947_s0 = scalar_select %p3801_p0, 1, 0 }
  0x6d   : > { %4946 = sst [smem:[#allocation31_spill]] %s4945_s12  ;;  %p2751_p11 = scmp.ge.s32.totalorder %s3505_s3, 1 }
  0x6e   : > { %4948 = sst [smem:[#allocation32_spill]] %s4947_s0  ;;  %p541_p3 = scmp.lt.s32.totalorder %s3505_s3, 5 }
  0x6f   : > { %p3809_p12 = por %p478_p2, %p106_p8  ;;  %s3509_s9 = smov [#allocation11]  }
  0x70   : > { %p3813_p6 = pnand %p2751_p11, %p541_p3  ;;  %s557_s14 = sshll.u32 %s3509_s9, 4  ;;  %s558_s14 = int_to_ptr.vmem [resolvable:$true] %s557_s14 }
  0x71   : > { %s4949_s7 = scalar_select %p3809_p12, 1, 0 }
  0x72   : > { %s4951_s11 = scalar_select %p3813_p6, 1, 0 }
  0x73   : > { %4950 = sst [smem:[#allocation33_spill]] %s4949_s7  ;;  %p2940_p4 = pneg %p3813_p6 }
  0x74   : > { %s55_s15 = sadd.s32 1, %s3497_s24  ;;  %s4900_s5 = sand.u32 1, %s3485_s22  }
  0x75   : > { %p3822_p1 = pnand %p2940_p4, %p4891_p13  ;;  %p3827_p8 = scmp.ge.s32.totalorder %s55_s15, 2 }
  0x76   : > { %s4954_s8 = sld [smem:[#allocation43_spill]] }
  0x77   : > { %s4953_s2 = scalar_select %p3827_p8, 1, 0 }
  0x78   : > { %p3195_p2 = pneg %p3822_p1 }
  0x7c   : > { %s3193_s9 = scalar_lea.hbm %s4954_s8, 16 }
  0x7d   : > { %p3194_p7 = scmp.ne.s32.totalorder %s4954_s8, %s3193_s9  ;;  %p3200_p4 = scmp.lt.u32.totalorder %s3193_s9, %s4954_s8 }
  0x7f   : > { %p3196_p11 = pnand %p3195_p2, %p3194_p7 }
  0x81   : > { %p3197_p3 = pneg %p3196_p11 }
  0x83   : > { %p3202_p13 = pnand %p3200_p4, %p3197_p3 }
  0x85   : > { %3205 = shalt.err (!%p3202_p13)
}
  0x86   : > { %s3206_s18 = scalar_lea.vmem %s558_s14, 16  ;;  %s3213_s21 = scalar_lea.vmem %s558_s14, 32 }
  0x87   : > { %p3207_p12 = scmp.ne.s32.totalorder %s558_s14, %s3206_s18  ;;  %p3214_p9 = scmp.lt.s32.totalorder %s558_s14, %s558_s14 }
  0x88   : > { %p3215_p6 = scmp.lt.s32.totalorder %s3213_s21, %s3206_s18 }
  0x89   : > { %p3209_p0 = pnand %p3207_p12, %p3195_p2 }
  0x8a   : > { %p3216_p5 = por %p3215_p6, %p3214_p9 }
  0x8b   : > { %p3210_p10 = pneg %p3209_p0 }
  0x8d   : > { %p3217_p8 = pnand %p3216_p5, %p3210_p10 }
  0x8f   : > { %3220 = shalt.err (!%p3217_p8)
}
  0x90   : > { %2943 = dma.hbm_to_vmem [thread:$0]  (!%p3822_p1), %s4954_s8, 16, %s558_s14, [#allocation12]  }
  0x91   : > { %p4955_p12 = scmp.ne.s32.totalorder %s4953_s2, 0  ;;  %s4957_s30 = sadd.s32 1, %s3501_s25 }
  0x92   : > { %s2754_s7 = sshll.u32 %s4900_s5, 7  ;;  %s2826_s26 = sshll.u32 %s3497_s24, 4 }
  0x93   : > { %s5021_s15 = smov (%p4955_p12, %s55_s15), 0  ;;  %s5023_s30 = smov (!%p4955_p12, %s4957_s30), %s3501_s25 }
  0x94   : > { %4956 = sst [smem:[#allocation34_spill]] %s5021_s15  ;;  %s89_s18 = ssub.s32 %s3497_s24, %s5021_s15 }
  0x95   : > { %p60_p6 = scmp.ge.s32.totalorder %s5023_s30, 2  ;;  %s2757_s14 = sshll.u32 %s3501_s25, 5 }
  0x96   : > { %s611_s10 = sadd.s32 %s2826_s26, %s2757_s14  ;;  %s604_s2 = scalar_lea.vmem [#allocation2], %s2754_s7 }
  0x97   : > { %s5025_s30 = smov (%p60_p6, %s5023_s30), 0  ;;  %s614_s9 = sshll.u32 %s604_s2, 4  ;;  %s3882_s9 = int_to_ptr.vmem [resolvable:$true] %s614_s9 }
  0x98   : > { %s88_s21 = ssub.s32 %s3501_s25, %s5025_s30  ;;  %s2758_s12 = sshll.u32 %s611_s10, 7 }
  0x99   : > { %s90_s0 = sor.u32 %s89_s18, %s88_s21  ;;  %p143_p13 = scmp.eq.s32.totalorder %s88_s21, 0 }
  0x9a   : > { %p91_p5 = scmp.eq.s32.totalorder %s90_s0, 0  ;;  %s4958_s5 = sld [smem:[#allocation36_spill]] }
  0x9b   : > { %s4959_s1 = sadd.s32 1, %s3473_s20  ;;  %s4960_s26 = sadd.s32 1, %s3485_s22 }
  0x9c   : > { %s3875_s24 = scalar_select %p143_p13, %s3473_s20, %s4959_s1  }
  0x9d   : > { %s3880_s7 = scalar_select %p91_p5, %s3485_s22, %s4960_s26  }
  0x9e   : > { %p4961_p9 = scmp.ne.s32.totalorder %s4942_s23, 0  ;;  %p4962_p10 = scmp.lt.s32.totalorder %s3505_s3, 4 }
  0x9f   : > { %s4964_s8 = sand.u32 1, %s3485_s22  }
  0xa0   : > { %s3870_s16 = scalar_lea.hbm %s4958_s5, %s2758_s12  ;;  %p3888_p0 = pnand %p4962_p10, %p4961_p9 }
  0xa1   : > { %s3894_s15 = scalar_lea.sflag [#allocation3], %s4964_s8  ;;  %s3221_s14 = scalar_lea.hbm %s3870_s16, 2048 }
  0xa2   : > { %p3222_p1 = scmp.ne.s32.totalorder %s3870_s16, %s3221_s14  ;;  %p3223_p8 = pneg %p3888_p0 }
  0xa3   : > { %s3226_s10 = scalar_lea.hbm %s4958_s5, 8192  ;;  %p3227_p11 = scmp.lt.u32.totalorder %s3870_s16, %s4958_s5 }
  0xa4   : > { %p3224_p7 = pnand %p3223_p8, %p3222_p1  ;;  %p3228_p3 = scmp.lt.u32.totalorder %s3226_s10, %s3221_s14 }
  0xa5   : > { %p3230_p12 = scmp.lt.u32.totalorder %s3221_s14, %s3870_s16 }
  0xa6   : > { %p3225_p2 = pneg %p3224_p7  ;;  %p3229_p4 = por %p3228_p3, %p3227_p11 }
  0xa8   : > { %p3231_p6 = por %p3230_p12, %p3229_p4 }
  0xaa   : > { %p3232_p13 = pnand %p3231_p6, %p3225_p2 }
  0xac   : > { %3235 = shalt.err (!%p3232_p13)
}
  0xad   : > { %s3236_s12 = scalar_lea.vmem %s3882_s9, 2048  ;;  %s3510_s0 = smov [#allocation2]  }
  0xae   : > { %p3237_p5 = scmp.ne.s32.totalorder %s3882_s9, %s3236_s12  ;;  %s3241_s26 = sshll.u32 %s3510_s0, 4  ;;  %s3242_s26 = int_to_ptr.vmem [resolvable:$false] %s3241_s26 }
  0xaf   : > { %s3243_s8 = scalar_lea.vmem %s3242_s26, 4096  ;;  %p3244_p1 = scmp.lt.s32.totalorder %s3882_s9, %s3242_s26 }
  0xb0   : > { %p3239_p9 = pnand %p3237_p5, %p3223_p8  ;;  %p3245_p7 = scmp.lt.s32.totalorder %s3243_s8, %s3236_s12 }
  0xb2   : > { %p3240_p10 = pneg %p3239_p9  ;;  %p3246_p11 = por %p3245_p7, %p3244_p1 }
  0xb4   : > { %p3247_p3 = pnand %p3246_p11, %p3240_p10 }
  0xb6   : > { %3250 = shalt.err (!%p3247_p3)
}
  0xb7   : > { %s3511_s14 = smov 128   ;;  %s3512_s1 = smov 8  }
  0xb8   : > { %2947 = dma.hbm_to_vmem [thread:$0]  (!%p3888_p0), %s3870_s16, 2048, %s3882_s9, %s3894_s15, %s3511_s14, %s3511_s14, %s3512_s1  }
  0xb9   : > { %s4965_s4 = sld [smem:[#allocation39_spill]]  ;;  %s652_s21 = scalar_lea.vmem [#allocation7], %s3690_s29 }
  0xba   : > { %s659_s12 = sshll.u32 %s652_s21, 4  ;;  %p4966_p2 = scmp.ne.s32.totalorder %s4937_s27, 0  ;;  %s660_s12 = int_to_ptr.vmem [resolvable:$true] %s659_s12 }
  0xbf   : > { %s3926_s2 = scalar_lea.hbm %s4965_s4, %s3693_s17  ;;  %s3256_s16 = scalar_lea.hbm %s4965_s4, 32 }
  0xc0   : > { %s3251_s0 = scalar_lea.hbm %s3926_s2, 16  ;;  %p3257_p0 = scmp.lt.u32.totalorder %s3926_s2, %s4965_s4 }
  0xc1   : > { %p3252_p8 = scmp.ne.s32.totalorder %s3926_s2, %s3251_s0  ;;  %p3258_p6 = scmp.lt.u32.totalorder %s3256_s16, %s3251_s0 }
  0xc2   : > { %p3260_p5 = scmp.lt.u32.totalorder %s3251_s0, %s3926_s2 }
  0xc3   : > { %p3254_p4 = pnand %p3252_p8, %p4966_p2  ;;  %p3259_p13 = por %p3258_p6, %p3257_p0 }
  0xc5   : > { %p3255_p12 = pneg %p3254_p4  ;;  %p3261_p9 = por %p3260_p5, %p3259_p13 }
  0xc7   : > { %p3262_p10 = pnand %p3261_p9, %p3255_p12 }
  0xc9   : > { %3265 = shalt.err (!%p3262_p10)
}
  0xca   : > { %s3266_s8 = scalar_lea.vmem %s660_s12, 16  ;;  %s3513_s14 = smov [#allocation7]  }
  0xcb   : > { %p3267_p1 = scmp.ne.s32.totalorder %s660_s12, %s3266_s8  ;;  %s3271_s1 = sshll.u32 %s3513_s14, 4  ;;  %s3272_s1 = int_to_ptr.vmem [resolvable:$false] %s3271_s1 }
  0xcc   : > { %s3273_s23 = scalar_lea.vmem %s3272_s1, 32  ;;  %p3274_p3 = scmp.lt.s32.totalorder %s660_s12, %s3272_s1 }
  0xcd   : > { %p3269_p7 = pnand %p3267_p1, %p4966_p2  ;;  %p3275_p8 = scmp.lt.s32.totalorder %s3273_s23, %s3266_s8 }
  0xcf   : > { %p3270_p11 = pneg %p3269_p7  ;;  %p3276_p4 = por %p3275_p8, %p3274_p3 }
  0xd1   : > { %p3277_p0 = pnand %p3276_p4, %p3270_p11 }
  0xd3   : > { %3280 = shalt.err (!%p3277_p0)
}
  0xd4   : > { %p4967_p6 = scmp.ne.s32.totalorder %s4934_s28, 0  ;;  %s4968_s6 = sld [smem:[#allocation41_spill]] }
  0xd5   : > { %s686_s26 = scalar_lea.vmem [#allocation10], %s3690_s29 }
  0xd6   : > { %2953 = dma.hbm_to_vmem [thread:$0]  (!%p4967_p6), %s3926_s2, 16, %s660_s12, %s3718_s13  }
  0xd7   : > { %s693_s18 = sshll.u32 %s686_s26, 4  ;;  %s694_s18 = int_to_ptr.vmem [resolvable:$true] %s693_s18 }
  0xda   : > { %s3951_s0 = scalar_lea.hbm %s4968_s6, %s3693_s17  ;;  %s3286_s13 = scalar_lea.hbm %s4968_s6, 32 }
  0xdb   : > { %s3281_s16 = scalar_lea.hbm %s3951_s0, 16  ;;  %p3287_p9 = scmp.lt.u32.totalorder %s3951_s0, %s4968_s6 }
  0xdc   : > { %p3282_p12 = scmp.ne.s32.totalorder %s3951_s0, %s3281_s16  ;;  %p3288_p10 = scmp.lt.u32.totalorder %s3286_s13, %s3281_s16 }
  0xdd   : > { %p3290_p7 = scmp.lt.u32.totalorder %s3281_s16, %s3951_s0 }
  0xde   : > { %p3284_p13 = pnand %p3282_p12, %p4966_p2  ;;  %p3289_p1 = por %p3288_p10, %p3287_p9 }
  0xe0   : > { %p3285_p5 = pneg %p3284_p13  ;;  %p3291_p11 = por %p3290_p7, %p3289_p1 }
  0xe2   : > { %p3292_p3 = pnand %p3291_p11, %p3285_p5 }
  0xe4   : > { %3295 = shalt.err (!%p3292_p3)
}
  0xe5   : > { %s3296_s17 = scalar_lea.vmem %s694_s18, 16  ;;  %s3514_s29 = smov [#allocation10]  }
  0xe6   : > { %p3297_p8 = scmp.ne.s32.totalorder %s694_s18, %s3296_s17  ;;  %s3301_s8 = sshll.u32 %s3514_s29, 4  ;;  %s3302_s8 = int_to_ptr.vmem [resolvable:$false] %s3301_s8 }
  0xe7   : > { %s3303_s14 = scalar_lea.vmem %s3302_s8, 32  ;;  %p3304_p12 = scmp.lt.s32.totalorder %s694_s18, %s3302_s8 }
  0xe8   : > { %p3299_p4 = pnand %p3297_p8, %p4966_p2  ;;  %p3305_p13 = scmp.lt.s32.totalorder %s3303_s14, %s3296_s17 }
  0xea   : > { %p3300_p0 = pneg %p3299_p4  ;;  %p3306_p6 = por %p3305_p13, %p3304_p12 }
  0xec   : > { %p3307_p9 = pnand %p3306_p6, %p3300_p0 }
  0xee   : > { %3310 = shalt.err (!%p3307_p9)
}
  0xef   : > { %p4969_p10 = scmp.ne.s32.totalorder %s4934_s28, 0  ;;  %p4970_p5 = scmp.ne.s32.totalorder %s4951_s11, 0 }
  0xf0   : > { %s4971_s27 = sld [smem:[#allocation25_spill]] (!%p4970_p5)  ;;  %s4972_s1 = sld [smem:[#allocation30_spill]] (!%p4970_p5) }
  0xf1   : > { %2959 = dma.hbm_to_vmem [thread:$0]  (!%p4969_p10), %s3951_s0, 16, %s694_s18, %s3751_s19  }
  0xf2   : > { %702 = sbr.rel (%p4970_p5) target bundleno = 970 (0x3ca), region = 88 }
  0xf6   : > { %s3975_s23 = sand.u32 (!%p4970_p5), 1, %s4971_s27   ;;  %p4973_p2 = scmp.ne.s32.totalorder (!%p4970_p5), %s4972_s1, 0 }
  0xf7   : > { %s4905_s10 = sshll.u32 (!%p4970_p5), %s3975_s23, 7  ;;  %s705_s21 = scalar_lea.sflag (!%p4970_p5), [#allocation3], %s3975_s23 }
  0xf8   : > { %s3981_s26 = scalar_lea.vmem (!%p4970_p5), [#allocation2], %s4905_s10 }
  0xf9   : > { %3440 = dma.done.wait (%p4973_p2), %s705_s21, 2048  }
  0xfa   : > { %3442 = vsyncadd (%p4973_p2), %s705_s21, 4294965248  ;;  %s4974_s28 = sld [smem:[#allocation29_spill]]  ;;  %s4975_s19 = sld [smem:[#allocation23_spill]] }
  0xfb   : > { %s4976_s11 = sld [smem:[#allocation31_spill]] }
 0x100   : > { %s3988_s0 = sand.u32 1, %s4974_s28   ;;  %s3991_s18 = sand.u32 1, %s4975_s19  }
 0x101   : > { %s714_s16 = scalar_lea.sflag [#allocation6], %s3988_s0  ;;  %p4977_p6 = scmp.ne.s32.totalorder %s4976_s11, 0 }
 0x103   : > { %3444 = dma.done.wait (%p4977_p6), %s714_s16, 32  }
 0x104   : > { %3446 = vsyncadd (%p4977_p6), %s714_s16, 4294967264  ;;  %s730_s13 = scalar_lea.sflag [#allocation9], %s3988_s0 }
 0x105   : > { %3448 = dma.done.wait (%p4977_p6), %s730_s13, 32  }
 0x106   : > { %3450 = vsyncadd (%p4977_p6), %s730_s13, 4294967264  ;;  %p4978_p1 = scmp.eq.s32.totalorder %s4974_s28, 0 }
 0x108   : > { %3452 = dma.done.wait (%p4978_p1), [#allocation12], 16   ;;  %p4979_p7 = pmov %p4978_p1 }
 0x109   : > { %s4980_s17 = sld [smem:[#allocation27_spill]]  ;;  %s4981_s29 = sld [smem:[#allocation26_spill]]  ;;  %v3515_v0 = vmov 0.0   ;;  %vm3516_vm0 = vmmov 0   ;;  %v3517_v1 = vmov 0   ;;  %vm881_vm1 = vcmask 261120  }
 0x10a   : > { %3454 = vsyncadd (%p4979_p7), [#allocation12], 4294967280  ;;  %2858 = vmatprep.subr.bf16.mxu0 %v3515_v0  ;;  %2866 = vmatprep.subr.bf16.mxu1 %v3515_v0  ;;  %s4982_s21 = sld [smem:[#allocation35_spill]]  ;;  %s4983_s13 = sld [smem:[#allocation44_spill]]  ;;  %v1012_v14 = vld [vmem:[%s3981_s26] sm:$0xff]  ;;  %vm1051_vm2 = vcmask 130048  }
 0x10b   : > { %2862 = vmatprep.mubr.msk.bf16.mxu0 %vm3516_vm0, %v3515_v0  ;;  %2870 = vmatprep.mubr.msk.bf16.mxu1 %vm3516_vm0, %v3515_v0  ;;  %s4984_s12 = sld [smem:[#allocation42_spill]]  ;;  %s4985_s4 = sld [smem:[#allocation37_spill]]  ;;  %v1013_v16 = vld [vmem:[%s3981_s26 + $0x8] sm:$0xff]  ;;  %v2253_v17 = vsel %vm1051_vm2, %v1012_v14, 0.0  ;;  %v4061_v18 = vsel %vm1051_vm2, %v1012_v14, inf  ;;  %v4064_v19 = vsel %vm1051_vm2, %v1012_v14, -inf  ;;  %v2364_v20 = vmul.f32 %v1012_v14, %v1012_v14 }
 0x10c   : > { %3072 = vset.pattern.permute.xlu0 %v3517_v1  ;;  %3073 = vset.pattern.permute.xlu1 %v3517_v1  ;;  %s4986_s15 = sld [smem:[#allocation46_spill]]  ;;  %v4067_v21 = vld [vmem:[%s3981_s26 + $0x10] sm:$0xff]  ;;  %v4070_v22 = vld [vmem:[%s3981_s26 + $0x18] sm:$0xff]  ;;  %v1030_v23 = vpack.c.bf16 %v1013_v16, %v1012_v14  ;;  %v2254_v24 = vsel %vm1051_vm2, %v1013_v16, 0.0  ;;  %v4074_v25 = vsel %vm1051_vm2, %v1013_v16, inf  ;;  %v4077_v26 = vsel %vm1051_vm2, %v1013_v16, -inf }
 0x10d   : > { %v1016_v27 = vld [vmem:[%s3981_s26 + $0x20] sm:$0xff]  ;;  %v1017_v28 = vld [vmem:[%s3981_s26 + $0x28] sm:$0xff]  ;;  %v2255_v29 = vadd.f32 %v2254_v24, %v2253_v17  ;;  %v2365_v30 = vmul.f32 %v1013_v16, %v1013_v16  ;;  %v2380_v31 = vsel %vm1051_vm2, %v2364_v20, 0.0  ;;  %v1031_v32 = vpack.c.bf16 %v4070_v22, %v4067_v21  ;;  %v1018_v45 = vld [vmem:[%s3981_s26 + $0x30] sm:$0xff]  ;;  %s4988_s16 = sld [smem:[#allocation48_spill]]  ;;  %s4993_s11 = scalar_lea.vmem [#allocation10], %s3991_s18 }
 0x10e   : > { %v2256_v33 = vsel %vm1051_vm2, %v4067_v21, 0.0  ;;  %v2366_v34 = vmul.f32 %v4067_v21, %v4067_v21  ;;  %v2367_v35 = vmul.f32 %v4070_v22, %v4070_v22  ;;  %v1032_v36 = vpack.c.bf16 %v1017_v28, %v1016_v27  ;;  %v1019_v46 = vld [vmem:[%s3981_s26 + $0x38] sm:$0xff]  ;;  %v1020_v14 = vld [vmem:[%s3981_s26 + $0x40] sm:$0xff]  ;;  %v1021_v16 = vld [vmem:[%s3981_s26 + $0x48] sm:$0xff]  ;;  %s4995_s10 = sld [smem:[#allocation49_spill]]  ;;  %s4996_s2 = sshll.u32 %s3975_s23, 7 }
 0x10f   : > { %p835_p11 = scmp.lt.s32.totalorder %s4980_s17, 1  ;;  %s2773_s19 = sshll.u32 %s4981_s29, 3  ;;  %v2381_v37 = vsel %vm1051_vm2, %v2365_v30, 0.0  ;;  %v2257_v38 = vadd.f32 %v2256_v33, %v2255_v29  ;;  %v2258_v39 = vsel %vm1051_vm2, %v4070_v22, 0.0  ;;  %v2260_v40 = vsel %vm1051_vm2, %v1016_v27, 0.0 }
 0x110   : > { %v3074_v2 = vld [vmem:[%s4983_s13] sm:$0xff]   ;;  %v3076_v4 = vld [vmem:[%s4983_s13 + $0x8] sm:$0xff]   ;;  %v2382_v41 = vadd.f32 %v2381_v37, %v2380_v31  ;;  %v2383_v42 = vsel %vm1051_vm2, %v2366_v34, 0.0  ;;  %v2262_v43 = vsel %vm1051_vm2, %v1017_v28, 0.0  ;;  %v2294_v44 = vsel %vm1051_vm2, %v1016_v27, inf  ;;  %v1022_v37 = vld [vmem:[%s3981_s26 + $0x50] sm:$0xff] }
 0x111   : > { %s836_s8 = scalar_select %p835_p11, %s4980_s17, 1  ;;  %v3075_v3 = vld [vmem:[%s4984_s12] sm:$0xff]   ;;  %2859 = vmatpush3.bf16.msra.mxu0 %v3074_v2  ;;  %v3077_v5 = vld [vmem:[%s4984_s12 + $0x8] sm:$0xff]   ;;  %v2259_v47 = vadd.f32 %v2258_v39, %v2257_v38  ;;  %v2295_v48 = vmin.f32 %v4061_v18, %v2294_v44  ;;  %v2296_v49 = vsel %vm1051_vm2, %v1017_v28, inf  ;;  %v2331_v50 = vsel %vm1051_vm2, %v1016_v27, -inf  ;;  %v1023_v38 = vld [vmem:[%s3981_s26 + $0x58] sm:$0xff] }
 0x112   : > { %2867 = vmatpush3.bf16.msra.mxu1 %v3075_v3  ;;  %2860 = vmatprep.subr.bf16.mxu0 %v3515_v0  ;;  %v3078_v13 = vld [vmem:[%s4986_s15] sm:$0xff]   ;;  %v2297_v51 = vmin.f32 %v4074_v25, %v2296_v49  ;;  %v2332_v52 = vmax.f32 %v4064_v19, %v2331_v50  ;;  %v2333_v53 = vsel %vm1051_vm2, %v1017_v28, -inf  ;;  %v2368_v54 = vmul.f32 %v1016_v27, %v1016_v27  ;;  %s2829_s9 = sshll.u32 %s4981_s29, 4  ;;  %s2820_s15 = sshll.u32 %s4980_s17, 5 }
 0x113   : > { %s2827_s14 = sshll.u32 %s836_s8, 4  ;;  %2868 = vmatprep.subr.bf16.mxu1 %v3515_v0  ;;  %v2261_v55 = vadd.f32 %v2260_v40, %v2259_v47  ;;  %v2334_v56 = vmax.f32 %v4077_v26, %v2333_v53  ;;  %v2369_v57 = vmul.f32 %v1017_v28, %v1017_v28  ;;  %v2384_v58 = vadd.f32 %v2383_v42, %v2382_v41  ;;  %s4994_s8 = scalar_lea.vmem [#allocation8], %s3991_s18 }
 0x114   : > { %s839_s28 = scalar_lea.vmem %s4982_s21, %s2827_s14  ;;  %s4032_s5 = scalar_lea.vmem %s4985_s4, %s2827_s14  ;;  %v2385_v59 = vsel %vm1051_vm2, %v2367_v35, 0.0  ;;  %v2387_v60 = vsel %vm1051_vm2, %v2368_v54, 0.0  ;;  %v1033_v61 = vpack.c.bf16 %v1019_v46, %v1018_v45  ;;  %v2264_v62 = vsel %vm1051_vm2, %v1018_v45, 0.0 }
 0x115   : > { %s853_s1 = scalar_lea.vmem %s839_s28, %s2773_s19  ;;  %v849_v6 = vld [vmem:[%s839_s28] sm:$0xff]  ;;  %v850_v7 = vld [vmem:[%s839_s28 + $0x8] sm:$0xff]  ;;  %2861 = vmatpush3.bf16.msra.mxu0 %v3076_v4  ;;  %v2263_v63 = vadd.f32 %v2262_v43, %v2261_v55  ;;  %v2386_v1 = vadd.f32 %v2385_v59, %v2384_v58  ;;  %v2389_v2 = vsel %vm1051_vm2, %v2369_v57, 0.0  ;;  %v2266_v3 = vsel %vm1051_vm2, %v1019_v46, 0.0  ;;  %s855_s14 = scalar_lea.vmem %s4032_s5, %s2773_s19 }
 0x116   : > { %v4045_v8 = vld [vmem:[%s4032_s5] sm:$0xff]  ;;  %v4048_v9 = vld [vmem:[%s4032_s5 + $0x8] sm:$0xff]  ;;  %v861_v10 = vpack.c.bf16 %v850_v7, %v849_v6  ;;  %2869 = vmatpush3.bf16.msra.mxu1 %v3077_v5  ;;  %2874 = vmatprep.subr.bf16.mxu0 %v3078_v13  ;;  %v2292_v4 = vsel %vm1051_vm2, %v4067_v21, inf  ;;  %v2293_v5 = vsel %vm1051_vm2, %v4070_v22, inf  ;;  %v2298_v6 = vsel %vm1051_vm2, %v1018_v45, inf  ;;  %s4987_s28 = sld [smem:[#allocation45_spill]]  ;;  %s2464_s21 = sadd.s32 %s2829_s9, %s2820_s15 }
 0x117   : > { %v854_v11 = vld [vmem:[%s853_s1] sm:$0xff]  ;;  %928 = vperm.xlu0 %3072, %v4045_v8   ;;  %v4056_v15 = vadd.f32 -1.0, %v4048_v9  ;;  %v2300_v7 = vsel %vm1051_vm2, %v1019_v46, inf  ;;  %v2329_v17 = vsel %vm1051_vm2, %v4067_v21, -inf  ;;  %v2330_v18 = vsel %vm1051_vm2, %v4070_v22, -inf  ;;  %s4989_s1 = sld [smem:[#allocation47_spill]] }
 0x118   : > { %v942_v12 = vpack.c.bf16 %v854_v11, %v854_v11  ;;  %2863 = vmatmul.mubr.msk.bf16.vlgmr.msra.gmra.mrb[0].mxu0 %vm881_vm1, %v861_v10  ;;  %v2388_v10 = vadd.f32 %v2387_v60, %v2386_v1  ;;  %v2265_v11 = vadd.f32 %v2264_v62, %v2263_v63  ;;  %v2335_v19 = vsel %vm1051_vm2, %v1018_v45, -inf  ;;  %v1024_v59 = vld [vmem:[%s3981_s26 + $0x60] sm:$0xff]  ;;  %v1025_v60 = vld [vmem:[%s3981_s26 + $0x68] sm:$0xff]  ;;  %s3519_s4 = smov 96   ;;  %s4992_s19 = scalar_lea.vmem [#allocation5], %s3991_s18 }
 0x119   : > { %2875 = vmatpush3.bf16.msra.mxu0 %v3078_v13  ;;  %2876 = vmatprep.mubr.msk.bf16.mxu0 %vm1051_vm2, %v1030_v23  ;;  %v2301_v13 = vmin.f32 %v2293_v5, %v2300_v7  ;;  %v2337_v20 = vsel %vm1051_vm2, %v1019_v46, -inf  ;;  %v2336_v25 = vmax.f32 %v2329_v17, %v2335_v19  ;;  %v2370_v27 = vmul.f32 %v1018_v45, %v1018_v45  ;;  %v1026_v17 = vld [vmem:[%s3981_s26 + $0x70] sm:$0xff]  ;;  %s2816_s5 = sshll.u32 %s4980_s17, 1  ;;  %s2821_s17 = sshll.u32 %s2464_s21, 7 }
 0x11a   : > { %2871 = vmatmul.mubr.msk.bf16.vlgmr.msra.gmra.mrb[0].mxu1 %vm881_vm1, %v942_v12  ;;  %2912 = vmatprep.subr.bf16.mxu0 %v3515_v0  ;;  %v2299_v12 = vmin.f32 %v2292_v4, %v2298_v6  ;;  %v2390_v23 = vadd.f32 %v2389_v2, %v2388_v10  ;;  %v2267_v24 = vadd.f32 %v2266_v3, %v2265_v11  ;;  %v2268_v30 = vsel %vm1051_vm2, %v1020_v14, 0.0  ;;  %s5000_s15 = sld [smem:[#allocation54_spill]]  ;;  %s2431_s21 = scalar_lea.sflag [#allocation15], %s3988_s0 }
 0x11b   : > { %933 = vperm.xlu0 %3072, %v4048_v9   ;;  %v2338_v26 = vmax.f32 %v2330_v18, %v2337_v20  ;;  %v2371_v28 = vmul.f32 %v1019_v46, %v1019_v46  ;;  %v1034_v29 = vpack.c.bf16 %v1021_v16, %v1020_v14  ;;  %v2270_v21 = vsel %vm1051_vm2, %v1021_v16, 0.0  ;;  %v1027_v18 = vld [vmem:[%s3981_s26 + $0x78] sm:$0xff] }
 0x11c   : > { %v2269_v31 = vadd.f32 %v2268_v30, %v2267_v24  ;;  %v2302_v22 = vsel %vm1051_vm2, %v1020_v14, inf  ;;  %v2391_v33 = vsel %vm1051_vm2, %v2370_v27, 0.0  ;;  %v2339_v41 = vsel %vm1051_vm2, %v1020_v14, -inf }
 0x11d   : > { %v2393_v34 = vsel %vm1051_vm2, %v2371_v28, 0.0  ;;  %v2303_v35 = vmin.f32 %v2295_v48, %v2302_v22  ;;  %v2392_v39 = vadd.f32 %v2391_v33, %v2390_v23  ;;  %v2341_v42 = vsel %vm1051_vm2, %v1021_v16, -inf }
 0x11e   : > { %v2271_v40 = vadd.f32 %v2270_v21, %v2269_v31  ;;  %v2340_v43 = vmax.f32 %v2332_v52, %v2339_v41  ;;  %v2342_v44 = vmax.f32 %v2334_v56, %v2341_v42  ;;  %v2372_v45 = vmul.f32 %v1020_v14, %v1020_v14 }
 0x11f   : > { %v2373_v46 = vmul.f32 %v1021_v16, %v1021_v16  ;;  %v2394_v47 = vadd.f32 %v2393_v34, %v2392_v39  ;;  %v1035_v48 = vpack.c.bf16 %v1023_v38, %v1022_v37  ;;  %v2272_v49 = vsel %vm1051_vm2, %v1022_v37, 0.0 }
 0x120   : > { %2877 = vmatmul.mubr.msk.bf16.vlgmr.msra.gmra.mrb[4].mxu0 %vm1051_vm2, %v1031_v32  ;;  %v2304_v32 = vsel %vm1051_vm2, %v1021_v16, inf  ;;  %v2274_v50 = vsel %vm1051_vm2, %v1023_v38, 0.0  ;;  %v2273_v54 = vadd.f32 %v2272_v49, %v2271_v40  ;;  %v2306_v55 = vsel %vm1051_vm2, %v1022_v37, inf }
 0x121   : > { %2880 = vmatprep.mubr.msk.bf16.mxu0 %vm1051_vm2, %v1032_v36  ;;  %v2305_v36 = vmin.f32 %v2297_v51, %v2304_v32  ;;  %v2395_v51 = vsel %vm1051_vm2, %v2372_v45, 0.0  ;;  %v2397_v53 = vsel %vm1051_vm2, %v2373_v46, 0.0  ;;  %v2307_v52 = vmin.f32 %v2299_v12, %v2306_v55 }
 0x122   : > { %v2396_v57 = vadd.f32 %v2395_v51, %v2394_v47  ;;  %v2308_v56 = vsel %vm1051_vm2, %v1023_v38, inf  ;;  %v2343_v58 = vsel %vm1051_vm2, %v1022_v37, -inf  ;;  %v2345_v1 = vsel %vm1051_vm2, %v1023_v38, -inf }
 0x123   : > { %v2309_v62 = vmin.f32 %v2301_v13, %v2308_v56  ;;  %v2344_v63 = vmax.f32 %v2336_v25, %v2343_v58  ;;  %v2346_v3 = vmax.f32 %v2338_v26, %v2345_v1  ;;  %v2374_v4 = vmul.f32 %v1022_v37, %v1022_v37 }
 0x124   : > { %v2398_v2 = vadd.f32 %v2397_v53, %v2396_v57  ;;  %v2375_v5 = vmul.f32 %v1023_v38, %v1023_v38  ;;  %v1036_v6 = vpack.c.bf16 %v1025_v60, %v1024_v59  ;;  %v2276_v7 = vsel %vm1051_vm2, %v1024_v59, 0.0 }
 0x125   : > { %v2278_v10 = vsel %vm1051_vm2, %v1025_v60, 0.0  ;;  %v2310_v11 = vsel %vm1051_vm2, %v1024_v59, inf  ;;  %v2399_v12 = vsel %vm1051_vm2, %v2374_v4, 0.0  ;;  %v2312_v20 = vsel %vm1051_vm2, %v1025_v60, inf }
 0x126   : > { %v2401_v13 = vsel %vm1051_vm2, %v2375_v5, 0.0  ;;  %v2311_v16 = vmin.f32 %v2303_v35, %v2310_v11  ;;  %v2400_v19 = vadd.f32 %v2399_v12, %v2398_v2  ;;  %v2347_v23 = vsel %vm1051_vm2, %v1024_v59, -inf }
 0x127   : > { %v2349_v24 = vsel %vm1051_vm2, %v1025_v60, -inf  ;;  %v2313_v26 = vmin.f32 %v2305_v36, %v2312_v20  ;;  %v2348_v27 = vmax.f32 %v2340_v43, %v2347_v23  ;;  %v2376_v30 = vmul.f32 %v1024_v59, %v1024_v59  ;;  %v4176_v43 = vld [vmem:[%s855_s14] sm:$0xff]  ;;  %s4990_s14 = sld [smem:[#allocation50_spill]] }
 0x128   : > { %2881 = vmatmul.mubr.msk.bf16.gmra.mrb[8].mxu0 %vm1051_vm2, %v1033_v61  ;;  %v2275_v61 = vadd.f32 %v2274_v50, %v2273_v54  ;;  %v2350_v28 = vmax.f32 %v2342_v44, %v2349_v24  ;;  %v2377_v31 = vmul.f32 %v1025_v60, %v1025_v60  ;;  %v1037_v21 = vpack.c.bf16 %v1027_v18, %v1026_v17  ;;  %v3080_v24 = vld [vmem:[%s4988_s16] sm:$0xff]  }
 0x129   : > { %2884 = vmatprep.mubr.msk.bf16.mxu0 %vm1051_vm2, %v1034_v29  ;;  %v2402_v29 = vadd.f32 %v2401_v13, %v2400_v19  ;;  %v2318_v22 = vmin.f32 %v2311_v16, %v2313_v26  ;;  %v2280_v33 = vsel %vm1051_vm2, %v1026_v17, 0.0  ;;  %v2282_v34 = vsel %vm1051_vm2, %v1027_v18, 0.0  ;;  %2892 = vmatprep.subr.bf16.mxu1 %v3080_v24 }
 0x12a   : > { %v2277_v14 = vadd.f32 %v2276_v7, %v2275_v61  ;;  %v2355_v32 = vmax.f32 %v2348_v27, %v2350_v28  ;;  %v2403_v35 = vsel %vm1051_vm2, %v2376_v30, 0.0  ;;  %v2405_v37 = vsel %vm1051_vm2, %v2377_v31, 0.0  ;;  %v4206_v28 = vld [vmem:[%s4989_s1] ss:$0 sm:$0xff]  ;;  %2893 = vmatpush3.bf16.msra.mxu1 %v3080_v24  ;;  %s4998_s1 = sld [smem:[#allocation53_spill]] }
 0x12b   : > { %v2314_v36 = vsel %vm1051_vm2, %v1026_v17, inf  ;;  %v2404_v39 = vadd.f32 %v2403_v35, %v2402_v29  ;;  %v2316_v41 = vsel %vm1051_vm2, %v1027_v18, inf  ;;  %v2351_v42 = vsel %vm1051_vm2, %v1026_v17, -inf }
 0x12c   : > { %v2279_v25 = vadd.f32 %v2278_v10, %v2277_v14  ;;  %v2315_v40 = vmin.f32 %v2307_v52, %v2314_v36  ;;  %v2317_v45 = vmin.f32 %v2309_v62, %v2316_v41  ;;  %v2352_v46 = vmax.f32 %v2344_v63, %v2351_v42 }
 0x12d   : > { %v2353_v47 = vsel %vm1051_vm2, %v1027_v18, -inf  ;;  %v2378_v50 = vmul.f32 %v1026_v17, %v1026_v17  ;;  %v2805_v51 = vadd.f32 -1.0, %v4045_v8  ;;  %v1005_v54 = vmul.f32 0.35355338, %v4176_v43 }
 0x12e   : > { %v2281_v38 = vadd.f32 %v2280_v33, %v2279_v25  ;;  %v2354_v49 = vmax.f32 %v2346_v3, %v2353_v47  ;;  %v2319_v53 = vmin.f32 %v2315_v40, %v2317_v45  ;;  %v1810_v58 = vmul.f32 1e+30, %v4056_v15  ;;  %v2778_v3 = vld [vmem:[#allocation11] ss:$0 sm:$0xff]  ;;  %v2774_v15 = vld [vmem:[%s4987_s28] ss:$0 sm:$0xff] }
 0x12f   : > { %v2407_v57 = vsel %vm1051_vm2, %v2378_v50, 0.0  ;;  %1008 = vperm.xlu1 %3073, %v1005_v54   ;;  %v1809_v60 = vmul.f32 1e+30, %v2805_v51  ;;  %v3518_v61 = vmov 1966171168   ;;  %v1178_v63 = vlaneseq  ;;  %s4991_s28 = scalar_lea.vmem [#allocation7], %s3991_s18 }
 0x130   : > { %2885 = vmatmul.mubr.msk.bf16.gmra.mrb[12].mxu0 %vm1051_vm2, %v1035_v48  ;;  %v4178_v44 = vadd.f32 %v2282_v34, %v2281_v38  ;;  %v2406_v48 = vadd.f32 %v2405_v37, %v2404_v39  ;;  %v2356_v55 = vmax.f32 %v2352_v46, %v2354_v49  ;;  %v4187_v52 = vmin.f32 %v2318_v22, %v2319_v53  ;;  %v3081_v37 = vld [vmem:[%s4988_s16 + $0x8] sm:$0xff]  }
 0x131   : > { %2888 = vmatprep.mubr.msk.bf16.mxu0 %vm1051_vm2, %v1036_v6  ;;  %1818 = vperm.xlu0 %3072, %v1810_v58   ;;  %v1176_v62 = vunpack.c.l.s4 %v3518_v61  ;;  %v1179_v2 = vshrl.u32 %v1178_v63, 7  ;;  %vm2157_vm3 = vcmask 1041409   ;;  %vm2159_vm4 = vcmask 1042434  }
 0x132   : > { %v4189_v56 = vadd.f32 %v2407_v57, %v2406_v48  ;;  %v4192_v59 = vmax.f32 %v2355_v32, %v2356_v55  ;;  %2894 = vmatprep.subr.bf16.mxu1 %v3081_v37  ;;  %vm2161_vm5 = vcmask 1043459   ;;  %vm2163_vm6 = vcmask 1044484  }
 0x133   : > { %1813 = vperm.xlu1 %3073, %v1809_v60   ;;  %v1177_v1 = vunpack.c.0.s8 %v1176_v62  ;;  %v4208_v29 = vsub.s32 0, %v1179_v2  ;;  %2895 = vmatpush3.bf16.msra.mxu1 %v3081_v37  ;;  %vm2165_vm7 = vcmask 1045509   ;;  %vm2167_vm8 = vcmask 1046534  }
 0x134   : > { %vm2169_vm9 = vcmask 1047559   ;;  %vm2417_vm10 = vcmask 1040384   ;;  %vm2419_vm11 = vcmask 1041408   ;;  %vm2421_vm12 = vcmask 1042432  }
 0x135   : > { %v4194_v11 = vsub.s32 %v1177_v1, %v1179_v2  ;;  %vm2423_vm13 = vcmask 125952  }
 0x138   : > { %2889 = vmatmul.mubr.msk.bf16.gmra.mrb[16].mxu0 %vm1051_vm2, %v1037_v21 }
 0x139   : > { %2916 = vmatprep.mubr.msk.bf16.mxu0 %vm3516_vm0, %v3515_v0 }
 0x196   : > { %v929_v4 = vpop.permute.xlu0 %928 }
 0x19a   : > { %v934_v27 = vpop.permute.xlu0 %933 }
 0x1ae   : > { %v1009_v6 = vpop.permute.xlu1 %1008 }
 0x1eb   : > { %v919_v5 = vpop.f32.mrb[0].mxu0 }
 0x1ec   : > { %v2864_v10 = vpop.f32.mrb[1].mxu0  ;;  %v920_v20 = vadd.f32 %v2774_v15, %v919_v5 }
 0x1ed   : > { %v999_v7 = vpop.f32.mrb[0].mxu1  ;;  %v922_v13 = vpop.f32.mrb[2].mxu0 }
 0x1ee   : > { %v1000_v12 = vadd.f32 %v2778_v3, %v999_v7  ;;  %v2872_v14 = vpop.f32.mrb[1].mxu1  ;;  %v2865_v16 = vpop.f32.mrb[3].mxu0  ;;  %v923_v23 = vadd.f32 %v2774_v15, %v922_v13  ;;  %v4212_v32 = vmul.f32 %v929_v4, %v920_v20 }
 0x1ef   : > { %v1002_v17 = vpop.f32.mrb[2].mxu1 }
 0x1f0   : > { %v1011_v18 = vmul.f32 %v1009_v6, %v1000_v12  ;;  %v2873_v19 = vpop.f32.mrb[3].mxu1  ;;  %v4214_v33 = vmul.f32 %v934_v27, %v923_v23 }
 0x1f2   : > { %v1174_v25 = vcombine.high %v1011_v18, %v1011_v18  ;;  %v1181_v26 = vrot.slane %v1011_v18, %v4194_v11 }
 0x1f3   : > { %v2878_v22 = vpop.f32.mrb[4].mxu0 }
 0x1f4   : > { %v1188_v30 = vrot.slane %v1174_v25, %v4194_v11  ;;  %v1189_v31 = vcombine.high %v1181_v26, %v1181_v26  ;;  %v1197_v21 = vrot.slane %v1181_v26, %v4194_v11  ;;  %v1119_v34 = vadd.f32 %v2878_v22, %v4206_v28  ;;  %v1110_v35 = vpop.f32.mrb[5].mxu0 }
 0x1f5   : > { %v2879_v41 = vpop.f32.mrb[6].mxu0  ;;  %v1111_v45 = vadd.f32 %v4206_v28, %v1110_v35 }
 0x1f6   : > { %v1190_v38 = vcombine.high %v1188_v30, %v1188_v30  ;;  %v1204_v36 = vrot.slane %v1188_v30, %v4194_v11  ;;  %v1211_v39 = vrot.slane %v1189_v31, %v4194_v11  ;;  %v1219_v40 = vcombine.high %v1197_v21, %v1197_v21  ;;  %1331 = vrot.lane.b32.xlu1 %v1119_v34, %s3519_s4  ;;  %v1113_v47 = vpop.f32.mrb[7].mxu0 }
 0x1f7   : > { %v1281_v42 = vadd.f32 1.0, %v1119_v34  ;;  %v1122_v46 = vadd.f32 %v2879_v41, %v4206_v28  ;;  %v1226_v48 = vrot.slane %v1197_v21, %v4208_v29  ;;  %v1114_v49 = vadd.f32 %v4206_v28, %v1113_v47 }
 0x1f8   : > { %v1230_v50 = vrot.slane %v1211_v39, %v4208_v29  ;;  %v1221_v51 = vcombine.high %v1211_v39, %v1211_v39  ;;  %v1234_v53 = vrot.slane %v1219_v40, %v4208_v29  ;;  %v1279_v54 = vadd.f32 1.0, %v1111_v45 }
 0x1f9   : > { %v1282_v55 = vadd.f32 1.0, %v1122_v46  ;;  %1333 = vrot.lane.b32.xlu0 %v1122_v46, %s3519_s4  ;;  %v1263_v57 = vmul.f32 %v1226_v48, %v4212_v32  ;;  %v1264_v58 = vmul.f32 %v1226_v48, %v4214_v33  ;;  %v1280_v60 = vadd.f32 1.0, %v1114_v49 }
 0x1fa   : > { %v1265_v61 = vmul.f32 %v1230_v50, %v4212_v32  ;;  %v1266_v62 = vmul.f32 %v1230_v50, %v4214_v33  ;;  %v1238_v63 = vrot.slane %v1221_v51, %v4208_v29  ;;  %1327 = vrot.lane.b32.xlu1 %v1111_v45, %s3519_s4  ;;  %v1267_v2 = vmul.f32 %v1234_v53, %v4212_v32 }
 0x1fb   : > { %v4236_v1 = vmul.f32 %v1279_v54, %v1263_v57  ;;  %v1268_v3 = vmul.f32 %v1234_v53, %v4214_v33  ;;  %v1218_v4 = vrot.slane %v1190_v38, %v4194_v11  ;;  %v2882_v5 = vpop.f32.mrb[8].mxu0  ;;  %v4245_v10 = vmul.f32 %v1280_v60, %v1264_v58 }
 0x1fc   : > { %v4241_v6 = vmul.f32 %v1281_v42, %v1265_v61  ;;  %v4243_v7 = vmul.f32 %v1282_v55, %v1266_v62  ;;  %v1269_v12 = vmul.f32 %v1238_v63, %v4212_v32  ;;  %v1135_v15 = vadd.f32 %v2882_v5, %v4206_v28  ;;  %v1126_v13 = vpop.f32.mrb[9].mxu0 }
 0x1fd   : > { %1329 = vrot.lane.b32.xlu0 %v1114_v49, %s3519_s4  ;;  %v1270_v14 = vmul.f32 %v1238_v63, %v4214_v33  ;;  %v1246_v16 = vrot.slane %v1218_v4, %v4208_v29  ;;  %v1242_v17 = vrot.slane %v1204_v36, %v4208_v29  ;;  %v1127_v18 = vadd.f32 %v4206_v28, %v1126_v13  ;;  %v2883_v19 = vpop.f32.mrb[10].mxu0 }
 0x1fe   : > { %v1220_v20 = vcombine.high %v1204_v36, %v1204_v36  ;;  %v1222_v23 = vcombine.high %v1218_v4, %v1218_v4  ;;  %v1285_v24 = vadd.f32 1.0, %v1135_v15  ;;  %v1138_v25 = vadd.f32 %v2883_v19, %v4206_v28  ;;  %v1129_v26 = vpop.f32.mrb[11].mxu0  ;;  %1339 = vrot.lane.b32.xlu1 %v1135_v15, %s3519_s4 }
 0x1ff   : > { %v1273_v27 = vmul.f32 %v1246_v16, %v4212_v32  ;;  %v1274_v30 = vmul.f32 %v1246_v16, %v4214_v33  ;;  %v1283_v31 = vadd.f32 1.0, %v1127_v18  ;;  %v1130_v21 = vadd.f32 %v4206_v28, %v1129_v26 }
 0x200   : > { %v1271_v22 = vmul.f32 %v1242_v17, %v4212_v32  ;;  %v1272_v34 = vmul.f32 %v1242_v17, %v4214_v33  ;;  %v1286_v35 = vadd.f32 1.0, %v1138_v25  ;;  %v4262_v37 = vmul.f32 %v1285_v24, %v1269_v12 }
 0x201   : > { %1341 = vrot.lane.b32.xlu0 %v1138_v25, %s3519_s4  ;;  %v1250_v38 = vrot.slane %v1220_v20, %v4208_v29  ;;  %v1254_v36 = vrot.slane %v1222_v23, %v4208_v29  ;;  %v1284_v39 = vadd.f32 1.0, %v1130_v21  ;;  %v4266_v40 = vmul.f32 %v1283_v31, %v1267_v2 }
 0x202   : > { %1335 = vrot.lane.b32.xlu1 %v1127_v18, %s3519_s4  ;;  %v4269_v41 = vmul.f32 %v1286_v35, %v1270_v14  ;;  %v1445_v5 = vrot.slane %v4176_v43, %v4194_v11 }
 0x203   : > { %v1275_v42 = vmul.f32 %v1250_v38, %v4212_v32  ;;  %v1276_v45 = vmul.f32 %v1250_v38, %v4214_v33  ;;  %v1277_v46 = vmul.f32 %v1254_v36, %v4212_v32  ;;  %v2886_v47 = vpop.f32.mrb[12].mxu0  ;;  %v4274_v48 = vmul.f32 %v1284_v39, %v1268_v3 }
 0x204   : > { %v1278_v49 = vmul.f32 %v1254_v36, %v4214_v33  ;;  %v1151_v50 = vadd.f32 %v2886_v47, %v4206_v28  ;;  %v1142_v51 = vpop.f32.mrb[13].mxu0  ;;  %v1461_v25 = vrot.slane %v1445_v5, %v4194_v11  ;;  %v1453_v26 = vcombine.high %v1445_v5, %v1445_v5 }
 0x205   : > { %1337 = vrot.lane.b32.xlu0 %v1130_v21, %s3519_s4  ;;  %v1143_v53 = vadd.f32 %v4206_v28, %v1142_v51  ;;  %v2887_v54 = vpop.f32.mrb[14].mxu0  ;;  %v1438_v38 = vcombine.high %v4176_v43, %v4176_v43 }
 0x206   : > { %v1289_v55 = vadd.f32 1.0, %v1151_v50  ;;  %v1154_v57 = vadd.f32 %v2887_v54, %v4206_v28  ;;  %v1145_v58 = vpop.f32.mrb[15].mxu0  ;;  %1347 = vrot.lane.b32.xlu1 %v1151_v50, %s3519_s4 }
 0x207   : > { %v1287_v60 = vadd.f32 1.0, %v1143_v53  ;;  %v1146_v61 = vadd.f32 %v4206_v28, %v1145_v58  ;;  %v1452_v50 = vrot.slane %v1438_v38, %v4194_v11 }
 0x208   : > { %v1290_v62 = vadd.f32 1.0, %v1154_v57  ;;  %v4284_v63 = vmul.f32 %v1289_v55, %v1273_v27 }
 0x209   : > { %1349 = vrot.lane.b32.xlu0 %v1154_v57, %s3519_s4  ;;  %v1288_v2 = vadd.f32 1.0, %v1146_v61  ;;  %v4286_v3 = vmul.f32 %v1287_v60, %v1271_v22  ;;  %v1454_v54 = vcombine.high %v1452_v50, %v1452_v50 }
 0x20a   : > { %1343 = vrot.lane.b32.xlu1 %v1143_v53, %s3519_s4  ;;  %v4289_v4 = vmul.f32 %v1290_v62, %v1274_v30 }
 0x20b   : > { %v2890_v12 = vpop.f32.mrb[16].mxu0  ;;  %v4293_v15 = vmul.f32 %v1288_v2, %v1272_v34  ;;  %v1490_v34 = vrot.slane %v1461_v25, %v4208_v29  ;;  %v1482_v60 = vrot.slane %v1454_v54, %v4194_v11 }
 0x20c   : > { %v1167_v13 = vadd.f32 %v2890_v12, %v4206_v28  ;;  %v1158_v14 = vpop.f32.mrb[17].mxu0 }
 0x20d   : > { %1345 = vrot.lane.b32.xlu0 %v1146_v61, %s3519_s4  ;;  %v1159_v16 = vadd.f32 %v4206_v28, %v1158_v14  ;;  %v2891_v17 = vpop.f32.mrb[18].mxu0  ;;  %v1527_v36 = vmul.f32 %v1490_v34, %v4045_v8  ;;  %v1510_v2 = vrot.slane %v1482_v60, %v4208_v29 }
 0x20e   : > { %v1293_v18 = vadd.f32 1.0, %v1167_v13  ;;  %v1170_v19 = vadd.f32 %v2891_v17, %v4206_v28  ;;  %v1161_v20 = vpop.f32.mrb[19].mxu0 }
 0x20f   : > { %v1291_v23 = vadd.f32 1.0, %v1159_v16  ;;  %v1162_v24 = vadd.f32 %v4206_v28, %v1161_v20  ;;  %1351 = vrot.lane.b32.xlu1 %v1159_v16, %s3519_s4  ;;  %v1475_v28 = vrot.slane %v1453_v26, %v4194_v11  ;;  %v1486_v16 = vcombine.high %v1482_v60, %v1482_v60 }
 0x210   : > { %v1294_v27 = vadd.f32 1.0, %v1170_v19  ;;  %v4302_v30 = vmul.f32 %v1293_v18, %v1277_v46  ;;  %v1528_v46 = vmul.f32 %v1490_v34, %v4048_v9 }
 0x211   : > { %v1292_v31 = vadd.f32 1.0, %v1162_v24  ;;  %1353 = vrot.lane.b32.xlu0 %v1162_v24, %s3519_s4  ;;  %v4305_v21 = vmul.f32 %v1291_v23, %v1275_v42  ;;  %v1494_v39 = vrot.slane %v1475_v28, %v4208_v29  ;;  %v1483_v42 = vcombine.high %v1461_v25, %v1461_v25  ;;  %v3082_v24 = vld [vmem:[%s4990_s14] sm:$0xff]   ;;  %v4357_v25 = vpop.permute.xlu0 %1818 }
 0x212   : > { %v4307_v22 = vmul.f32 %v1294_v27, %v1278_v49  ;;  %v1485_v49 = vcombine.high %v1475_v28, %v1475_v28  ;;  %v1518_v18 = vrot.slane %v1486_v16, %v4208_v29  ;;  %2913 = vmatpush3.bf16.msra.mxu0 %v3082_v24 }
 0x213   : > { %1355 = vrot.lane.b32.xlu1 %v1167_v13, %s3519_s4  ;;  %v4312_v35 = vmul.f32 %v1292_v31, %v1276_v45  ;;  %v1529_v45 = vmul.f32 %v1494_v39, %v4045_v8  ;;  %v1498_v47 = vrot.slane %v1483_v42, %v4208_v29  ;;  %v1537_v13 = vmul.f32 %v1510_v2, %v4045_v8  ;;  %v4366_v31 = vld [vmem:[%s4992_s19] ss:$0 sm:$0xff] }
 0x214   : > { %v1502_v53 = vrot.slane %v1485_v49, %v4208_v29  ;;  %v1541_v20 = vmul.f32 %v1518_v18, %v4045_v8  ;;  %v1542_v23 = vmul.f32 %v1518_v18, %v4048_v9  ;;  %2914 = vmatprep.subr.bf16.mxu0 %v3515_v0 }
 0x215   : > { %1357 = vrot.lane.b32.xlu0 %v1170_v19, %s3519_s4  ;;  %v1531_v51 = vmul.f32 %v1498_v47, %v4045_v8  ;;  %v1532_v55 = vmul.f32 %v1498_v47, %v4048_v9 }
 0x216   : > { %v1533_v57 = vmul.f32 %v1502_v53, %v4045_v8  ;;  %v1534_v61 = vmul.f32 %v1502_v53, %v4048_v9 }
 0x217   : > { %2031 = vrot.lane.b32.xlu1 %v4212_v32, %s3519_s4  ;;  %v1530_v32 = vmul.f32 %v1494_v39, %v4048_v9 }
 0x219   : > { %2033 = vrot.lane.b32.xlu0 %v4214_v33, %s3519_s4  ;;  %v1468_v33 = vrot.slane %v1452_v50, %v4194_v11  ;;  %v1538_v11 = vmul.f32 %v1510_v2, %v4048_v9  ;;  %s4655_s4 = scalar_lea.vmem [#allocation14], %s4996_s2  ;;  %s4711_s2 = scalar_lea.hbm %s4998_s1, %s2821_s17 }
 0x21a   : > { %s2467_s19 = sshll.u32 %s4655_s4, 4  ;;  %s4704_s19 = int_to_ptr.vmem [resolvable:$true] %s2467_s19 }
 0x21b   : > { %1697 = vperm.xlu1 %3073, %v1527_v36   ;;  %v1506_v58 = vrot.slane %v1468_v33, %v4208_v29  ;;  %v1484_v5 = vcombine.high %v1468_v33, %v1468_v33  ;;  %s3311_s6 = scalar_lea.vmem %s4704_s19, 2048 }
 0x21c   : > { %p3312_p3 = scmp.ne.s32.totalorder %s4704_s19, %s3311_s6 }
 0x21d   : > { %1702 = vperm.xlu0 %3072, %v1528_v46   ;;  %v1535_v62 = vmul.f32 %v1506_v58, %v4045_v8  ;;  %v1536_v12 = vmul.f32 %v1506_v58, %v4048_v9  ;;  %v1514_v14 = vrot.slane %v1484_v5, %v4208_v29  ;;  %v3083_v29 = vld [vmem:[%s4990_s14 + $0x8] sm:$0xff]  }
 0x21e   : > { %2915 = vmatpush3.bf16.msra.mxu0 %v3083_v29 }
 0x21f   : > { %1707 = vperm.xlu1 %3073, %v1529_v45   ;;  %v1539_v17 = vmul.f32 %v1514_v14, %v4045_v8  ;;  %v1540_v19 = vmul.f32 %v1514_v14, %v4048_v9  ;;  %v4355_v8 = vpop.permute.xlu1 %1813  ;;  %v4361_v9 = vld [vmem:[%s4991_s28] ss:$0 sm:$0xff]  ;;  %s4694_s28 = sadd.s32 %s4981_s29, %s2816_s5  ;;  %s4997_s29 = sld [smem:[#allocation32_spill]] }
 0x221   : > { %1712 = vperm.xlu0 %3072, %v1530_v32  }
 0x223   : > { %1717 = vperm.xlu1 %3073, %v1531_v51  }
 0x225   : > { %1722 = vperm.xlu0 %3072, %v1532_v55   ;;  %p5001_p8 = scmp.ne.s32.totalorder %s4997_s29, 0 }
 0x227   : > { %1727 = vperm.xlu1 %3073, %v1533_v57   ;;  %p3313_p4 = pnand %p3312_p3, %p5001_p8 }
 0x229   : > { %1732 = vperm.xlu0 %3072, %v1534_v61   ;;  %p3314_p0 = pneg %p3313_p4 }
 0x22b   : > { %1737 = vperm.xlu1 %3073, %v1535_v62  }
 0x22d   : > { %1742 = vperm.xlu0 %3072, %v1536_v12  }
 0x22f   : > { %1747 = vperm.xlu1 %3073, %v1537_v13  }
 0x231   : > { %1752 = vperm.xlu0 %3072, %v1538_v11  }
 0x233   : > { %1757 = vperm.xlu1 %3073, %v1539_v17  }
 0x235   : > { %1762 = vperm.xlu0 %3072, %v1540_v19  }
 0x237   : > { %1767 = vperm.xlu1 %3073, %v1541_v20  }
 0x239   : > { %1772 = vperm.xlu0 %3072, %v1542_v23  }
 0x23b   : > { %2248 = vperm.xlu1 %3073, %v4176_v43  }
 0x268   : > { %v1332_v43 = vpop.permute.xlu1 %1331 }
 0x269   : > { %v1377_v26 = vadd.f32 %v1332_v43, %v4241_v6 }
 0x26b   : > { %v1334_v27 = vpop.permute.xlu0 %1333  ;;  %v1401_v34 = vmul.f32 %v4361_v9, %v1377_v26  ;;  %v4370_v28 = vadd.f32 %v4355_v8, %v1377_v26 }
 0x26c   : > { %v1378_v0 = vadd.f32 %v1334_v27, %v4243_v7  ;;  %v1328_v38 = vpop.permute.xlu1 %1327 }
 0x26d   : > { %v1423_v42 = vadd.f32 %v4366_v31, %v1401_v34  ;;  %v1375_v6 = vadd.f32 %v1328_v38, %v4236_v1  ;;  %v1846_v45 = vsel %vm881_vm1, %v4370_v28, -inf }
 0x26e   : > { %v1402_v36 = vmul.f32 %v4361_v9, %v1378_v0  ;;  %v4375_v39 = vadd.f32 %v4357_v25, %v1378_v0 }
 0x26f   : > { %v1330_v46 = vpop.permute.xlu0 %1329  ;;  %v1399_v32 = vmul.f32 %v4361_v9, %v1375_v6  ;;  %v4387_v51 = vadd.f32 %v4355_v8, %v1375_v6 }
 0x270   : > { %v1424_v47 = vadd.f32 %v4366_v31, %v1402_v36  ;;  %v1847_v49 = vsel %vm881_vm1, %v4375_v39, -inf  ;;  %v1376_v7 = vadd.f32 %v1330_v46, %v4245_v10  ;;  %v1340_v53 = vpop.permute.xlu1 %1339 }
 0x271   : > { %v1848_v50 = vmax.f32 %v1846_v45, %v1847_v49  ;;  %v1381_v55 = vadd.f32 %v1340_v53, %v4262_v37  ;;  %v1421_v58 = vadd.f32 %v4366_v31, %v1399_v32  ;;  %v1837_v10 = vsel %vm881_vm1, %v4387_v51, -inf }
 0x272   : > { %v1548_v33 = vpack.c.bf16 %v1424_v47, %v1423_v42  ;;  %v1400_v1 = vmul.f32 %v4361_v9, %v1376_v7  ;;  %v4391_v54 = vadd.f32 %v4357_v25, %v1376_v7 }
 0x273   : > { %v1849_v57 = vrot.slane %v1848_v50, 4  ;;  %v1342_v60 = vpop.permute.xlu0 %1341  ;;  %v1405_v2 = vmul.f32 %v4361_v9, %v1381_v55  ;;  %v4402_v5 = vadd.f32 %v4355_v8, %v1381_v55 }
 0x274   : > { %v1422_v61 = vadd.f32 %v4366_v31, %v1400_v1  ;;  %v1838_v62 = vsel %vm881_vm1, %v4391_v54, -inf  ;;  %v1382_v37 = vadd.f32 %v1342_v60, %v4269_v41  ;;  %v1336_v14 = vpop.permute.xlu1 %1335 }
 0x275   : > { %v1850_v12 = vmax.f32 %v1848_v50, %v1849_v57  ;;  %v1839_v13 = vmax.f32 %v1837_v10, %v1838_v62  ;;  %v1427_v11 = vadd.f32 %v4366_v31, %v1405_v2  ;;  %v1379_v17 = vadd.f32 %v1336_v14, %v4266_v40 }
 0x276   : > { %v1547_v16 = vpack.c.bf16 %v1422_v61, %v1421_v58  ;;  %v1406_v20 = vmul.f32 %v4361_v9, %v1382_v37  ;;  %v4409_v23 = vadd.f32 %v4357_v25, %v1382_v37  ;;  %v1864_v29 = vsel %vm881_vm1, %v4402_v5, -inf }
 0x277   : > { %v1851_v18 = vrot.slane %v1850_v12, 2  ;;  %v1840_v19 = vrot.slane %v1839_v13, 4  ;;  %v1338_v24 = vpop.permute.xlu0 %1337  ;;  %v1403_v43 = vmul.f32 %v4361_v9, %v1379_v17  ;;  %v4415_v41 = vadd.f32 %v4355_v8, %v1379_v17 }
 0x278   : > { %v1380_v26 = vadd.f32 %v1338_v24, %v4274_v48  ;;  %2896 = vmatprep.mubr.msk.bf16.mxu1 %vm881_vm1, %v1547_v16  ;;  %v1428_v34 = vadd.f32 %v4366_v31, %v1406_v20  ;;  %v1865_v0 = vsel %vm881_vm1, %v4409_v23, -inf  ;;  %v1348_v38 = vpop.permute.xlu1 %1347 }
 0x279   : > { %v1852_v40 = vmax.f32 %v1850_v12, %v1851_v18  ;;  %v1841_v27 = vmax.f32 %v1839_v13, %v1840_v19  ;;  %2897 = vmatmul.mubr.msk.bf16.vlgmr.msra.gmra.mrb[4].mxu1 %vm881_vm1, %v1548_v33  ;;  %v1866_v36 = vmax.f32 %v1864_v29, %v1865_v0  ;;  %v1425_v42 = vadd.f32 %v4366_v31, %v1403_v43 }
 0x27a   : > { %v1404_v6 = vmul.f32 %v4361_v9, %v1380_v26  ;;  %v1550_v48 = vpack.c.bf16 %v1428_v34, %v1427_v11  ;;  %v4426_v47 = vadd.f32 %v4357_v25, %v1380_v26  ;;  %v1385_v32 = vadd.f32 %v1348_v38, %v4284_v63 }
 0x27b   : > { %v1853_v46 = vrot.slane %v1852_v40, 1  ;;  %v1842_v45 = vrot.slane %v1841_v27, 2  ;;  %v1350_v49 = vpop.permute.xlu0 %1349  ;;  %v1867_v7 = vrot.slane %v1866_v36, 4  ;;  %v1855_v55 = vsel %vm881_vm1, %v4415_v41, -inf }
 0x27c   : > { %v1426_v50 = vadd.f32 %v4366_v31, %v1404_v6  ;;  %v1386_v53 = vadd.f32 %v1350_v49, %v4289_v4  ;;  %v1856_v57 = vsel %vm881_vm1, %v4426_v47, -inf  ;;  %v1409_v61 = vmul.f32 %v4361_v9, %v1385_v32  ;;  %v1344_v62 = vpop.permute.xlu1 %1343 }
 0x27d   : > { %v1854_v33 = vmax.f32 %v1852_v40, %v1853_v46  ;;  %v1843_v1 = vmax.f32 %v1841_v27, %v1842_v45  ;;  %v1868_v58 = vmax.f32 %v1866_v36, %v1867_v7  ;;  %v1857_v60 = vmax.f32 %v1855_v55, %v1856_v57 }
 0x27e   : > { %v1549_v10 = vpack.c.bf16 %v1426_v50, %v1425_v42  ;;  %v4439_v4 = vadd.f32 %v4355_v8, %v1385_v32  ;;  %v4442_v14 = vadd.f32 %v4366_v31, %v1409_v61  ;;  %v1410_v16 = vmul.f32 %v4361_v9, %v1386_v53 }
 0x27f   : > { %v1911_v2 = vsub.f32 %v4370_v28, %v1854_v33  ;;  %v1912_v63 = vsub.f32 %v4375_v39, %v1854_v33  ;;  %v1844_v12 = vrot.slane %v1843_v1, 1  ;;  %v1869_v13 = vrot.slane %v1868_v58, 2  ;;  %v1346_v0 = vpop.permute.xlu0 %1345 }
 0x280   : > { %v1858_v37 = vrot.slane %v1857_v60, 4  ;;  %2900 = vmatprep.mubr.msk.bf16.mxu1 %vm881_vm1, %v1549_v10  ;;  %v1882_v28 = vsel %vm881_vm1, %v4439_v4, -inf  ;;  %v4450_v20 = vadd.f32 %v4366_v31, %v1410_v16  ;;  %v4453_v24 = vadd.f32 %v4357_v25, %v1386_v53 }
 0x281   : > { %v1929_v11 = vmul.f32 1.442695, %v1911_v2  ;;  %v1931_v17 = vmul.f32 1.442695, %v1912_v63  ;;  %v1845_v18 = vmax.f32 %v1843_v1, %v1844_v12  ;;  %2901 = vmatmul.mubr.msk.bf16.gmra.mrb[8].mxu1 %vm881_vm1, %v1550_v48  ;;  %v1870_v39 = vmax.f32 %v1868_v58, %v1869_v13  ;;  %v1352_v38 = vpop.permute.xlu1 %1351 }
 0x282   : > { %v1859_v19 = vmax.f32 %v1857_v60, %v1858_v37  ;;  %v1383_v26 = vadd.f32 %v1344_v62, %v4286_v3  ;;  %v1552_v34 = vpack.c.bf16 %v4450_v20, %v4442_v14  ;;  %v1883_v6 = vsel %vm881_vm1, %v4453_v24, -inf }
 0x283   : > { %3084 = vpow2.f32 %v1929_v11  ;;  %v1909_v29 = vsub.f32 %v4387_v51, %v1845_v18  ;;  %v1910_v43 = vsub.f32 %v4391_v54, %v1845_v18  ;;  %v1871_v40 = vrot.slane %v1870_v39, 1  ;;  %v1354_v12 = vpop.permute.xlu0 %1353 }
 0x284   : > { %3086 = vpow2.f32 %v1931_v17  ;;  %v1860_v27 = vrot.slane %v1859_v19, 2  ;;  %v1407_v46 = vmul.f32 %v4361_v9, %v1383_v26  ;;  %v1884_v54 = vmax.f32 %v1882_v28, %v1883_v6 }
 0x285   : > { %v1925_v36 = vmul.f32 1.442695, %v1909_v29  ;;  %v1927_v42 = vmul.f32 1.442695, %v1910_v43  ;;  %v1872_v51 = vmax.f32 %v1870_v39, %v1871_v40  ;;  %v4464_v3 = vadd.f32 %v4355_v8, %v1383_v26  ;;  %v1356_v11 = vpop.permute.xlu1 %1355 }
 0x286   : > { %v1861_v45 = vmax.f32 %v1859_v19, %v1860_v27  ;;  %v1429_v48 = vadd.f32 %v4366_v31, %v1407_v46  ;;  %v1384_v49 = vadd.f32 %v1346_v0, %v4293_v15  ;;  %v1387_v7 = vadd.f32 %v1352_v38, %v4305_v21 }
 0x287   : > { %3088 = vpow2.f32 %v1925_v36  ;;  %v1915_v50 = vsub.f32 %v4402_v5, %v1872_v51  ;;  %v1916_v32 = vsub.f32 %v4409_v23, %v1872_v51  ;;  %v1885_v33 = vrot.slane %v1884_v54, 4 }
 0x288   : > { %3090 = vpow2.f32 %v1927_v42  ;;  %v1862_v53 = vrot.slane %v1861_v45, 1  ;;  %v1873_v1 = vsel %vm881_vm1, %v4464_v3, -inf  ;;  %v1408_v55 = vmul.f32 %v4361_v9, %v1384_v49 }
 0x289   : > { %v4475_v57 = vadd.f32 %v4357_v25, %v1384_v49  ;;  %v1937_v58 = vmul.f32 1.442695, %v1915_v50  ;;  %v1939_v10 = vmul.f32 1.442695, %v1916_v32  ;;  %v1411_v21 = vmul.f32 %v4361_v9, %v1387_v7 }
 0x28a   : > { %v1863_v15 = vmax.f32 %v1861_v45, %v1862_v53  ;;  %v1886_v60 = vmax.f32 %v1884_v54, %v1885_v33  ;;  %v1430_v5 = vadd.f32 %v4366_v31, %v1408_v55  ;;  %v4482_v61 = vadd.f32 %v4355_v8, %v1387_v7 }
 0x28b   : > { %v1874_v23 = vsel %vm881_vm1, %v4475_v57, -inf  ;;  %3092 = vpow2.f32 %v1937_v58  ;;  %v1433_v16 = vadd.f32 %v4366_v31, %v1411_v21  ;;  %v1388_v29 = vadd.f32 %v1354_v12, %v4312_v35 }
 0x28c   : > { %v1913_v62 = vsub.f32 %v4415_v41, %v1863_v15  ;;  %v1914_v2 = vsub.f32 %v4426_v47, %v1863_v15  ;;  %v1875_v63 = vmax.f32 %v1873_v1, %v1874_v23  ;;  %3094 = vpow2.f32 %v1939_v10 }
 0x28d   : > { %v4486_v13 = vpop.eup %3084  ;;  %v1887_v37 = vrot.slane %v1886_v60, 2  ;;  %v1551_v14 = vpack.c.bf16 %v1430_v5, %v1429_v48  ;;  %v1891_v20 = vsel %vm881_vm1, %v4482_v61, -inf  ;;  %v1389_v40 = vadd.f32 %v1356_v11, %v4302_v30 }
 0x28e   : > { %v4489_v17 = vpop.eup %3086  ;;  %v1966_v18 = vsel %vm881_vm1, %v4486_v13, 0.0  ;;  %v1933_v28 = vmul.f32 1.442695, %v1913_v62  ;;  %v1935_v39 = vmul.f32 1.442695, %v1914_v2  ;;  %v1876_v41 = vrot.slane %v1875_v63, 4 }
 0x28f   : > { %v1967_v47 = vsel %vm881_vm1, %v4489_v17, 0.0  ;;  %v1888_v19 = vmax.f32 %v1886_v60, %v1887_v37  ;;  %2904 = vmatprep.mubr.msk.bf16.mxu1 %vm881_vm1, %v1551_v14  ;;  %v1412_v38 = vmul.f32 %v4361_v9, %v1388_v29  ;;  %v4505_v36 = vadd.f32 %v4357_v25, %v1388_v29  ;;  %v1358_v29 = vpop.permute.xlu0 %1357 }
 0x290   : > { %v1968_v43 = vadd.f32 %v1967_v47, %v1966_v18  ;;  %3096 = vpow2.f32 %v1933_v28  ;;  %v1877_v26 = vmax.f32 %v1875_v63, %v1876_v41  ;;  %2905 = vmatmul.mubr.msk.bf16.gmra.mrb[12].mxu1 %vm881_vm1, %v1552_v34  ;;  %v1413_v30 = vmul.f32 %v4361_v9, %v1389_v40 }
 0x291   : > { %v4501_v27 = vpop.eup %3088  ;;  %3098 = vpow2.f32 %v1935_v39  ;;  %v1889_v0 = vrot.slane %v1888_v19, 1  ;;  %v1434_v45 = vadd.f32 %v4366_v31, %v1412_v38  ;;  %v1892_v54 = vsel %vm881_vm1, %v4505_v36, -inf }
 0x292   : > { %v4507_v42 = vpop.eup %3090  ;;  %v1969_v35 = vrot.slane %v1968_v43, 4  ;;  %v1957_v6 = vsel %vm881_vm1, %v4501_v27, 0.0  ;;  %v1878_v46 = vrot.slane %v1877_v26, 2  ;;  %v1893_v50 = vmax.f32 %v1891_v20, %v1892_v54 }
 0x293   : > { %v1958_v34 = vsel %vm881_vm1, %v4507_v42, 0.0  ;;  %v1890_v51 = vmax.f32 %v1888_v19, %v1889_v0  ;;  %v1553_v33 = vpack.c.bf16 %v1434_v45, %v1433_v16  ;;  %v4520_v1 = vadd.f32 %v4366_v31, %v1413_v30 }
 0x294   : > { %v1970_v48 = vadd.f32 %v1969_v35, %v1968_v43  ;;  %v1959_v49 = vadd.f32 %v1958_v34, %v1957_v6  ;;  %v1879_v7 = vmax.f32 %v1877_v26, %v1878_v46  ;;  %v1894_v21 = vrot.slane %v1893_v50, 4 }
 0x295   : > { %v1919_v32 = vsub.f32 %v4439_v4, %v1890_v51  ;;  %v1920_v53 = vsub.f32 %v4453_v24, %v1890_v51  ;;  %v4522_v55 = vpop.eup %3092  ;;  %v4529_v4 = vadd.f32 %v4355_v8, %v1389_v40  ;;  %2908 = vmatprep.mubr.msk.bf16.mxu1 %vm881_vm1, %v1553_v33  ;;  %v1390_v34 = vadd.f32 %v1358_v29, %v4307_v22 }
 0x296   : > { %v1971_v58 = vrot.slane %v1970_v48, 2  ;;  %v1960_v10 = vrot.slane %v1959_v49, 4  ;;  %v1880_v15 = vrot.slane %v1879_v7, 1  ;;  %v4524_v60 = vpop.eup %3094  ;;  %v1984_v5 = vsel %vm881_vm1, %v4522_v55, 0.0 }
 0x297   : > { %v1945_v23 = vmul.f32 1.442695, %v1919_v32  ;;  %v1947_v62 = vmul.f32 1.442695, %v1920_v53  ;;  %v1985_v63 = vsel %vm881_vm1, %v4524_v60, 0.0  ;;  %v1895_v14 = vmax.f32 %v1893_v50, %v1894_v21 }
 0x298   : > { %v1972_v24 = vadd.f32 %v1971_v58, %v1970_v48  ;;  %v1961_v2 = vadd.f32 %v1960_v10, %v1959_v49  ;;  %v1881_v12 = vmax.f32 %v1879_v7, %v1880_v15  ;;  %v1986_v37 = vadd.f32 %v1985_v63, %v1984_v5 }
 0x299   : > { %3100 = vpow2.f32 %v1945_v23  ;;  %v1900_v16 = vsel %vm881_vm1, %v4529_v4, -inf  ;;  %v1896_v20 = vrot.slane %v1895_v14, 2  ;;  %v1414_v49 = vmul.f32 %v4361_v9, %v1390_v34 }
 0x29a   : > { %v3097_v11 = vpop.eup %3096  ;;  %v1973_v18 = vrot.slane %v1972_v24, 1  ;;  %v1962_v28 = vrot.slane %v1961_v2, 2  ;;  %3102 = vpow2.f32 %v1947_v62  ;;  %v1917_v8 = vsub.f32 %v4464_v3, %v1881_v12  ;;  %v4543_v3 = vpop.permute.xlu1 %2031 }
 0x29b   : > { %v4537_v39 = vpop.eup %3098  ;;  %v1987_v41 = vrot.slane %v1986_v37, 4  ;;  %v1975_v47 = vsel %vm881_vm1, %v3097_v11, 0.0  ;;  %v1918_v19 = vsub.f32 %v4475_v57, %v1881_v12  ;;  %v1897_v46 = vmax.f32 %v1895_v14, %v1896_v20 }
 0x29c   : > { %v1974_v43 = vadd.f32 %v1973_v18, %v1972_v24  ;;  %v1963_v26 = vadd.f32 %v1962_v28, %v1961_v2  ;;  %v1976_v40 = vsel %vm881_vm1, %v4537_v39, 0.0  ;;  %v1941_v0 = vmul.f32 1.442695, %v1917_v8 }
 0x29d   : > { %v1988_v38 = vadd.f32 %v1987_v41, %v1986_v37  ;;  %v1977_v35 = vadd.f32 %v1976_v40, %v1975_v47  ;;  %v1943_v6 = vmul.f32 1.442695, %v1918_v19  ;;  %v2037_v57 = vmul.f32 %v4501_v27, %v4543_v3  ;;  %v4572_v41 = vpop.permute.xlu0 %2033 }
 0x29e   : > { %3104 = vrcp.f32 %v1974_v43  ;;  %v1964_v30 = vrot.slane %v1963_v26, 1  ;;  %v1898_v54 = vrot.slane %v1897_v46, 1  ;;  %v4550_v7 = vadd.f32 %v4357_v25, %v1390_v34 }
 0x29f   : > { %v1989_v51 = vrot.slane %v1988_v38, 2  ;;  %v1978_v45 = vrot.slane %v1977_v35, 4  ;;  %3106 = vpow2.f32 %v1941_v0  ;;  %v2039_v22 = vmul.f32 %v4486_v13, %v4543_v3 }
 0x2a0   : > { %v1965_v48 = vadd.f32 %v1964_v30, %v1963_v26  ;;  %3108 = vpow2.f32 %v1943_v6  ;;  %v1899_v53 = vmax.f32 %v1897_v46, %v1898_v54  ;;  %v1436_v27 = vadd.f32 %v4366_v31, %v1414_v49 }
 0x2a1   : > { %v1990_v50 = vadd.f32 %v1989_v51, %v1988_v38  ;;  %v1979_v32 = vadd.f32 %v1978_v45, %v1977_v35  ;;  %v1901_v33 = vsel %vm881_vm1, %v4550_v7, -inf  ;;  %v2041_v58 = vmul.f32 %v3097_v11, %v4543_v3 }
 0x2a2   : > { %3110 = vrcp.f32 %v1965_v48  ;;  %v1921_v25 = vsub.f32 %v4482_v61, %v1899_v53  ;;  %v1922_v21 = vsub.f32 %v4505_v36, %v1899_v53  ;;  %v1554_v13 = vpack.c.bf16 %v1436_v27, %v4520_v1 }
 0x2a3   : > { %v3101_v10 = vpop.eup %3100  ;;  %v1991_v15 = vrot.slane %v1990_v50, 1  ;;  %v1980_v9 = vrot.slane %v1979_v32, 2  ;;  %v1902_v62 = vmax.f32 %v1900_v16, %v1901_v33  ;;  %v2043_v31 = vmul.f32 %v4522_v55, %v4543_v3 }
 0x2a4   : > { %v3103_v5 = vpop.eup %3102  ;;  %v2002_v23 = vsel %vm881_vm1, %v3101_v10, 0.0  ;;  %v1949_v12 = vmul.f32 1.442695, %v1921_v25  ;;  %v1951_v14 = vmul.f32 1.442695, %v1922_v21  ;;  %v2047_v61 = vmul.f32 %v3101_v10, %v4543_v3  ;;  %2909 = vmatmul.mubr.msk.bf16.gmra.mrb[16].mxu1 %vm881_vm1, %v1554_v13 }
 0x2a5   : > { %v1992_v24 = vadd.f32 %v1991_v15, %v1990_v50  ;;  %v1981_v2 = vadd.f32 %v1980_v9, %v1979_v32  ;;  %v2003_v63 = vsel %vm881_vm1, %v3103_v5, 0.0  ;;  %v1903_v11 = vrot.slane %v1902_v62, 4 }
 0x2a6   : > { %v2004_v37 = vadd.f32 %v2003_v63, %v2002_v23  ;;  %v2053_v1 = vsel %vm881_vm1, %v2037_v57, 0.0  ;;  %v2062_v16 = vsel %vm881_vm1, %v2039_v22, 0.0  ;;  %v2071_v8 = vsel %vm881_vm1, %v2041_v58, 0.0 }
 0x2a7   : > { %3112 = vrcp.f32 %v1992_v24  ;;  %v1982_v36 = vrot.slane %v1981_v2, 1  ;;  %v1904_v28 = vmax.f32 %v1902_v62, %v1903_v11  ;;  %v2080_v20 = vsel %vm881_vm1, %v2043_v31, 0.0 }
 0x2a8   : > { %v4569_v18 = vpop.eup %3104  ;;  %v2005_v55 = vrot.slane %v2004_v37, 4  ;;  %3114 = vpow2.f32 %v1949_v12  ;;  %v4576_v29 = vsel %vm881_vm1, %v2047_v61, 0.0  ;;  %v2038_v6 = vmul.f32 %v4507_v42, %v4572_v41 }
 0x2a9   : > { %v3107_v47 = vpop.eup %3106  ;;  %v1983_v19 = vadd.f32 %v1982_v36, %v1981_v2  ;;  %3116 = vpow2.f32 %v1951_v14  ;;  %v1905_v0 = vrot.slane %v1904_v28, 2  ;;  %v2040_v46 = vmul.f32 %v4489_v17, %v4572_v41 }
 0x2aa   : > { %v3109_v43 = vpop.eup %3108  ;;  %v2006_v26 = vadd.f32 %v2005_v55, %v2004_v37  ;;  %v1993_v40 = vsel %vm881_vm1, %v3107_v47, 0.0  ;;  %v2045_v38 = vmul.f32 %v3107_v47, %v4543_v3  ;;  %v2042_v54 = vmul.f32 %v4537_v39, %v4572_v41 }
 0x2ab   : > { %3118 = vrcp.f32 %v1983_v19  ;;  %v1994_v35 = vsel %vm881_vm1, %v3109_v43, 0.0  ;;  %v1906_v51 = vmax.f32 %v1904_v28, %v1905_v0  ;;  %v2044_v48 = vmul.f32 %v4524_v60, %v4572_v41 }
 0x2ac   : > { %v4585_v30 = vpop.eup %3110  ;;  %v2007_v34 = vrot.slane %v2006_v26, 2  ;;  %v1995_v57 = vadd.f32 %v1994_v35, %v1993_v40  ;;  %v2089_v45 = vsel %vm881_vm1, %v2045_v38, 0.0  ;;  %v2046_v49 = vmul.f32 %v3109_v43, %v4572_v41 }
 0x2ad   : > { %v2048_v42 = vmul.f32 %v3103_v5, %v4572_v41  ;;  %v1907_v17 = vrot.slane %v1906_v51, 1  ;;  %v2054_v53 = vsel %vm881_vm1, %v2038_v6, 0.0  ;;  %v2063_v27 = vsel %vm881_vm1, %v2040_v46, 0.0 }
 0x2ae   : > { %v2008_v50 = vadd.f32 %v2007_v34, %v2006_v26  ;;  %v1996_v32 = vrot.slane %v1995_v57, 4  ;;  %v2055_v22 = vadd.f32 %v2054_v53, %v2053_v1  ;;  %v2072_v33 = vsel %vm881_vm1, %v2042_v54, 0.0 }
 0x2af   : > { %v2081_v58 = vsel %vm881_vm1, %v2044_v48, 0.0  ;;  %v1908_v15 = vmax.f32 %v1906_v51, %v1907_v17  ;;  %v2064_v60 = vadd.f32 %v2063_v27, %v2062_v16  ;;  %v2073_v21 = vadd.f32 %v2072_v33, %v2071_v8 }
 0x2b0   : > { %v2009_v39 = vrot.slane %v2008_v50, 1  ;;  %v1997_v10 = vadd.f32 %v1996_v32, %v1995_v57  ;;  %v2056_v25 = vrot.slane %v2055_v22, 4  ;;  %v2082_v5 = vadd.f32 %v2081_v58, %v2080_v20 }
 0x2b1   : > { %v4598_v9 = vpop.eup %3112  ;;  %v2090_v23 = vsel %vm881_vm1, %v2046_v49, 0.0  ;;  %v1923_v24 = vsub.f32 %v4529_v4, %v1908_v15  ;;  %v1924_v2 = vsub.f32 %v4550_v7, %v1908_v15  ;;  %v2065_v11 = vrot.slane %v2064_v60, 4 }
 0x2b2   : > { %v3115_v13 = vpop.eup %3114  ;;  %v2010_v62 = vadd.f32 %v2009_v39, %v2008_v50  ;;  %v1998_v31 = vrot.slane %v1997_v10, 2  ;;  %v2057_v14 = vadd.f32 %v2056_v25, %v2055_v22  ;;  %v2074_v43 = vrot.slane %v2073_v21, 4 }
 0x2b3   : > { %v3117_v63 = vpop.eup %3116  ;;  %v2011_v12 = vsel %vm881_vm1, %v3115_v13, 0.0  ;;  %v2049_v37 = vmul.f32 %v3115_v13, %v4543_v3  ;;  %v1953_v1 = vmul.f32 1.442695, %v1923_v24  ;;  %v1955_v28 = vmul.f32 1.442695, %v1924_v2 }
 0x2b4   : > { %3120 = vrcp.f32 %v2010_v62  ;;  %v1999_v61 = vadd.f32 %v1998_v31, %v1997_v10  ;;  %v2012_v36 = vsel %vm881_vm1, %v3117_v63, 0.0  ;;  %v2050_v7 = vmul.f32 %v3117_v63, %v4572_v41 }
 0x2b5   : > { %v4606_v16 = vpop.eup %3118  ;;  %v2013_v55 = vadd.f32 %v2012_v36, %v2011_v12  ;;  %v2107_v4 = vsel %vm881_vm1, %v2049_v37, 0.0  ;;  %3122 = vpow2.f32 %v1953_v1  ;;  %v2058_v47 = vrot.slane %v2057_v14, 2 }
 0x2b6   : > { %v2000_v8 = vrot.slane %v1999_v61, 1  ;;  %v2066_v19 = vadd.f32 %v2065_v11, %v2064_v60  ;;  %3124 = vpow2.f32 %v1955_v28  ;;  %v2083_v26 = vrot.slane %v2082_v5, 4 }
 0x2b7   : > { %v2014_v20 = vrot.slane %v2013_v55, 4  ;;  %v2059_v0 = vadd.f32 %v2058_v47, %v2057_v14  ;;  %v2091_v35 = vadd.f32 %v2090_v23, %v2089_v45  ;;  %v2075_v46 = vadd.f32 %v2074_v43, %v2073_v21 }
 0x2b8   : > { %v2001_v40 = vadd.f32 %v2000_v8, %v1999_v61  ;;  %v2067_v38 = vrot.slane %v2066_v19, 2  ;;  %v2084_v34 = vadd.f32 %v2083_v26, %v2082_v5  ;;  %v2099_v57 = vsel %vm881_vm1, %v2048_v42, 0.0 }
 0x2b9   : > { %v2015_v6 = vadd.f32 %v2014_v20, %v2013_v55  ;;  %v2060_v51 = vrot.slane %v2059_v0, 1  ;;  %v2092_v48 = vrot.slane %v2091_v35, 4  ;;  %v2076_v50 = vrot.slane %v2075_v46, 2 }
 0x2ba   : > { %3126 = vrcp.f32 %v2001_v40  ;;  %v2068_v54 = vadd.f32 %v2067_v38, %v2066_v19  ;;  %v2085_v32 = vrot.slane %v2084_v34, 2  ;;  %v2100_v17 = vadd.f32 %v2099_v57, %v4576_v29 }
 0x2bb   : > { %v2016_v49 = vrot.slane %v2015_v6, 2  ;;  %v2061_v53 = vadd.f32 %v2060_v51, %v2059_v0  ;;  %v2093_v27 = vadd.f32 %v2092_v48, %v2091_v35  ;;  %v2108_v45 = vsel %vm881_vm1, %v2050_v7, 0.0 }
 0x2bc   : > { %v2069_v22 = vrot.slane %v2068_v54, 1  ;;  %v2077_v58 = vadd.f32 %v2076_v50, %v2075_v46  ;;  %v2086_v39 = vadd.f32 %v2085_v32, %v2084_v34  ;;  %v2101_v42 = vrot.slane %v2100_v17, 4 }
 0x2bd   : > { %v2017_v33 = vadd.f32 %v2016_v49, %v2015_v6  ;;  %v2094_v60 = vrot.slane %v2093_v27, 2  ;;  %v2109_v25 = vadd.f32 %v2108_v45, %v2107_v4  ;;  %v2133_v21 = vmul.f32 %v4585_v30, %v2061_v53 }
 0x2be   : > { %v3121_v10 = vpop.eup %3120  ;;  %v2070_v15 = vadd.f32 %v2069_v22, %v2068_v54  ;;  %v2078_v23 = vrot.slane %v2077_v58, 1  ;;  %v2087_v29 = vrot.slane %v2086_v39, 1  ;;  %v2102_v13 = vadd.f32 %v2101_v42, %v2100_v17 }
 0x2bf   : > { %v2018_v5 = vrot.slane %v2017_v33, 1  ;;  %v3123_v62 = vpop.eup %3122  ;;  %v2095_v31 = vadd.f32 %v2094_v60, %v2093_v27  ;;  %v2110_v24 = vrot.slane %v2109_v25, 4 }
 0x2c0   : > { %v2134_v2 = vmul.f32 %v4569_v18, %v2070_v15  ;;  %v3125_v63 = vpop.eup %3124  ;;  %v2020_v37 = vsel %vm881_vm1, %v3123_v62, 0.0  ;;  %v2051_v14 = vmul.f32 %v3123_v62, %v4543_v3  ;;  %v2079_v11 = vadd.f32 %v2078_v23, %v2077_v58  ;;  %v3132_v62 = vld [vmem:[%s3981_s26 + $0x78] sm:$0xff]  ;;  %s2768_s26 = sshll.u32 %s3975_s23, 2 }
 0x2c1   : > { %v2019_v12 = vadd.f32 %v2018_v5, %v2017_v33  ;;  %v2021_v61 = vsel %vm881_vm1, %v3125_v63, 0.0  ;;  %v2052_v30 = vmul.f32 %v3125_v63, %v4572_v41  ;;  %v2088_v36 = vadd.f32 %v2087_v29, %v2086_v39  ;;  %s4641_s18 = scalar_lea.vmem [#allocation16], %s2768_s26  ;;  %s3520_s26 = smov [#allocation14]  }
 0x2c2   : > { %v2096_v1 = vrot.slane %v2095_v31, 1  ;;  %v2022_v55 = vadd.f32 %v2021_v61, %v2020_v37  ;;  %v2116_v28 = vsel %vm881_vm1, %v2051_v14, 0.0  ;;  %v2103_v4 = vrot.slane %v2102_v13, 2  ;;  %s3315_s17 = sshll.u32 %s3520_s26, 4  ;;  %s3316_s17 = int_to_ptr.vmem [resolvable:$false] %s3315_s17 }
 0x2c3   : > { %3128 = vrcp.f32 %v2019_v12  ;;  %v2111_v8 = vadd.f32 %v2110_v24, %v2109_v25  ;;  %v2117_v47 = vsel %vm881_vm1, %v2052_v30, 0.0  ;;  %v2135_v19 = vmul.f32 %v4606_v16, %v2079_v11  ;;  %s3317_s27 = scalar_lea.vmem %s3316_s17, 4096  ;;  %p3318_p12 = scmp.lt.s32.totalorder %s4704_s19, %s3316_s17 }
 0x2c4   : > { %v3127_v18 = vpop.eup %3126  ;;  %v2097_v7 = vadd.f32 %v2096_v1, %v2095_v31  ;;  %v2023_v3 = vrot.slane %v2022_v55, 4  ;;  %v2104_v20 = vadd.f32 %v2103_v4, %v2102_v13  ;;  %v2118_v43 = vadd.f32 %v2117_v47, %v2116_v28  ;;  %p3319_p13 = scmp.lt.s32.totalorder %s3317_s27, %s3311_s6 }
 0x2c5   : > { %v2136_v26 = vmul.f32 %v4598_v9, %v2088_v36  ;;  %v2112_v41 = vrot.slane %v2111_v8, 2  ;;  %v2158_v0 = vsel %vm2157_vm3, %v2134_v2, %v2133_v21  ;;  %v2808_v21 = vld [vmem:[%s4994_s8] ss:$0 sm:$0xff]  ;;  %v2379_v31 = vmul.f32 %v3132_v62, %v3132_v62  ;;  %s2485_s8 = sshll.u32 %s4641_s18, 4  ;;  %s4720_s8 = int_to_ptr.vmem [resolvable:$true] %s2485_s8 }
 0x2c6   : > { %v2137_v40 = vmul.f32 %v3127_v18, %v2097_v7  ;;  %v2024_v38 = vadd.f32 %v2023_v3, %v2022_v55  ;;  %v2105_v35 = vrot.slane %v2104_v20, 1  ;;  %v2119_v6 = vrot.slane %v2118_v43, 4  ;;  %p3320_p9 = por %p3319_p13, %p3318_p12 }
 0x2c7   : > { %v2160_v46 = vsel %vm2159_vm4, %v2135_v19, %v2158_v0  ;;  %v2113_v34 = vadd.f32 %v2112_v41, %v2111_v8  ;;  %v2284_v24 = vrot.slane %v4178_v44, 4  ;;  %v2409_v2 = vsel %vm1051_vm2, %v2379_v31, 0.0  ;;  %v1703_v0 = vpop.permute.xlu0 %1702 }
 0x2c8   : > { %v2162_v57 = vsel %vm2161_vm5, %v2136_v26, %v2160_v46  ;;  %v2025_v51 = vrot.slane %v2024_v38, 2  ;;  %v2106_v16 = vadd.f32 %v2105_v35, %v2104_v20  ;;  %v2120_v49 = vadd.f32 %v2119_v6, %v2118_v43  ;;  %v4647_v6 = vld [vmem:[%s4995_s10] ss:$0 sm:$0xff]  ;;  %s4999_s10 = smov %s4998_s1  ;;  %p3321_p10 = pnand %p3320_p9, %p3314_p0 }
 0x2c9   : > { %v2164_v54 = vsel %vm2163_vm6, %v2137_v40, %v2162_v57  ;;  %v2114_v48 = vrot.slane %v2113_v34, 1  ;;  %v2285_v63 = vadd.f32 %v2284_v24, %v4178_v44  ;;  %v2321_v12 = vrot.slane %v4187_v52, 4 }
 0x2ca   : > { %v2026_v9 = vadd.f32 %v2025_v51, %v2024_v38  ;;  %v2138_v50 = vmul.f32 %v3121_v10, %v2106_v16  ;;  %v2121_v27 = vrot.slane %v2120_v49, 2  ;;  %v2807_v10 = vld [vmem:[%s4993_s11] ss:$0 sm:$0xff]  ;;  %v2410_v37 = vadd.f32 %v2409_v2, %v4189_v56  ;;  %s2823_s11 = sshll.u32 %s4694_s28, 6 }
 0x2cb   : > { %v2115_v32 = vadd.f32 %v2114_v48, %v2113_v34  ;;  %v2358_v14 = vrot.slane %v4192_v59, 4  ;;  %v2286_v11 = vrot.slane %v2285_v63, 2  ;;  %v2322_v61 = vmin.f32 %v4187_v52, %v2321_v12  ;;  %v1713_v46 = vpop.permute.xlu0 %1712  ;;  %s4718_s5 = scalar_lea.hbm %s5000_s15, %s2823_s11 }
 0x2cc   : > { %v2027_v53 = vrot.slane %v2026_v9, 1  ;;  %v2166_v22 = vsel %vm2165_vm7, %v2138_v50, %v2164_v54  ;;  %v2122_v39 = vadd.f32 %v2121_v27, %v2120_v49  ;;  %v2411_v30 = vrot.slane %v2410_v37, 4 }
 0x2cd   : > { %v3129_v17 = vpop.eup %3128  ;;  %v2359_v36 = vmax.f32 %v4192_v59, %v2358_v14  ;;  %v2323_v1 = vrot.slane %v2322_v61, 2  ;;  %v2287_v4 = vadd.f32 %v2286_v11, %v2285_v63  ;;  %v1698_v59 = vpop.permute.xlu1 %1697 }
 0x2ce   : > { %v2139_v45 = vmul.f32 %v3129_v17, %v2115_v32  ;;  %v2028_v33 = vadd.f32 %v2027_v53, %v2026_v9  ;;  %v2123_v42 = vrot.slane %v2122_v39, 1  ;;  %v2412_v55 = vadd.f32 %v2411_v30, %v2410_v37 }
 0x2cf   : > { %v2360_v28 = vrot.slane %v2359_v36, 2  ;;  %v2324_v18 = vmin.f32 %v2322_v61, %v2323_v1  ;;  %v2288_v44 = vrot.slane %v2287_v4, 1 }
 0x2d0   : > { %v2168_v58 = vsel %vm2167_vm8, %v2139_v45, %v2166_v22  ;;  %3130 = vrcp.f32 %v2028_v33  ;;  %v2124_v15 = vadd.f32 %v2123_v42, %v2122_v39  ;;  %v2413_v7 = vrot.slane %v2412_v55, 2  ;;  %v1723_v22 = vpop.permute.xlu0 %1722 }
 0x2d1   : > { %v2361_v8 = vmax.f32 %v2359_v36, %v2360_v28  ;;  %v2325_v47 = vrot.slane %v2324_v18, 1  ;;  %v2289_v3 = vadd.f32 %v2288_v44, %v2287_v4  ;;  %v1708_v35 = vpop.permute.xlu1 %1707 }
 0x2d2   : > { %v2414_v19 = vadd.f32 %v2413_v7, %v2412_v55 }
 0x2d3   : > { %v2362_v56 = vrot.slane %v2361_v8, 1  ;;  %v2326_v20 = vmin.f32 %v2324_v18, %v2325_v47 }
 0x2d4   : > { %v2415_v43 = vrot.slane %v2414_v19, 1 }
 0x2d5   : > { %v2363_v52 = vmax.f32 %v2361_v8, %v2362_v56  ;;  %v2418_v41 = vsel %vm2417_vm10, %v2289_v3, %v2326_v20  ;;  %v1718_v50 = vpop.permute.xlu1 %1717 }
 0x2d6   : > { %v2416_v26 = vadd.f32 %v2415_v43, %v2414_v19 }
 0x2d7   : > { %v2420_v40 = vsel %vm2419_vm11, %v2418_v41, %v2363_v52 }
 0x2d8   : > { %v2422_v38 = vsel %vm2421_vm12, %v2420_v40, %v2416_v26 }
 0x2d9   : > { %2424 = vst.msk [vmem:[%s4641_s18] sm:$0xf] %vm2423_vm13, %v2422_v38  ;;  %v1728_v39 = vpop.permute.xlu1 %1727 }
 0x2da   : > { %v3131_v60 = vpop.eup %3130 }
 0x2db   : > { %v2140_v25 = vmul.f32 %v3131_v60, %v2124_v15 }
 0x2dd   : > { %v2170_v5 = vsel %vm2169_vm9, %v2140_v25, %v2168_v58  ;;  %v1738_v62 = vpop.permute.xlu1 %1737 }
 0x2de   : > { %v2172_v23 = vmul.f32 %v2807_v10, %v2170_v5 }
 0x2e0   : > { %v2179_v29 = vadd.f32 %v2808_v21, %v2172_v23  ;;  %v1733_v21 = vpop.permute.xlu0 %1732 }
 0x2e1   : > { %v1748_v12 = vpop.permute.xlu1 %1747 }
 0x2e2   : > { %v2184_v13 = vpack.c.bf16 %v2179_v29, %v2179_v29 }
 0x2e4   : > { %2917 = vmatmul.mubr.msk.bf16.vlgmr.msra.gmra.mrb[20].mxu0 %vm881_vm1, %v2184_v13  ;;  %v1743_v31 = vpop.permute.xlu0 %1742 }
 0x2e5   : > { %v1758_v18 = vpop.permute.xlu1 %1757 }
 0x2e8   : > { %v1753_v36 = vpop.permute.xlu0 %1752 }
 0x2e9   : > { %v1768_v19 = vpop.permute.xlu1 %1767 }
 0x2ec   : > { %v1763_v7 = vpop.permute.xlu0 %1762 }
 0x34c   : > { %v2898_v34 = vpop.f32.mrb[4].mxu1 }
 0x34d   : > { %v1641_v57 = vadd.f32 %v2898_v34, %v4647_v6  ;;  %v1632_v51 = vpop.f32.mrb[5].mxu1 }
 0x34e   : > { %v1633_v16 = vadd.f32 %v4647_v6, %v1632_v51  ;;  %v2899_v54 = vpop.f32.mrb[6].mxu1 }
 0x34f   : > { %v1777_v48 = vmul.f32 %v1708_v35, %v1641_v57  ;;  %v1644_v49 = vadd.f32 %v2899_v54, %v4647_v6  ;;  %v1635_v9 = vpop.f32.mrb[7].mxu1 }
 0x350   : > { %v1775_v32 = vmul.f32 %v1698_v59, %v1633_v16  ;;  %v1636_v17 = vadd.f32 %v4647_v6, %v1635_v9  ;;  %v1773_v59 = vpop.permute.xlu0 %1772 }
 0x351   : > { %1793 = vst.msk [vmem:[%s4655_s4 + $0x10] sm:$0xff] %vm1051_vm2, %v1777_v48  ;;  %v1778_v53 = vmul.f32 %v1713_v46, %v1644_v49 }
 0x352   : > { %1791 = vst.msk [vmem:[%s4655_s4] sm:$0xff] %vm1051_vm2, %v1775_v32  ;;  %v1776_v27 = vmul.f32 %v1703_v0, %v1636_v17 }
 0x353   : > { %1794 = vst.msk [vmem:[%s4655_s4 + $0x18] sm:$0xff] %vm1051_vm2, %v1778_v53 }
 0x354   : > { %1792 = vst.msk [vmem:[%s4655_s4 + $0x8] sm:$0xff] %vm1051_vm2, %v1776_v27  ;;  %v2902_v45 = vpop.f32.mrb[8].mxu1 }
 0x355   : > { %v1657_v33 = vadd.f32 %v2902_v45, %v4647_v6  ;;  %v1648_v58 = vpop.f32.mrb[9].mxu1 }
 0x356   : > { %v1649_v42 = vadd.f32 %v4647_v6, %v1648_v58  ;;  %v2903_v15 = vpop.f32.mrb[10].mxu1 }
 0x357   : > { %v1781_v60 = vmul.f32 %v1728_v39, %v1657_v33  ;;  %v1660_v25 = vadd.f32 %v2903_v15, %v4647_v6  ;;  %v1651_v10 = vpop.f32.mrb[11].mxu1 }
 0x358   : > { %v1779_v5 = vmul.f32 %v1718_v50, %v1649_v42  ;;  %v1652_v23 = vadd.f32 %v4647_v6, %v1651_v10 }
 0x359   : > { %1797 = vst.msk [vmem:[%s4655_s4 + $0x30] sm:$0xff] %vm1051_vm2, %v1781_v60  ;;  %v1782_v29 = vmul.f32 %v1733_v21, %v1660_v25 }
 0x35a   : > { %1795 = vst.msk [vmem:[%s4655_s4 + $0x20] sm:$0xff] %vm1051_vm2, %v1779_v5  ;;  %v1780_v13 = vmul.f32 %v1723_v22, %v1652_v23 }
 0x35b   : > { %1798 = vst.msk [vmem:[%s4655_s4 + $0x38] sm:$0xff] %vm1051_vm2, %v1782_v29 }
 0x35c   : > { %1796 = vst.msk [vmem:[%s4655_s4 + $0x28] sm:$0xff] %vm1051_vm2, %v1780_v13 }
 0x363   : > { %v2906_v24 = vpop.f32.mrb[12].mxu1 }
 0x364   : > { %v1673_v2 = vadd.f32 %v2906_v24, %v4647_v6  ;;  %v1664_v63 = vpop.f32.mrb[13].mxu1 }
 0x365   : > { %v1665_v37 = vadd.f32 %v4647_v6, %v1664_v63  ;;  %v2907_v14 = vpop.f32.mrb[14].mxu1 }
 0x366   : > { %v1785_v11 = vmul.f32 %v1748_v12, %v1673_v2  ;;  %v1676_v61 = vadd.f32 %v2907_v14, %v4647_v6  ;;  %v1667_v30 = vpop.f32.mrb[15].mxu1 }
 0x367   : > { %v1783_v1 = vmul.f32 %v1738_v62, %v1665_v37  ;;  %v1668_v55 = vadd.f32 %v4647_v6, %v1667_v30 }
 0x368   : > { %1801 = vst.msk [vmem:[%s4655_s4 + $0x50] sm:$0xff] %vm1051_vm2, %v1785_v11  ;;  %v1786_v28 = vmul.f32 %v1753_v36, %v1676_v61 }
 0x369   : > { %1799 = vst.msk [vmem:[%s4655_s4 + $0x40] sm:$0xff] %vm1051_vm2, %v1783_v1  ;;  %v1784_v4 = vmul.f32 %v1743_v31, %v1668_v55 }
 0x36a   : > { %1802 = vst.msk [vmem:[%s4655_s4 + $0x58] sm:$0xff] %vm1051_vm2, %v1786_v28 }
 0x36b   : > { %1800 = vst.msk [vmem:[%s4655_s4 + $0x48] sm:$0xff] %vm1051_vm2, %v1784_v4 }
 0x377   : > { %v2910_v8 = vpop.f32.mrb[16].mxu1 }
 0x378   : > { %v1689_v44 = vadd.f32 %v2910_v8, %v4647_v6  ;;  %v1680_v47 = vpop.f32.mrb[17].mxu1 }
 0x379   : > { %v1681_v56 = vadd.f32 %v4647_v6, %v1680_v47  ;;  %v2911_v3 = vpop.f32.mrb[18].mxu1 }
 0x37a   : > { %v1789_v20 = vmul.f32 %v1768_v19, %v1689_v44  ;;  %v1692_v43 = vadd.f32 %v2911_v3, %v4647_v6  ;;  %v1683_v52 = vpop.f32.mrb[19].mxu1 }
 0x37b   : > { %v1787_v26 = vmul.f32 %v1758_v18, %v1681_v56  ;;  %v1684_v41 = vadd.f32 %v4647_v6, %v1683_v52 }
 0x37c   : > { %1805 = vst.msk [vmem:[%s4655_s4 + $0x70] sm:$0xff] %vm1051_vm2, %v1789_v20  ;;  %v1790_v40 = vmul.f32 %v1773_v59, %v1692_v43 }
 0x37d   : > { %1803 = vst.msk [vmem:[%s4655_s4 + $0x60] sm:$0xff] %vm1051_vm2, %v1787_v26  ;;  %v1788_v0 = vmul.f32 %v1763_v7, %v1684_v41 }
 0x37e   : > { %1806 = vst.msk [vmem:[%s4655_s4 + $0x78] sm:$0xff] %vm1051_vm2, %v1790_v40 }
 0x37f   : > { %1804 = vst.msk [vmem:[%s4655_s4 + $0x68] sm:$0xff] %vm1051_vm2, %v1788_v0 }
 0x380   : > { %3324 = shalt.err (!%p3321_p10)
}
 0x381   : > { %s3325_s4 = scalar_lea.hbm %s4711_s2, 2048  ;;  %s3329_s9 = scalar_lea.hbm %s4999_s10, 8192 }
 0x382   : > { %p3326_p5 = scmp.ne.s32.totalorder %s4711_s2, %s3325_s4  ;;  %p3330_p1 = scmp.lt.u32.totalorder %s4711_s2, %s4999_s10 }
 0x383   : > { %p3331_p7 = scmp.lt.u32.totalorder %s3329_s9, %s3325_s4  ;;  %p3333_p3 = scmp.lt.u32.totalorder %s3325_s4, %s4711_s2 }
 0x384   : > { %p3327_p2 = pnand %p3326_p5, %p5001_p8 }
 0x385   : > { %p3332_p11 = por %p3331_p7, %p3330_p1 }
 0x386   : > { %p3328_p6 = pneg %p3327_p2 }
 0x387   : > { %p3334_p4 = por %p3333_p3, %p3332_p11 }
 0x389   : > { %p3335_p0 = pnand %p3334_p4, %p3328_p6 }
 0x38b   : > { %3338 = shalt.err (!%p3335_p0)
}
 0x38c   : > { %s3521_s6 = smov 128   ;;  %s3522_s17 = smov 8  }
 0x38d   : > { %2935 = dma.vmem_to_hbm [thread:$0]  (%p5001_p8), %s4704_s19, 2048, %s4711_s2, %s2431_s21, %s3521_s6, %s3521_s6, %s3522_s17  }
 0x38e   : > { %s3339_s27 = scalar_lea.vmem %s4720_s8, 64  ;;  %s3523_s4 = smov [#allocation16]  }
 0x38f   : > { %p3340_p12 = scmp.ne.s32.totalorder %s4720_s8, %s3339_s27  ;;  %s3343_s11 = sshll.u32 %s3523_s4, 4  ;;  %s3344_s11 = int_to_ptr.vmem [resolvable:$false] %s3343_s11 }
 0x390   : > { %s3345_s1 = scalar_lea.vmem %s3344_s11, 128  ;;  %p3346_p10 = scmp.lt.s32.totalorder %s4720_s8, %s3344_s11 }
 0x391   : > { %p3341_p13 = pnand %p3340_p12, %p5001_p8  ;;  %p3347_p5 = scmp.lt.s32.totalorder %s3345_s1, %s3339_s27 }
 0x393   : > { %p3342_p9 = pneg %p3341_p13  ;;  %p3348_p2 = por %p3347_p5, %p3346_p10 }
 0x395   : > { %p3349_p6 = pnand %p3348_p2, %p3342_p9 }
 0x397   : > { %3352 = shalt.err (!%p3349_p6)
}
 0x398   : > { %s3353_s19 = scalar_lea.hbm %s4718_s5, 64  ;;  %s3357_s18 = scalar_lea.hbm %s5000_s15, 256 }
 0x399   : > { %p3354_p1 = scmp.ne.s32.totalorder %s4718_s5, %s3353_s19  ;;  %p3358_p3 = scmp.lt.u32.totalorder %s4718_s5, %s5000_s15 }
 0x39a   : > { %p3359_p4 = scmp.lt.u32.totalorder %s3357_s18, %s3353_s19  ;;  %p3361_p12 = scmp.lt.u32.totalorder %s3353_s19, %s4718_s5 }
 0x39b   : > { %p3355_p7 = pnand %p3354_p1, %p5001_p8 }
 0x39c   : > { %p3360_p0 = por %p3359_p4, %p3358_p3 }
 0x39d   : > { %p3356_p11 = pneg %p3355_p7 }
 0x39e   : > { %p3362_p13 = por %p3361_p12, %p3360_p0 }
 0x3a0   : > { %p3363_p9 = pnand %p3362_p13, %p3356_p11 }
 0x3a2   : > { %3366 = shalt.err (!%p3363_p9)
}
 0x3a3   : > { %2936 = dma.vmem_to_hbm [thread:$0]  (%p5001_p8), %s4720_s8, 64, %s4718_s5, %s2431_s21   ;;  %v2249_v34 = vpop.permute.xlu1 %2248 }
 0x3a4   : > { %s2766_s17 = sshll.u32 %s3975_s23, 3  ;;  %s5002_s11 = sld [smem:[#allocation51_spill]] }
 0x3a5   : > { %s2817_s1 = sshll.u32 %s4694_s28, 7  ;;  %s820_s19 = scalar_lea.vmem [#allocation13], %s2766_s17 }
 0x3a6   : > { %s2451_s2 = sshll.u32 %s820_s19, 4  ;;  %s5003_s8 = sld [smem:[#allocation52_spill]]  ;;  %s4781_s2 = int_to_ptr.vmem [resolvable:$true] %s2451_s2 }
 0x3a7   : > { %s2426_s28 = scalar_lea.sflag [#allocation4], %s3975_s23  ;;  %s3367_s21 = scalar_lea.vmem %s4781_s2, 128 }
 0x3a8   : > { %p3368_p10 = scmp.ne.s32.totalorder %s4781_s2, %s3367_s21  ;;  %s3524_s18 = smov [#allocation13]  }
 0x3a9   : > { %s3371_s26 = sshll.u32 %s3524_s18, 4  ;;  %s3372_s26 = int_to_ptr.vmem [resolvable:$false] %s3371_s26 }
 0x3aa   : > { %v2809_v38 = vld [vmem:[%s5002_s11] ss:$0 sm:$0xff]  ;;  %p3369_p5 = pnand %p3368_p10, %p5001_p8  ;;  %s3373_s6 = scalar_lea.vmem %s3372_s26, 256 }
 0x3ab   : > { %p3374_p6 = scmp.lt.s32.totalorder %s4781_s2, %s3372_s26  ;;  %p3375_p1 = scmp.lt.s32.totalorder %s3373_s6, %s3367_s21 }
 0x3ac   : > { %s4779_s5 = scalar_lea.hbm %s5003_s8, %s2817_s1  ;;  %p3370_p2 = pneg %p3369_p5 }
 0x3ad   : > { %p3376_p7 = por %p3375_p1, %p3374_p6 }
 0x3af   : > { %p3377_p11 = pnand %p3376_p7, %p3370_p2 }
 0x3b7   : > { %v2241_v35 = vpop.f32.mrb[20].mxu0 }
 0x3b8   : > { %v2242_v6 = vadd.f32 %v2809_v38, %v2241_v35  ;;  %v2918_v46 = vpop.f32.mrb[21].mxu0 }
 0x3b9   : > { %v2244_v57 = vpop.f32.mrb[22].mxu0 }
 0x3ba   : > { %v2251_v51 = vmul.f32 %v2249_v34, %v2242_v6  ;;  %v2919_v16 = vpop.f32.mrb[23].mxu0 }
 0x3bc   : > { %2252 = vst.msk [vmem:[%s820_s19] sm:$0xff] %vm881_vm1, %v2251_v51 }
 0x3bd   : > { %3380 = shalt.err (!%p3377_p11)
}
 0x3be   : > { %s3381_s23 = scalar_lea.hbm %s4779_s5, 128  ;;  %s3385_s4 = scalar_lea.hbm %s5003_s8, 512 }
 0x3bf   : > { %p3382_p3 = scmp.ne.s32.totalorder %s4779_s5, %s3381_s23  ;;  %p3386_p12 = scmp.lt.u32.totalorder %s4779_s5, %s5003_s8 }
 0x3c0   : > { %p3387_p13 = scmp.lt.u32.totalorder %s3385_s4, %s3381_s23  ;;  %p3389_p10 = scmp.lt.u32.totalorder %s3381_s23, %s4779_s5 }
 0x3c1   : > { %p3383_p4 = pnand %p3382_p3, %p5001_p8 }
 0x3c2   : > { %p3388_p9 = por %p3387_p13, %p3386_p12 }
 0x3c3   : > { %p3384_p0 = pneg %p3383_p4 }
 0x3c4   : > { %p3390_p5 = por %p3389_p10, %p3388_p9 }
 0x3c6   : > { %p3391_p2 = pnand %p3390_p5, %p3384_p0 }
 0x3c8   : > { %3394 = shalt.err (!%p3391_p2)
}
 0x3c9   : > { %2934 = dma.vmem_to_hbm [thread:$0]  (%p5001_p8), %s4781_s2, 128, %s4779_s5, %s2426_s28  }
 0x3ca PF: > { %s5004_s19 = sld [smem:[#allocation24_spill]]  ;;  %s5005_s0 = sld [smem:[#allocation33_spill]] }
 0x3cb   : > { %p2973_p6 = scmp.ge.s32.totalorder %s3505_s3, 2 }
 0x3d0   : > { %s2497_s9 = sand.u32 1, %s5004_s19   ;;  %p5006_p1 = scmp.ne.s32.totalorder %s5005_s0, 0 }
 0x3d1   : > { %s2498_s21 = scalar_lea.sflag [#allocation4], %s2497_s9 }
 0x3d2   : > { %p2961_p7 = pnand %p2973_p6, %p5006_p1 }
 0x3d4   : > { %3456 = dma.done.wait (!%p2961_p7), %s2498_s21, 128  }
 0x3d5   : > { %3458 = vsyncadd (!%p2961_p7), %s2498_s21, 4294967168  ;;  %s5007_s18 = sadd.s32 4294967294, %s3505_s3  }
 0x3d6   : > { %s2506_s26 = sand.u32 1, %s5007_s18  }
 0x3d7   : > { %s2507_s6 = scalar_lea.sflag [#allocation15], %s2506_s26 }
 0x3d8   : > { %3460 = dma.done.wait (!%p2961_p7), %s2507_s6, 2112  }
 0x3d9   : > { %3462 = vsyncadd (!%p2961_p7), %s2507_s6, 4294965184  ;;  %s46_s3 = sadd.s32 1, %s3505_s3   ;;  %s5008_s0 = sld [smem:[#allocation23_spill]] }
 0x3da   : > { %p43_p8 = scmp.ge.s32.totalorder %s46_s3, 6   ;;  %s5009_s21 = sld [smem:[#allocation25_spill]] }
 0x3db   : > { %s5010_s2 = sld [smem:[#allocation28_spill]]  ;;  %s5011_s29 = sld [smem:[#allocation34_spill]] }
 0x3dc   : > { %s5012_s5 = smov %s5025_s30  ;;  %s5013_s30 = smov %s3473_s20 }
 0x3dd   : > { %s5014_s20 = smov %s3875_s24  ;;  %s5015_s1 = smov %s3485_s22 }
 0x3de   : > { %s5016_s22 = smov %s3880_s7  ;;  %s5017_s23 = smov %s3501_s25 }
 0x3df   : > { %s5019_s25 = smov %s5012_s5  ;;  %45 = sbr.rel (!%p43_p8) target bundleno = 37 (0x25), region = 225 }
 0x3e1   : > { %s5018_s24 = smov %s5011_s29 }
 0x3e6   :  { %2521 = vsyncpa [#allocation3], 1 }
 0x3e7   :  { %2523 = vsyncpa [#allocation3 + $0x1], 1 }
 0x3e8   :  { %2524 = vsyncpa [#allocation6], 1 }
 0x3e9   :  { %2526 = vsyncpa [#allocation6 + $0x1], 1 }
 0x3ea   :  { %2527 = vsyncpa [#allocation9], 1 }
 0x3eb   :  { %2529 = vsyncpa [#allocation9 + $0x1], 1 }
 0x3ec   :  { %2530 = vsyncpa [#allocation12], 1 }
 0x3ed   :  { %2531 = vsyncpa [#allocation4], 1 }
 0x3ee   :  { %2533 = vsyncpa [#allocation4 + $0x1], 1 }
 0x3ef   :  { %2534 = vsyncpa [#allocation15], 1 }
 0x3f0   :  { %2536 = vsyncpa [#allocation15 + $0x1], 1 }

</bundles_post_ra>
